<compile_context>
chip_gen: v5e
topology: v5e:2x2
jax: 0.10.0
libtpu: 0.0.40
codegen_flags: <defaults>
</compile_context>

<pallas_src>
import functools

import jax
import jax.numpy as jnp
from jax import lax
from jax.experimental import pallas as pl
from jax.experimental.pallas import tpu as pltpu

_EPS = 1e-5
_MM_DT = jnp.bfloat16   # MXU operand dtype; accumulation is always f32.

# Order in which the packed branch weights are passed to the fused kernel.
_PACK_ORDER = (
    "emb_w", "emb_b",
    "wqkv", "bqkv", "wo", "bo",
    "g1", "be1", "w1", "b1", "w2", "b2", "g2", "be2",
    "norm_g", "norm_b", "proj_w", "proj_b",
)


# ----------------------------------------------------------------------------
# Small in-kernel helpers
# ----------------------------------------------------------------------------
def _mm(a, b):
    """(M,K)@(K,N) on the MXU: bf16 operands, f32 accumulation."""
    return jnp.dot(a.astype(_MM_DT), b.astype(_MM_DT),
                   preferred_element_type=jnp.float32)


def _mm_nt(a, b):
    """a @ b.T (contract last dims of both operands), bf16 in / f32 out."""
    return lax.dot_general(a.astype(_MM_DT), b.astype(_MM_DT),
                           (((1,), (1,)), ((), ())),
                           preferred_element_type=jnp.float32)


def _ln(x, g, b):
    mu = jnp.mean(x, axis=-1, keepdims=True)
    xc = x - mu
    var = jnp.mean(xc * xc, axis=-1, keepdims=True)
    return xc * lax.rsqrt(var + _EPS) * g + b


# ----------------------------------------------------------------------------
# Fused branch kernel
# ----------------------------------------------------------------------------
def _dual_branch_kernel(
    x_ref,
    emb_w_ref, emb_b_ref,
    wqkv_ref, bqkv_ref, wo_ref, bo_ref,
    g1_ref, be1_ref, w1_ref, b1_ref, w2_ref, b2_ref, g2_ref, be2_ref,
    ng_ref, nb_ref, pw_ref, pb_ref,
    enc_ref, out_ref, attn_ref,
    ctx_scr,
    *, n_heads, n_layers, batch_block, revin,
):
    """Fused forward of one Dual branch for a block of `batch_block` elements."""
    Bb = batch_block
    x = x_ref[...].astype(jnp.float32)          # TS: (Bb, L, N); prompt: (Bb, Tp, D)

    if revin:
        # RevIN 'norm' (affine=False): statistics over the time axis (axis 1).
        mean = jnp.mean(x, axis=1, keepdims=True)                  # (Bb, 1, N)
        xc = x - mean
        std = jnp.sqrt(jnp.mean(xc * xc, axis=1, keepdims=True) + _EPS)
        tok3 = jnp.transpose(xc / std, (0, 2, 1))                  # (Bb, N, L)
    else:
        tok3 = x                                                   # (Bb, Tp, D)

    T = tok3.shape[1]                            # tokens per element after embedding
    tok = tok3.reshape(Bb * T, tok3.shape[2])    # batch folded into the matmul M dim

    # Embedding linear (length_to_feature / token_to_feature).
    h = _mm(tok, emb_w_ref[...]) + emb_b_ref[...]                  # (Bb*T, C)
    C = h.shape[1]
    H = n_heads
    dh = C // H
    scale = 1.0 / (dh ** 0.5)                    # FullAttention 1/sqrt(E)

    for l in range(n_layers):                    # static unroll over layers
        # --- fused QKV projection: one full-width MXU matmul, one bf16 cast ---
        qkv = (_mm(h, wqkv_ref[l]) + bqkv_ref[l]).astype(_MM_DT)   # (Bb*T, 3C)

        # --- per-(element, head) scores / softmax / A·V (tiny 2D matmuls);
        #     per-head contexts are assembled into a lane-dense VMEM slab so the
        #     output projection below is a single (Bb*T, C)@(C, C) matmul. ---
        for b in range(Bb):
            qkv_b = qkv[b * T:(b + 1) * T]                         # (T, 3C)
            for hd in range(H):
                q_h = qkv_b[:, hd * dh:(hd + 1) * dh]
                k_h = qkv_b[:, C + hd * dh:C + (hd + 1) * dh]
                v_h = qkv_b[:, 2 * C + hd * dh:2 * C + (hd + 1) * dh]
                s = _mm_nt(q_h, k_h) * scale                       # (T, T) f32
                m = jnp.max(s, axis=-1, keepdims=True)
                e = jnp.exp(s - m)
                a = e * pl.reciprocal(jnp.sum(e, axis=-1, keepdims=True),
                                      approx=True)
                if l == n_layers - 1:                              # output_attention
                    attn_ref[b, hd] = a
                ctx_scr[b * T:(b + 1) * T, hd * dh:(hd + 1) * dh] = _mm(a, v_h)

        # --- single full-width output projection over the assembled contexts ---
        attn_out = _mm(ctx_scr[...], wo_ref[l]) + bo_ref[l]        # (Bb*T, C)

        # --- residual + norm1 (dropout = identity in eval) ---
        xn1 = _ln(h + attn_out, g1_ref[l], be1_ref[l])
        # --- FFN: conv1d(kernel=1) == linear, relu ---
        f1 = jnp.maximum(_mm(xn1, w1_ref[l]) + b1_ref[l], 0.0)
        f2 = _mm(f1, w2_ref[l]) + b2_ref[l]
        # --- residual + norm2 ---
        h = _ln(xn1 + f2, g2_ref[l], be2_ref[l])

    # Encoder's final norm_layer.
    enc = _ln(h, ng_ref[...], nb_ref[...])
    enc_ref[...] = enc.reshape(Bb, T, C)

    # Output projection, lane-dense in pred_len: (Bb*T, C) @ (C, P).
    out = _mm(enc, pw_ref[...]) + pb_ref[...]                      # (Bb*T, P)
    out3 = out.reshape(Bb, T, out.shape[1])
    if revin:
        # RevIN 'denorm' per node: std/mean transposed to (Bb, N, 1).
        out3 = (out3 * jnp.transpose(std, (0, 2, 1))
                + jnp.transpose(mean, (0, 2, 1)))
    out_ref[...] = out3


# ----------------------------------------------------------------------------
# Host-side packing (run ONCE at model-load time, outside jit)
# ----------------------------------------------------------------------------
def _pack_branch(emb_w, emb_b, layers, norm_g, norm_b, proj_w, proj_b):
    """Stack per-layer weights, fuse QKV into a (E, C, 3C) slab with a lane-dense
    (E, 1, 3C) bias, keep wo as (E, C, C), keep proj_w as (C, P) (native
    K-contraction, lane-dense output) and cast matmul weights to bf16."""
    E = len(layers)
    C = emb_w.shape[1]
    Dff = layers[0]["w1"].shape[1]
    P = proj_w.shape[1]
    f32 = jnp.float32

    def st(k, dt=f32):
        return jnp.stack([lp[k] for lp in layers]).astype(dt)

    wqkv = jnp.concatenate([st("wq"), st("wk"), st("wv")], axis=-1)   # (E, C, 3C)
    bqkv = jnp.concatenate([st("bq"), st("bk"), st("bv")], axis=-1)   # (E, 3C)

    return dict(
        emb_w=emb_w.astype(_MM_DT),
        emb_b=emb_b.reshape(1, C).astype(f32),
        wqkv=wqkv.astype(_MM_DT),
        bqkv=bqkv.reshape(E, 1, 3 * C).astype(f32),
        wo=st("wo", _MM_DT),                       # (E, C, C): rows are (H, dh)-major
        bo=st("bo").reshape(E, 1, C),
        g1=st("g1").reshape(E, 1, C), be1=st("be1").reshape(E, 1, C),
        w1=st("w1", _MM_DT), b1=st("b1").reshape(E, 1, Dff),
        w2=st("w2", _MM_DT), b2=st("b2").reshape(E, 1, C),
        g2=st("g2").reshape(E, 1, C), be2=st("be2").reshape(E, 1, C),
        norm_g=norm_g.reshape(1, C).astype(f32),
        norm_b=norm_b.reshape(1, C).astype(f32),
        proj_w=proj_w.astype(_MM_DT),              # (C, P)
        proj_b=proj_b.reshape(1, P).astype(f32),
    )


def pack_params(params):
    """One-time packing of both branches (call eagerly at load time)."""
    return dict(
        ts=_pack_branch(params["l2f_w"], params["l2f_b"], params["ts_layers"],
                        params["ts_norm_g"], params["ts_norm_b"],
                        params["ts_proj_w"], params["ts_proj_b"]),
        prompt=_pack_branch(params["t2f_w"], params["t2f_b"], params["prompt_layers"],
                            params["p_norm_g"], params["p_norm_b"],
                            params["p_proj_w"], params["p_proj_b"]),
    )


# ----------------------------------------------------------------------------
# pallas_call wrapper
# ----------------------------------------------------------------------------
def _const_index_map(ndim):
    return lambda i: (0,) * ndim


def _run_branch(tokens_in, packed, *, n_heads, revin, batch_block=None):
    """One fused pallas_call per branch: (B, rows, cols) -> (enc, out, attn)."""
    B, rows, cols = tokens_in.shape
    T = cols if revin else rows               # token count after embedding
    C = packed["norm_g"].shape[1]
    P = packed["proj_w"].shape[1]
    H = n_heads
    E = packed["wqkv"].shape[0]

    if batch_block is None:
        # >= 2 grid steps when possible so the "parallel" axis can still split
        # across v7x's two TensorCores; batching amortizes per-step overhead.
        batch_block = B // 2 if (B % 2 == 0 and B >= 2) else 1
    if B % batch_block:
        batch_block = 1
    Bb = batch_block

    kernel = functools.partial(
        _dual_branch_kernel, n_heads=H, n_layers=E, batch_block=Bb, revin=revin)

    weight_args = [packed[k] for k in _PACK_ORDER]
    in_specs = [pl.BlockSpec((Bb, rows, cols), lambda i: (i, 0, 0))]
    # Weights: fully VMEM-resident, constant block index (DMA'd once).
    in_specs += [pl.BlockSpec(w.shape, _const_index_map(w.ndim))
                 for w in weight_args]

    out_shape = (
        jax.ShapeDtypeStruct((B, T, C), jnp.float32),     # encoder output
        jax.ShapeDtypeStruct((B, T, P), jnp.float32),     # projected output (lane-dense P)
        jax.ShapeDtypeStruct((B, H, T, T), jnp.float32),  # last layer attention
    )
    out_specs = (
        pl.BlockSpec((Bb, T, C), lambda i: (i, 0, 0)),
        pl.BlockSpec((Bb, T, P), lambda i: (i, 0, 0)),
        pl.BlockSpec((Bb, H, T, T), lambda i: (i, 0, 0, 0)),
    )

    return pl.pallas_call(
        kernel,
        out_shape=out_shape,
        grid=(B // Bb,),
        in_specs=in_specs,
        out_specs=out_specs,
        scratch_shapes=[pltpu.VMEM((Bb * T, C), jnp.float32)],   # per-head ctx slab
        compiler_params=pltpu.CompilerParams(
            # Batch blocks are independent -> v7x's 2 TensorCores split them.
            dimension_semantics=("parallel",),
            # 48 MiB fits every generation (v7x has 64 MiB/TC).  At production
            # d_llm=768, raise toward ~100 MiB on v5e/v6e so all layers stay
            # resident; on v7x stream layer weights instead (see TODO above).
            vmem_limit_bytes=48 * 1024 * 1024,
        ),
    )(tokens_in, *weight_args)


# ----------------------------------------------------------------------------
# Parameter init (deterministic, synthetic, PyTorch-shaped)
# ----------------------------------------------------------------------------
def init_params(key, *, channel, seq_len, pred_len, d_llm, e_layer):
    C, L, P, D = channel, seq_len, pred_len, d_llm
    Dff = 4 * d_llm
    keys = iter(jax.random.split(key, 256))

    def w(shape, scale=0.05):
        return (scale * jax.random.normal(next(keys), shape)).astype(jnp.float32)

    def layer_params():
        return dict(
            wq=w((C, C)), bq=w((C,)), wk=w((C, C)), bk=w((C,)),
            wv=w((C, C)), bv=w((C,)), wo=w((C, C)), bo=w((C,)),
            g1=jnp.ones((C,), jnp.float32), be1=jnp.zeros((C,), jnp.float32),
            w1=w((C, Dff)), b1=w((Dff,)),
            w2=w((Dff, C)), b2=w((C,)),
            g2=jnp.ones((C,), jnp.float32), be2=jnp.zeros((C,), jnp.float32),
        )

    return dict(
        l2f_w=w((L, C)), l2f_b=w((C,)),          # length_to_feature
        t2f_w=w((D, C)), t2f_b=w((C,)),          # token_to_feature
        ts_layers=[layer_params() for _ in range(e_layer)],
        prompt_layers=[layer_params() for _ in range(e_layer)],
        ts_norm_g=jnp.ones((C,), jnp.float32), ts_norm_b=jnp.zeros((C,), jnp.float32),
        p_norm_g=jnp.ones((C,), jnp.float32), p_norm_b=jnp.zeros((C,), jnp.float32),
        ts_proj_w=w((C, P)), ts_proj_b=w((P,)),
        p_proj_w=w((C, P)), p_proj_b=w((P,)),
    )


# ----------------------------------------------------------------------------
# Dual.forward (takes the pre-packed weights; packing is NOT re-run per call)
# ----------------------------------------------------------------------------
def dual_forward(packed, x, prompt_emb, *, n_heads):
    """JAX/Pallas equivalent of Dual.forward (prompt_emb is not None path)."""
    # TODO(synk): the prompt_emb=None fast path of the module (prompt outputs = None) is not implemented here.
    # --- TS branch: RevIN norm -> permute -> embed -> encoder -> proj -> denorm ---
    ts_enc, ts_out_tp, ts_att = _run_branch(
        x.astype(jnp.float32), packed["ts"], n_heads=n_heads, revin=True)

    # --- Prompt branch ---
    pe = prompt_emb.astype(jnp.float32)
    # torch's `.squeeze()` would also drop a size-1 batch dim; only drop an extra
    # singleton axis (e.g. (B, 1, T, D)) and keep the (B, T, D) layout.
    if pe.ndim == 4 and pe.shape[1] == 1:
        pe = pe[:, 0]
    prompt_enc, prompt_out_tp, p_att = _run_branch(
        pe, packed["prompt"], n_heads=n_heads, revin=False)

    # Kernel emits (B, T, P) lane-dense; permute to the module's (B, P, T) layout.
    ts_out = jnp.transpose(ts_out_tp, (0, 2, 1))
    prompt_out = jnp.transpose(prompt_out_tp, (0, 2, 1))

    # Last layer's attention averaged over the batch (tiny, done in plain JAX).
    ts_att_avg = jnp.mean(ts_att, axis=0)                 # (H, N, N)
    prompt_att_avg = jnp.mean(p_att, axis=0)              # (H, Tp, Tp)

    return ts_enc, prompt_enc, ts_out, prompt_out, ts_att_avg, prompt_att_avg


# ----------------------------------------------------------------------------
if __name__ == "__main__":
    # Small shapes consistent with the module's forward.
    B = 2           # batch
    N = 8           # num_nodes
    L = 16          # seq_len
    P = 16          # pred_len
    C = 32          # channel (d_model)
    D_LLM = 32      # d_llm
    HEAD = 4        # heads (C % HEAD == 0)
    E_LAYER = 1
    T_PROMPT = 8    # prompt token count

    key = jax.random.PRNGKey(0)
    k_param, k_x, k_p = jax.random.split(key, 3)

    params = init_params(
        k_param, channel=C, seq_len=L, pred_len=P, d_llm=D_LLM, e_layer=E_LAYER
    )
    # Pack / cast / fuse weights once, outside the jitted forward.
    packed = jax.block_until_ready(pack_params(params))

    x = jax.random.normal(k_x, (B, L, N), dtype=jnp.float32)            # ts input
    prompt_emb = jax.random.normal(k_p, (B, T_PROMPT, D_LLM), dtype=jnp.float32)

    fwd = jax.jit(functools.partial(dual_forward, n_heads=HEAD))
    outs = jax.block_until_ready(fwd(packed, x, prompt_emb))

    ts_enc, prompt_enc, ts_out, prompt_out, ts_att_avg, prompt_att_avg = outs
    assert ts_enc.shape == (B, N, C)
    assert prompt_enc.shape == (B, T_PROMPT, C)
    assert ts_out.shape == (B, P, N)
    assert prompt_out.shape == (B, P, T_PROMPT)
    assert ts_att_avg.shape == (HEAD, N, N)
    assert prompt_att_avg.shape == (HEAD, T_PROMPT, T_PROMPT)
    assert all(bool(jnp.all(jnp.isfinite(o))) for o in outs)

    print("KERNEL_OK")
</pallas_src>

<mosaic_0001>
module attributes {stable_mosaic.version = 11 : i64} {
  func.func @_dual_branch_kernel(%arg0: i32, %arg1: memref<1x16x8xf32, #tpu.memory_space<vmem>>, %arg2: memref<16x32xbf16, #tpu.memory_space<vmem>>, %arg3: memref<1x32xf32, #tpu.memory_space<vmem>>, %arg4: memref<1x32x96xbf16, #tpu.memory_space<vmem>>, %arg5: memref<1x1x96xf32, #tpu.memory_space<vmem>>, %arg6: memref<1x32x32xbf16, #tpu.memory_space<vmem>>, %arg7: memref<1x1x32xf32, #tpu.memory_space<vmem>>, %arg8: memref<1x1x32xf32, #tpu.memory_space<vmem>>, %arg9: memref<1x1x32xf32, #tpu.memory_space<vmem>>, %arg10: memref<1x32x128xbf16, #tpu.memory_space<vmem>>, %arg11: memref<1x1x128xf32, #tpu.memory_space<vmem>>, %arg12: memref<1x128x32xbf16, #tpu.memory_space<vmem>>, %arg13: memref<1x1x32xf32, #tpu.memory_space<vmem>>, %arg14: memref<1x1x32xf32, #tpu.memory_space<vmem>>, %arg15: memref<1x1x32xf32, #tpu.memory_space<vmem>>, %arg16: memref<1x32xf32, #tpu.memory_space<vmem>>, %arg17: memref<1x32xf32, #tpu.memory_space<vmem>>, %arg18: memref<32x16xbf16, #tpu.memory_space<vmem>>, %arg19: memref<1x16xf32, #tpu.memory_space<vmem>>, %arg20: memref<1x8x32xf32, #tpu.memory_space<vmem>>, %arg21: memref<1x8x16xf32, #tpu.memory_space<vmem>>, %arg22: memref<1x4x8x8xf32, #tpu.memory_space<vmem>>, %arg23: memref<8x32xf32, #tpu.memory_space<vmem>>) attributes {dimension_semantics = [#tpu.dimension_semantics<parallel>], iteration_bounds = array<i64: 2>, scalar_prefetch = 0 : i64, scratch_operands = 1 : i64, tpu.core_type = #tpu.core_type<tc>, window_params = [{transform_indices = @transform_0, window_bounds = array<i64: 1, 16, 8>}, {pipeline_mode = #tpu.pipeline_mode<synchronous>, transform_indices = @transform_1, window_bounds = array<i64: 16, 32>}, {pipeline_mode = #tpu.pipeline_mode<synchronous>, transform_indices = @transform_2, window_bounds = array<i64: 1, 32>}, {pipeline_mode = #tpu.pipeline_mode<synchronous>, transform_indices = @transform_3, window_bounds = array<i64: 1, 32, 96>}, {pipeline_mode = #tpu.pipeline_mode<synchronous>, transform_indices = @transform_4, window_bounds = array<i64: 1, 1, 96>}, {pipeline_mode = #tpu.pipeline_mode<synchronous>, transform_indices = @transform_5, window_bounds = array<i64: 1, 32, 32>}, {pipeline_mode = #tpu.pipeline_mode<synchronous>, transform_indices = @transform_6, window_bounds = array<i64: 1, 1, 32>}, {pipeline_mode = #tpu.pipeline_mode<synchronous>, transform_indices = @transform_7, window_bounds = array<i64: 1, 1, 32>}, {pipeline_mode = #tpu.pipeline_mode<synchronous>, transform_indices = @transform_8, window_bounds = array<i64: 1, 1, 32>}, {pipeline_mode = #tpu.pipeline_mode<synchronous>, transform_indices = @transform_9, window_bounds = array<i64: 1, 32, 128>}, {pipeline_mode = #tpu.pipeline_mode<synchronous>, transform_indices = @transform_10, window_bounds = array<i64: 1, 1, 128>}, {pipeline_mode = #tpu.pipeline_mode<synchronous>, transform_indices = @transform_11, window_bounds = array<i64: 1, 128, 32>}, {pipeline_mode = #tpu.pipeline_mode<synchronous>, transform_indices = @transform_12, window_bounds = array<i64: 1, 1, 32>}, {pipeline_mode = #tpu.pipeline_mode<synchronous>, transform_indices = @transform_13, window_bounds = array<i64: 1, 1, 32>}, {pipeline_mode = #tpu.pipeline_mode<synchronous>, transform_indices = @transform_14, window_bounds = array<i64: 1, 1, 32>}, {pipeline_mode = #tpu.pipeline_mode<synchronous>, transform_indices = @transform_15, window_bounds = array<i64: 1, 32>}, {pipeline_mode = #tpu.pipeline_mode<synchronous>, transform_indices = @transform_16, window_bounds = array<i64: 1, 32>}, {pipeline_mode = #tpu.pipeline_mode<synchronous>, transform_indices = @transform_17, window_bounds = array<i64: 32, 16>}, {pipeline_mode = #tpu.pipeline_mode<synchronous>, transform_indices = @transform_18, window_bounds = array<i64: 1, 16>}, {transform_indices = @transform_19, window_bounds = array<i64: 1, 8, 32>}, {transform_indices = @transform_20, window_bounds = array<i64: 1, 8, 16>}, {transform_indices = @transform_21, window_bounds = array<i64: 1, 4, 8, 8>}]} {
    %c0 = arith.constant 0 : index
    %c0_0 = arith.constant 0 : index
    %c0_1 = arith.constant 0 : index
    %0 = vector.load %arg1[%c0, %c0_0, %c0_1] : memref<1x16x8xf32, #tpu.memory_space<vmem>>, vector<1x16x8xf32>
    %cst = arith.constant dense<0.000000e+00> : vector<1x8xf32>
    %1 = vector.multi_reduction <add>, %0, %cst [1] : vector<1x16x8xf32> to vector<1x8xf32>
    %2 = vector.shape_cast %1 : vector<1x8xf32> to vector<1x1x8xf32>
    %cst_2 = arith.constant 1.600000e+01 : f32
    %3 = vector.broadcast %cst_2 : f32 to vector<1x1x8xf32>
    %4 = arith.divf %2, %3 : vector<1x1x8xf32>
    %5 = vector.broadcast %4 : vector<1x1x8xf32> to vector<1x16x8xf32>
    %6 = arith.subf %0, %5 : vector<1x16x8xf32>
    %7 = arith.mulf %6, %6 : vector<1x16x8xf32>
    %cst_3 = arith.constant dense<0.000000e+00> : vector<1x8xf32>
    %8 = vector.multi_reduction <add>, %7, %cst_3 [1] : vector<1x16x8xf32> to vector<1x8xf32>
    %9 = vector.shape_cast %8 : vector<1x8xf32> to vector<1x1x8xf32>
    %cst_4 = arith.constant 1.600000e+01 : f32
    %10 = vector.broadcast %cst_4 : f32 to vector<1x1x8xf32>
    %11 = arith.divf %9, %10 : vector<1x1x8xf32>
    %cst_5 = arith.constant 9.99999974E-6 : f32
    %12 = vector.broadcast %cst_5 : f32 to vector<1x1x8xf32>
    %13 = arith.addf %11, %12 : vector<1x1x8xf32>
    %14 = math.sqrt %13 : vector<1x1x8xf32>
    %15 = vector.broadcast %14 : vector<1x1x8xf32> to vector<1x16x8xf32>
    %16 = arith.divf %6, %15 : vector<1x16x8xf32>
    %17 = tpu.transpose %16, [0, 2, 1] : vector<1x16x8xf32> -> vector<1x8x16xf32>
    %18 = vector.shape_cast %17 : vector<1x8x16xf32> to vector<8x16xf32>
    %c0_6 = arith.constant 0 : index
    %c0_7 = arith.constant 0 : index
    %19 = vector.load %arg2[%c0_6, %c0_7] : memref<16x32xbf16, #tpu.memory_space<vmem>>, vector<16x32xbf16>
    %20 = arith.truncf %18 : vector<8x16xf32> to vector<8x16xbf16>
    %cst_8 = arith.constant dense<0.000000e+00> : vector<8x32xf32>
    %21 = tpu.matmul %20, %19, %cst_8 {dimension_numbers = #tpu.dot_dimension_numbers<[1], [0], [0], [1], [0, 0, 1, 1], [], []>} : vector<8x16xbf16>, vector<16x32xbf16>, vector<8x32xf32> -> vector<8x32xf32>
    %c0_9 = arith.constant 0 : index
    %c0_10 = arith.constant 0 : index
    %22 = vector.load %arg3[%c0_9, %c0_10] : memref<1x32xf32, #tpu.memory_space<vmem>>, vector<1x32xf32>
    %23 = vector.broadcast %22 : vector<1x32xf32> to vector<8x32xf32>
    %24 = arith.addf %21, %23 : vector<8x32xf32>
    %c0_11 = arith.constant 0 : index
    %c0_12 = arith.constant 0 : index
    %c0_13 = arith.constant 0 : index
    %25 = vector.load %arg4[%c0_11, %c0_12, %c0_13] : memref<1x32x96xbf16, #tpu.memory_space<vmem>>, vector<1x32x96xbf16>
    %26 = vector.shape_cast %25 : vector<1x32x96xbf16> to vector<32x96xbf16>
    %27 = arith.truncf %24 : vector<8x32xf32> to vector<8x32xbf16>
    %cst_14 = arith.constant dense<0.000000e+00> : vector<8x96xf32>
    %28 = tpu.matmul %27, %26, %cst_14 {dimension_numbers = #tpu.dot_dimension_numbers<[1], [0], [0], [1], [0, 0, 1, 1], [], []>} : vector<8x32xbf16>, vector<32x96xbf16>, vector<8x96xf32> -> vector<8x96xf32>
    %c0_15 = arith.constant 0 : index
    %c0_16 = arith.constant 0 : index
    %c0_17 = arith.constant 0 : index
    %29 = vector.load %arg5[%c0_15, %c0_16, %c0_17] : memref<1x1x96xf32, #tpu.memory_space<vmem>>, vector<1x1x96xf32>
    %30 = vector.shape_cast %29 : vector<1x1x96xf32> to vector<1x96xf32>
    %31 = vector.broadcast %30 : vector<1x96xf32> to vector<8x96xf32>
    %32 = arith.addf %28, %31 : vector<8x96xf32>
    %33 = arith.truncf %32 : vector<8x96xf32> to vector<8x96xbf16>
    %34 = vector.extract_strided_slice %33 {offsets = [0, 0], sizes = [8, 8], strides = [1, 1]} : vector<8x96xbf16> to vector<8x8xbf16>
    %35 = vector.extract_strided_slice %33 {offsets = [0, 32], sizes = [8, 8], strides = [1, 1]} : vector<8x96xbf16> to vector<8x8xbf16>
    %36 = vector.extract_strided_slice %33 {offsets = [0, 64], sizes = [8, 8], strides = [1, 1]} : vector<8x96xbf16> to vector<8x8xbf16>
    %cst_18 = arith.constant dense<0.000000e+00> : vector<8x8xf32>
    %37 = tpu.matmul %34, %35, %cst_18 {dimension_numbers = #tpu.dot_dimension_numbers<[1], [1], [0], [0], [0, 0, 1, 0], [], []>} : vector<8x8xbf16>, vector<8x8xbf16>, vector<8x8xf32> -> vector<8x8xf32>
    %cst_19 = arith.constant 0.353553385 : f32
    %38 = vector.broadcast %cst_19 : f32 to vector<8x8xf32>
    %39 = arith.mulf %37, %38 : vector<8x8xf32>
    %cst_20 = arith.constant dense<0xFF800000> : vector<8xf32>
    %40 = vector.multi_reduction <maximumf>, %39, %cst_20 [1] : vector<8x8xf32> to vector<8xf32>
    %41 = vector.shape_cast %40 : vector<8xf32> to vector<8x1xf32>
    %42 = vector.broadcast %41 : vector<8x1xf32> to vector<8x8xf32>
    %43 = arith.subf %39, %42 : vector<8x8xf32>
    %44 = math.exp %43 : vector<8x8xf32>
    %cst_21 = arith.constant dense<0.000000e+00> : vector<8xf32>
    %45 = vector.multi_reduction <add>, %44, %cst_21 [1] : vector<8x8xf32> to vector<8xf32>
    %46 = vector.shape_cast %45 : vector<8xf32> to vector<8x1xf32>
    %47 = tpu.reciprocal %46 {approx = true} : vector<8x1xf32> -> vector<8x1xf32>
    %48 = vector.broadcast %47 : vector<8x1xf32> to vector<8x8xf32>
    %49 = arith.mulf %44, %48 : vector<8x8xf32>
    %c0_22 = arith.constant 0 : index
    %c0_23 = arith.constant 0 : index
    %c0_24 = arith.constant 0 : index
    %c0_25 = arith.constant 0 : index
    %50 = vector.load %arg22[%c0_22, %c0_23, %c0_24, %c0_25] : memref<1x4x8x8xf32, #tpu.memory_space<vmem>>, vector<1x1x8x8xf32>
    %51 = vector.shape_cast %50 : vector<1x1x8x8xf32> to vector<8x8xf32>
    %52 = vector.shape_cast %49 : vector<8x8xf32> to vector<1x1x8x8xf32>
    tpu.vector_store %arg22[%c0_22, %c0_23, %c0_24, %c0_25], %52 {strides = array<i32>} : memref<1x4x8x8xf32, #tpu.memory_space<vmem>>, vector<1x1x8x8xf32>,
    %53 = arith.truncf %49 : vector<8x8xf32> to vector<8x8xbf16>
    %cst_26 = arith.constant dense<0.000000e+00> : vector<8x8xf32>
    %54 = tpu.matmul %53, %36, %cst_26 {dimension_numbers = #tpu.dot_dimension_numbers<[1], [0], [0], [1], [0, 0, 1, 1], [], []>} : vector<8x8xbf16>, vector<8x8xbf16>, vector<8x8xf32> -> vector<8x8xf32>
    %c0_27 = arith.constant 0 : index
    %c0_28 = arith.constant 0 : index
    %55 = vector.load %arg23[%c0_27, %c0_28] : memref<8x32xf32, #tpu.memory_space<vmem>>, vector<8x8xf32>
    tpu.vector_store %arg23[%c0_27, %c0_28], %54 {strides = array<i32>} : memref<8x32xf32, #tpu.memory_space<vmem>>, vector<8x8xf32>,
    %56 = vector.extract_strided_slice %33 {offsets = [0, 8], sizes = [8, 8], strides = [1, 1]} : vector<8x96xbf16> to vector<8x8xbf16>
    %57 = vector.extract_strided_slice %33 {offsets = [0, 40], sizes = [8, 8], strides = [1, 1]} : vector<8x96xbf16> to vector<8x8xbf16>
    %58 = vector.extract_strided_slice %33 {offsets = [0, 72], sizes = [8, 8], strides = [1, 1]} : vector<8x96xbf16> to vector<8x8xbf16>
    %cst_29 = arith.constant dense<0.000000e+00> : vector<8x8xf32>
    %59 = tpu.matmul %56, %57, %cst_29 {dimension_numbers = #tpu.dot_dimension_numbers<[1], [1], [0], [0], [0, 0, 1, 0], [], []>} : vector<8x8xbf16>, vector<8x8xbf16>, vector<8x8xf32> -> vector<8x8xf32>
    %cst_30 = arith.constant 0.353553385 : f32
    %60 = vector.broadcast %cst_30 : f32 to vector<8x8xf32>
    %61 = arith.mulf %59, %60 : vector<8x8xf32>
    %cst_31 = arith.constant dense<0xFF800000> : vector<8xf32>
    %62 = vector.multi_reduction <maximumf>, %61, %cst_31 [1] : vector<8x8xf32> to vector<8xf32>
    %63 = vector.shape_cast %62 : vector<8xf32> to vector<8x1xf32>
    %64 = vector.broadcast %63 : vector<8x1xf32> to vector<8x8xf32>
    %65 = arith.subf %61, %64 : vector<8x8xf32>
    %66 = math.exp %65 : vector<8x8xf32>
    %cst_32 = arith.constant dense<0.000000e+00> : vector<8xf32>
    %67 = vector.multi_reduction <add>, %66, %cst_32 [1] : vector<8x8xf32> to vector<8xf32>
    %68 = vector.shape_cast %67 : vector<8xf32> to vector<8x1xf32>
    %69 = tpu.reciprocal %68 {approx = true} : vector<8x1xf32> -> vector<8x1xf32>
    %70 = vector.broadcast %69 : vector<8x1xf32> to vector<8x8xf32>
    %71 = arith.mulf %66, %70 : vector<8x8xf32>
    %c0_33 = arith.constant 0 : index
    %c1 = arith.constant 1 : index
    %c0_34 = arith.constant 0 : index
    %c0_35 = arith.constant 0 : index
    %72 = vector.load %arg22[%c0_33, %c1, %c0_34, %c0_35] : memref<1x4x8x8xf32, #tpu.memory_space<vmem>>, vector<1x1x8x8xf32>
    %73 = vector.shape_cast %72 : vector<1x1x8x8xf32> to vector<8x8xf32>
    %74 = vector.shape_cast %71 : vector<8x8xf32> to vector<1x1x8x8xf32>
    tpu.vector_store %arg22[%c0_33, %c1, %c0_34, %c0_35], %74 {strides = array<i32>} : memref<1x4x8x8xf32, #tpu.memory_space<vmem>>, vector<1x1x8x8xf32>,
    %75 = arith.truncf %71 : vector<8x8xf32> to vector<8x8xbf16>
    %cst_36 = arith.constant dense<0.000000e+00> : vector<8x8xf32>
    %76 = tpu.matmul %75, %58, %cst_36 {dimension_numbers = #tpu.dot_dimension_numbers<[1], [0], [0], [1], [0, 0, 1, 1], [], []>} : vector<8x8xbf16>, vector<8x8xbf16>, vector<8x8xf32> -> vector<8x8xf32>
    %c0_37 = arith.constant 0 : index
    %c8 = arith.constant 8 : index
    %77 = vector.load %arg23[%c0_37, %c8] : memref<8x32xf32, #tpu.memory_space<vmem>>, vector<8x8xf32>
    tpu.vector_store %arg23[%c0_37, %c8], %76 {strides = array<i32>} : memref<8x32xf32, #tpu.memory_space<vmem>>, vector<8x8xf32>,
    %78 = vector.extract_strided_slice %33 {offsets = [0, 16], sizes = [8, 8], strides = [1, 1]} : vector<8x96xbf16> to vector<8x8xbf16>
    %79 = vector.extract_strided_slice %33 {offsets = [0, 48], sizes = [8, 8], strides = [1, 1]} : vector<8x96xbf16> to vector<8x8xbf16>
    %80 = vector.extract_strided_slice %33 {offsets = [0, 80], sizes = [8, 8], strides = [1, 1]} : vector<8x96xbf16> to vector<8x8xbf16>
    %cst_38 = arith.constant dense<0.000000e+00> : vector<8x8xf32>
    %81 = tpu.matmul %78, %79, %cst_38 {dimension_numbers = #tpu.dot_dimension_numbers<[1], [1], [0], [0], [0, 0, 1, 0], [], []>} : vector<8x8xbf16>, vector<8x8xbf16>, vector<8x8xf32> -> vector<8x8xf32>
    %cst_39 = arith.constant 0.353553385 : f32
    %82 = vector.broadcast %cst_39 : f32 to vector<8x8xf32>
    %83 = arith.mulf %81, %82 : vector<8x8xf32>
    %cst_40 = arith.constant dense<0xFF800000> : vector<8xf32>
    %84 = vector.multi_reduction <maximumf>, %83, %cst_40 [1] : vector<8x8xf32> to vector<8xf32>
    %85 = vector.shape_cast %84 : vector<8xf32> to vector<8x1xf32>
    %86 = vector.broadcast %85 : vector<8x1xf32> to vector<8x8xf32>
    %87 = arith.subf %83, %86 : vector<8x8xf32>
    %88 = math.exp %87 : vector<8x8xf32>
    %cst_41 = arith.constant dense<0.000000e+00> : vector<8xf32>
    %89 = vector.multi_reduction <add>, %88, %cst_41 [1] : vector<8x8xf32> to vector<8xf32>
    %90 = vector.shape_cast %89 : vector<8xf32> to vector<8x1xf32>
    %91 = tpu.reciprocal %90 {approx = true} : vector<8x1xf32> -> vector<8x1xf32>
    %92 = vector.broadcast %91 : vector<8x1xf32> to vector<8x8xf32>
    %93 = arith.mulf %88, %92 : vector<8x8xf32>
    %c0_42 = arith.constant 0 : index
    %c2 = arith.constant 2 : index
    %c0_43 = arith.constant 0 : index
    %c0_44 = arith.constant 0 : index
    %94 = vector.load %arg22[%c0_42, %c2, %c0_43, %c0_44] : memref<1x4x8x8xf32, #tpu.memory_space<vmem>>, vector<1x1x8x8xf32>
    %95 = vector.shape_cast %94 : vector<1x1x8x8xf32> to vector<8x8xf32>
    %96 = vector.shape_cast %93 : vector<8x8xf32> to vector<1x1x8x8xf32>
    tpu.vector_store %arg22[%c0_42, %c2, %c0_43, %c0_44], %96 {strides = array<i32>} : memref<1x4x8x8xf32, #tpu.memory_space<vmem>>, vector<1x1x8x8xf32>,
    %97 = arith.truncf %93 : vector<8x8xf32> to vector<8x8xbf16>
    %cst_45 = arith.constant dense<0.000000e+00> : vector<8x8xf32>
    %98 = tpu.matmul %97, %80, %cst_45 {dimension_numbers = #tpu.dot_dimension_numbers<[1], [0], [0], [1], [0, 0, 1, 1], [], []>} : vector<8x8xbf16>, vector<8x8xbf16>, vector<8x8xf32> -> vector<8x8xf32>
    %c0_46 = arith.constant 0 : index
    %c16 = arith.constant 16 : index
    %99 = vector.load %arg23[%c0_46, %c16] : memref<8x32xf32, #tpu.memory_space<vmem>>, vector<8x8xf32>
    tpu.vector_store %arg23[%c0_46, %c16], %98 {strides = array<i32>} : memref<8x32xf32, #tpu.memory_space<vmem>>, vector<8x8xf32>,
    %100 = vector.extract_strided_slice %33 {offsets = [0, 24], sizes = [8, 8], strides = [1, 1]} : vector<8x96xbf16> to vector<8x8xbf16>
    %101 = vector.extract_strided_slice %33 {offsets = [0, 56], sizes = [8, 8], strides = [1, 1]} : vector<8x96xbf16> to vector<8x8xbf16>
    %102 = vector.extract_strided_slice %33 {offsets = [0, 88], sizes = [8, 8], strides = [1, 1]} : vector<8x96xbf16> to vector<8x8xbf16>
    %cst_47 = arith.constant dense<0.000000e+00> : vector<8x8xf32>
    %103 = tpu.matmul %100, %101, %cst_47 {dimension_numbers = #tpu.dot_dimension_numbers<[1], [1], [0], [0], [0, 0, 1, 0], [], []>} : vector<8x8xbf16>, vector<8x8xbf16>, vector<8x8xf32> -> vector<8x8xf32>
    %cst_48 = arith.constant 0.353553385 : f32
    %104 = vector.broadcast %cst_48 : f32 to vector<8x8xf32>
    %105 = arith.mulf %103, %104 : vector<8x8xf32>
    %cst_49 = arith.constant dense<0xFF800000> : vector<8xf32>
    %106 = vector.multi_reduction <maximumf>, %105, %cst_49 [1] : vector<8x8xf32> to vector<8xf32>
    %107 = vector.shape_cast %106 : vector<8xf32> to vector<8x1xf32>
    %108 = vector.broadcast %107 : vector<8x1xf32> to vector<8x8xf32>
    %109 = arith.subf %105, %108 : vector<8x8xf32>
    %110 = math.exp %109 : vector<8x8xf32>
    %cst_50 = arith.constant dense<0.000000e+00> : vector<8xf32>
    %111 = vector.multi_reduction <add>, %110, %cst_50 [1] : vector<8x8xf32> to vector<8xf32>
    %112 = vector.shape_cast %111 : vector<8xf32> to vector<8x1xf32>
    %113 = tpu.reciprocal %112 {approx = true} : vector<8x1xf32> -> vector<8x1xf32>
    %114 = vector.broadcast %113 : vector<8x1xf32> to vector<8x8xf32>
    %115 = arith.mulf %110, %114 : vector<8x8xf32>
    %c0_51 = arith.constant 0 : index
    %c3 = arith.constant 3 : index
    %c0_52 = arith.constant 0 : index
    %c0_53 = arith.constant 0 : index
    %116 = vector.load %arg22[%c0_51, %c3, %c0_52, %c0_53] : memref<1x4x8x8xf32, #tpu.memory_space<vmem>>, vector<1x1x8x8xf32>
    %117 = vector.shape_cast %116 : vector<1x1x8x8xf32> to vector<8x8xf32>
    %118 = vector.shape_cast %115 : vector<8x8xf32> to vector<1x1x8x8xf32>
    tpu.vector_store %arg22[%c0_51, %c3, %c0_52, %c0_53], %118 {strides = array<i32>} : memref<1x4x8x8xf32, #tpu.memory_space<vmem>>, vector<1x1x8x8xf32>,
    %119 = arith.truncf %115 : vector<8x8xf32> to vector<8x8xbf16>
    %cst_54 = arith.constant dense<0.000000e+00> : vector<8x8xf32>
    %120 = tpu.matmul %119, %102, %cst_54 {dimension_numbers = #tpu.dot_dimension_numbers<[1], [0], [0], [1], [0, 0, 1, 1], [], []>} : vector<8x8xbf16>, vector<8x8xbf16>, vector<8x8xf32> -> vector<8x8xf32>
    %c0_55 = arith.constant 0 : index
    %c24 = arith.constant 24 : index
    %121 = vector.load %arg23[%c0_55, %c24] : memref<8x32xf32, #tpu.memory_space<vmem>>, vector<8x8xf32>
    tpu.vector_store %arg23[%c0_55, %c24], %120 {strides = array<i32>} : memref<8x32xf32, #tpu.memory_space<vmem>>, vector<8x8xf32>,
    %c0_56 = arith.constant 0 : index
    %c0_57 = arith.constant 0 : index
    %122 = vector.load %arg23[%c0_56, %c0_57] : memref<8x32xf32, #tpu.memory_space<vmem>>, vector<8x32xf32>
    %c0_58 = arith.constant 0 : index
    %c0_59 = arith.constant 0 : index
    %c0_60 = arith.constant 0 : index
    %123 = vector.load %arg6[%c0_58, %c0_59, %c0_60] : memref<1x32x32xbf16, #tpu.memory_space<vmem>>, vector<1x32x32xbf16>
    %124 = vector.shape_cast %123 : vector<1x32x32xbf16> to vector<32x32xbf16>
    %125 = arith.truncf %122 : vector<8x32xf32> to vector<8x32xbf16>
    %cst_61 = arith.constant dense<0.000000e+00> : vector<8x32xf32>
    %126 = tpu.matmul %125, %124, %cst_61 {dimension_numbers = #tpu.dot_dimension_numbers<[1], [0], [0], [1], [0, 0, 1, 1], [], []>} : vector<8x32xbf16>, vector<32x32xbf16>, vector<8x32xf32> -> vector<8x32xf32>
    %c0_62 = arith.constant 0 : index
    %c0_63 = arith.constant 0 : index
    %c0_64 = arith.constant 0 : index
    %127 = vector.load %arg7[%c0_62, %c0_63, %c0_64] : memref<1x1x32xf32, #tpu.memory_space<vmem>>, vector<1x1x32xf32>
    %128 = vector.shape_cast %127 : vector<1x1x32xf32> to vector<1x32xf32>
    %129 = vector.broadcast %128 : vector<1x32xf32> to vector<8x32xf32>
    %130 = arith.addf %126, %129 : vector<8x32xf32>
    %131 = arith.addf %24, %130 : vector<8x32xf32>
    %c0_65 = arith.constant 0 : index
    %c0_66 = arith.constant 0 : index
    %c0_67 = arith.constant 0 : index
    %132 = vector.load %arg8[%c0_65, %c0_66, %c0_67] : memref<1x1x32xf32, #tpu.memory_space<vmem>>, vector<1x1x32xf32>
    %133 = vector.shape_cast %132 : vector<1x1x32xf32> to vector<1x32xf32>
    %c0_68 = arith.constant 0 : index
    %c0_69 = arith.constant 0 : index
    %c0_70 = arith.constant 0 : index
    %134 = vector.load %arg9[%c0_68, %c0_69, %c0_70] : memref<1x1x32xf32, #tpu.memory_space<vmem>>, vector<1x1x32xf32>
    %135 = vector.shape_cast %134 : vector<1x1x32xf32> to vector<1x32xf32>
    %cst_71 = arith.constant dense<0.000000e+00> : vector<8xf32>
    %136 = vector.multi_reduction <add>, %131, %cst_71 [1] : vector<8x32xf32> to vector<8xf32>
    %137 = vector.shape_cast %136 : vector<8xf32> to vector<8x1xf32>
    %cst_72 = arith.constant 3.200000e+01 : f32
    %138 = vector.broadcast %cst_72 : f32 to vector<8x1xf32>
    %139 = arith.divf %137, %138 : vector<8x1xf32>
    %140 = vector.broadcast %139 : vector<8x1xf32> to vector<8x32xf32>
    %141 = arith.subf %131, %140 : vector<8x32xf32>
    %142 = arith.mulf %141, %141 : vector<8x32xf32>
    %cst_73 = arith.constant dense<0.000000e+00> : vector<8xf32>
    %143 = vector.multi_reduction <add>, %142, %cst_73 [1] : vector<8x32xf32> to vector<8xf32>
    %144 = vector.shape_cast %143 : vector<8xf32> to vector<8x1xf32>
    %cst_74 = arith.constant 3.200000e+01 : f32
    %145 = vector.broadcast %cst_74 : f32 to vector<8x1xf32>
    %146 = arith.divf %144, %145 : vector<8x1xf32>
    %cst_75 = arith.constant 9.99999974E-6 : f32
    %147 = vector.broadcast %cst_75 : f32 to vector<8x1xf32>
    %148 = arith.addf %146, %147 : vector<8x1xf32>
    %149 = math.rsqrt %148 : vector<8x1xf32>
    %150 = vector.broadcast %149 : vector<8x1xf32> to vector<8x32xf32>
    %151 = arith.mulf %141, %150 : vector<8x32xf32>
    %152 = vector.broadcast %133 : vector<1x32xf32> to vector<8x32xf32>
    %153 = arith.mulf %151, %152 : vector<8x32xf32>
    %154 = vector.broadcast %135 : vector<1x32xf32> to vector<8x32xf32>
    %155 = arith.addf %153, %154 : vector<8x32xf32>
    %c0_76 = arith.constant 0 : index
    %c0_77 = arith.constant 0 : index
    %c0_78 = arith.constant 0 : index
    %156 = vector.load %arg10[%c0_76, %c0_77, %c0_78] : memref<1x32x128xbf16, #tpu.memory_space<vmem>>, vector<1x32x128xbf16>
    %157 = vector.shape_cast %156 : vector<1x32x128xbf16> to vector<32x128xbf16>
    %158 = arith.truncf %155 : vector<8x32xf32> to vector<8x32xbf16>
    %cst_79 = arith.constant dense<0.000000e+00> : vector<8x128xf32>
    %159 = tpu.matmul %158, %157, %cst_79 {dimension_numbers = #tpu.dot_dimension_numbers<[1], [0], [0], [1], [0, 0, 1, 1], [], []>} : vector<8x32xbf16>, vector<32x128xbf16>, vector<8x128xf32> -> vector<8x128xf32>
    %c0_80 = arith.constant 0 : index
    %c0_81 = arith.constant 0 : index
    %c0_82 = arith.constant 0 : index
    %160 = vector.load %arg11[%c0_80, %c0_81, %c0_82] : memref<1x1x128xf32, #tpu.memory_space<vmem>>, vector<1x1x128xf32>
    %161 = vector.shape_cast %160 : vector<1x1x128xf32> to vector<1x128xf32>
    %162 = vector.broadcast %161 : vector<1x128xf32> to vector<8x128xf32>
    %163 = arith.addf %159, %162 : vector<8x128xf32>
    %cst_83 = arith.constant 0.000000e+00 : f32
    %164 = vector.broadcast %cst_83 : f32 to vector<8x128xf32>
    %165 = arith.maximumf %163, %164 : vector<8x128xf32>
    %c0_84 = arith.constant 0 : index
    %c0_85 = arith.constant 0 : index
    %c0_86 = arith.constant 0 : index
    %166 = vector.load %arg12[%c0_84, %c0_85, %c0_86] : memref<1x128x32xbf16, #tpu.memory_space<vmem>>, vector<1x128x32xbf16>
    %167 = vector.shape_cast %166 : vector<1x128x32xbf16> to vector<128x32xbf16>
    %168 = arith.truncf %165 : vector<8x128xf32> to vector<8x128xbf16>
    %cst_87 = arith.constant dense<0.000000e+00> : vector<8x32xf32>
    %169 = tpu.matmul %168, %167, %cst_87 {dimension_numbers = #tpu.dot_dimension_numbers<[1], [0], [0], [1], [0, 0, 1, 1], [], []>} : vector<8x128xbf16>, vector<128x32xbf16>, vector<8x32xf32> -> vector<8x32xf32>
    %c0_88 = arith.constant 0 : index
    %c0_89 = arith.constant 0 : index
    %c0_90 = arith.constant 0 : index
    %170 = vector.load %arg13[%c0_88, %c0_89, %c0_90] : memref<1x1x32xf32, #tpu.memory_space<vmem>>, vector<1x1x32xf32>
    %171 = vector.shape_cast %170 : vector<1x1x32xf32> to vector<1x32xf32>
    %172 = vector.broadcast %171 : vector<1x32xf32> to vector<8x32xf32>
    %173 = arith.addf %169, %172 : vector<8x32xf32>
    %174 = arith.addf %155, %173 : vector<8x32xf32>
    %c0_91 = arith.constant 0 : index
    %c0_92 = arith.constant 0 : index
    %c0_93 = arith.constant 0 : index
    %175 = vector.load %arg14[%c0_91, %c0_92, %c0_93] : memref<1x1x32xf32, #tpu.memory_space<vmem>>, vector<1x1x32xf32>
    %176 = vector.shape_cast %175 : vector<1x1x32xf32> to vector<1x32xf32>
    %c0_94 = arith.constant 0 : index
    %c0_95 = arith.constant 0 : index
    %c0_96 = arith.constant 0 : index
    %177 = vector.load %arg15[%c0_94, %c0_95, %c0_96] : memref<1x1x32xf32, #tpu.memory_space<vmem>>, vector<1x1x32xf32>
    %178 = vector.shape_cast %177 : vector<1x1x32xf32> to vector<1x32xf32>
    %cst_97 = arith.constant dense<0.000000e+00> : vector<8xf32>
    %179 = vector.multi_reduction <add>, %174, %cst_97 [1] : vector<8x32xf32> to vector<8xf32>
    %180 = vector.shape_cast %179 : vector<8xf32> to vector<8x1xf32>
    %cst_98 = arith.constant 3.200000e+01 : f32
    %181 = vector.broadcast %cst_98 : f32 to vector<8x1xf32>
    %182 = arith.divf %180, %181 : vector<8x1xf32>
    %183 = vector.broadcast %182 : vector<8x1xf32> to vector<8x32xf32>
    %184 = arith.subf %174, %183 : vector<8x32xf32>
    %185 = arith.mulf %184, %184 : vector<8x32xf32>
    %cst_99 = arith.constant dense<0.000000e+00> : vector<8xf32>
    %186 = vector.multi_reduction <add>, %185, %cst_99 [1] : vector<8x32xf32> to vector<8xf32>
    %187 = vector.shape_cast %186 : vector<8xf32> to vector<8x1xf32>
    %cst_100 = arith.constant 3.200000e+01 : f32
    %188 = vector.broadcast %cst_100 : f32 to vector<8x1xf32>
    %189 = arith.divf %187, %188 : vector<8x1xf32>
    %cst_101 = arith.constant 9.99999974E-6 : f32
    %190 = vector.broadcast %cst_101 : f32 to vector<8x1xf32>
    %191 = arith.addf %189, %190 : vector<8x1xf32>
    %192 = math.rsqrt %191 : vector<8x1xf32>
    %193 = vector.broadcast %192 : vector<8x1xf32> to vector<8x32xf32>
    %194 = arith.mulf %184, %193 : vector<8x32xf32>
    %195 = vector.broadcast %176 : vector<1x32xf32> to vector<8x32xf32>
    %196 = arith.mulf %194, %195 : vector<8x32xf32>
    %197 = vector.broadcast %178 : vector<1x32xf32> to vector<8x32xf32>
    %198 = arith.addf %196, %197 : vector<8x32xf32>
    %c0_102 = arith.constant 0 : index
    %c0_103 = arith.constant 0 : index
    %199 = vector.load %arg16[%c0_102, %c0_103] : memref<1x32xf32, #tpu.memory_space<vmem>>, vector<1x32xf32>
    %c0_104 = arith.constant 0 : index
    %c0_105 = arith.constant 0 : index
    %200 = vector.load %arg17[%c0_104, %c0_105] : memref<1x32xf32, #tpu.memory_space<vmem>>, vector<1x32xf32>
    %cst_106 = arith.constant dense<0.000000e+00> : vector<8xf32>
    %201 = vector.multi_reduction <add>, %198, %cst_106 [1] : vector<8x32xf32> to vector<8xf32>
    %202 = vector.shape_cast %201 : vector<8xf32> to vector<8x1xf32>
    %cst_107 = arith.constant 3.200000e+01 : f32
    %203 = vector.broadcast %cst_107 : f32 to vector<8x1xf32>
    %204 = arith.divf %202, %203 : vector<8x1xf32>
    %205 = vector.broadcast %204 : vector<8x1xf32> to vector<8x32xf32>
    %206 = arith.subf %198, %205 : vector<8x32xf32>
    %207 = arith.mulf %206, %206 : vector<8x32xf32>
    %cst_108 = arith.constant dense<0.000000e+00> : vector<8xf32>
    %208 = vector.multi_reduction <add>, %207, %cst_108 [1] : vector<8x32xf32> to vector<8xf32>
    %209 = vector.shape_cast %208 : vector<8xf32> to vector<8x1xf32>
    %cst_109 = arith.constant 3.200000e+01 : f32
    %210 = vector.broadcast %cst_109 : f32 to vector<8x1xf32>
    %211 = arith.divf %209, %210 : vector<8x1xf32>
    %cst_110 = arith.constant 9.99999974E-6 : f32
    %212 = vector.broadcast %cst_110 : f32 to vector<8x1xf32>
    %213 = arith.addf %211, %212 : vector<8x1xf32>
    %214 = math.rsqrt %213 : vector<8x1xf32>
    %215 = vector.broadcast %214 : vector<8x1xf32> to vector<8x32xf32>
    %216 = arith.mulf %206, %215 : vector<8x32xf32>
    %217 = vector.broadcast %199 : vector<1x32xf32> to vector<8x32xf32>
    %218 = arith.mulf %216, %217 : vector<8x32xf32>
    %219 = vector.broadcast %200 : vector<1x32xf32> to vector<8x32xf32>
    %220 = arith.addf %218, %219 : vector<8x32xf32>
    %221 = vector.shape_cast %220 : vector<8x32xf32> to vector<1x8x32xf32>
    %c0_111 = arith.constant 0 : index
    %c0_112 = arith.constant 0 : index
    %c0_113 = arith.constant 0 : index
    %222 = vector.load %arg20[%c0_111, %c0_112, %c0_113] : memref<1x8x32xf32, #tpu.memory_space<vmem>>, vector<1x8x32xf32>
    tpu.vector_store %arg20[%c0_111, %c0_112, %c0_113], %221 {strides = array<i32>} : memref<1x8x32xf32, #tpu.memory_space<vmem>>, vector<1x8x32xf32>,
    %c0_114 = arith.constant 0 : index
    %c0_115 = arith.constant 0 : index
    %223 = vector.load %arg18[%c0_114, %c0_115] : memref<32x16xbf16, #tpu.memory_space<vmem>>, vector<32x16xbf16>
    %224 = arith.truncf %220 : vector<8x32xf32> to vector<8x32xbf16>
    %cst_116 = arith.constant dense<0.000000e+00> : vector<8x16xf32>
    %225 = tpu.matmul %224, %223, %cst_116 {dimension_numbers = #tpu.dot_dimension_numbers<[1], [0], [0], [1], [0, 0, 1, 1], [], []>} : vector<8x32xbf16>, vector<32x16xbf16>, vector<8x16xf32> -> vector<8x16xf32>
    %c0_117 = arith.constant 0 : index
    %c0_118 = arith.constant 0 : index
    %226 = vector.load %arg19[%c0_117, %c0_118] : memref<1x16xf32, #tpu.memory_space<vmem>>, vector<1x16xf32>
    %227 = vector.broadcast %226 : vector<1x16xf32> to vector<8x16xf32>
    %228 = arith.addf %225, %227 : vector<8x16xf32>
    %229 = vector.shape_cast %228 : vector<8x16xf32> to vector<1x8x16xf32>
    %230 = tpu.transpose %14, [0, 2, 1] : vector<1x1x8xf32> -> vector<1x8x1xf32>
    %231 = vector.broadcast %230 : vector<1x8x1xf32> to vector<1x8x16xf32>
    %232 = arith.mulf %229, %231 : vector<1x8x16xf32>
    %233 = tpu.transpose %4, [0, 2, 1] : vector<1x1x8xf32> -> vector<1x8x1xf32>
    %234 = vector.broadcast %233 : vector<1x8x1xf32> to vector<1x8x16xf32>
    %235 = arith.addf %232, %234 : vector<1x8x16xf32>
    %c0_119 = arith.constant 0 : index
    %c0_120 = arith.constant 0 : index
    %c0_121 = arith.constant 0 : index
    %236 = vector.load %arg21[%c0_119, %c0_120, %c0_121] : memref<1x8x16xf32, #tpu.memory_space<vmem>>, vector<1x8x16xf32>
    tpu.vector_store %arg21[%c0_119, %c0_120, %c0_121], %235 {strides = array<i32>} : memref<1x8x16xf32, #tpu.memory_space<vmem>>, vector<1x8x16xf32>,
    return
  }
  func.func @transform_0(%arg0: i32) -> (i32, i32, i32) {
    %c0_i32 = arith.constant 0 : i32
    %c0_i32_0 = arith.constant 0 : i32
    %c0_i32_1 = arith.constant 0 : i32
    return %arg0, %c0_i32, %c0_i32_0 : i32, i32, i32
  }
  func.func @transform_1(%arg0: i32) -> (i32, i32) {
    %c0_i32 = arith.constant 0 : i32
    %c0_i32_0 = arith.constant 0 : i32
    %c0_i32_1 = arith.constant 0 : i32
    return %c0_i32, %c0_i32_0 : i32, i32
  }
  func.func @transform_2(%arg0: i32) -> (i32, i32) {
    %c0_i32 = arith.constant 0 : i32
    %c0_i32_0 = arith.constant 0 : i32
    %c0_i32_1 = arith.constant 0 : i32
    return %c0_i32, %c0_i32_0 : i32, i32
  }
  func.func @transform_3(%arg0: i32) -> (i32, i32, i32) {
    %c0_i32 = arith.constant 0 : i32
    %c0_i32_0 = arith.constant 0 : i32
    %c0_i32_1 = arith.constant 0 : i32
    %c0_i32_2 = arith.constant 0 : i32
    return %c0_i32, %c0_i32_0, %c0_i32_1 : i32, i32, i32
  }
  func.func @transform_4(%arg0: i32) -> (i32, i32, i32) {
    %c0_i32 = arith.constant 0 : i32
    %c0_i32_0 = arith.constant 0 : i32
    %c0_i32_1 = arith.constant 0 : i32
    %c0_i32_2 = arith.constant 0 : i32
    return %c0_i32, %c0_i32_0, %c0_i32_1 : i32, i32, i32
  }
  func.func @transform_5(%arg0: i32) -> (i32, i32, i32) {
    %c0_i32 = arith.constant 0 : i32
    %c0_i32_0 = arith.constant 0 : i32
    %c0_i32_1 = arith.constant 0 : i32
    %c0_i32_2 = arith.constant 0 : i32
    return %c0_i32, %c0_i32_0, %c0_i32_1 : i32, i32, i32
  }
  func.func @transform_6(%arg0: i32) -> (i32, i32, i32) {
    %c0_i32 = arith.constant 0 : i32
    %c0_i32_0 = arith.constant 0 : i32
    %c0_i32_1 = arith.constant 0 : i32
    %c0_i32_2 = arith.constant 0 : i32
    return %c0_i32, %c0_i32_0, %c0_i32_1 : i32, i32, i32
  }
  func.func @transform_7(%arg0: i32) -> (i32, i32, i32) {
    %c0_i32 = arith.constant 0 : i32
    %c0_i32_0 = arith.constant 0 : i32
    %c0_i32_1 = arith.constant 0 : i32
    %c0_i32_2 = arith.constant 0 : i32
    return %c0_i32, %c0_i32_0, %c0_i32_1 : i32, i32, i32
  }
  func.func @transform_8(%arg0: i32) -> (i32, i32, i32) {
    %c0_i32 = arith.constant 0 : i32
    %c0_i32_0 = arith.constant 0 : i32
    %c0_i32_1 = arith.constant 0 : i32
    %c0_i32_2 = arith.constant 0 : i32
    return %c0_i32, %c0_i32_0, %c0_i32_1 : i32, i32, i32
  }
  func.func @transform_9(%arg0: i32) -> (i32, i32, i32) {
    %c0_i32 = arith.constant 0 : i32
    %c0_i32_0 = arith.constant 0 : i32
    %c0_i32_1 = arith.constant 0 : i32
    %c0_i32_2 = arith.constant 0 : i32
    return %c0_i32, %c0_i32_0, %c0_i32_1 : i32, i32, i32
  }
  func.func @transform_10(%arg0: i32) -> (i32, i32, i32) {
    %c0_i32 = arith.constant 0 : i32
    %c0_i32_0 = arith.constant 0 : i32
    %c0_i32_1 = arith.constant 0 : i32
    %c0_i32_2 = arith.constant 0 : i32
    return %c0_i32, %c0_i32_0, %c0_i32_1 : i32, i32, i32
  }
  func.func @transform_11(%arg0: i32) -> (i32, i32, i32) {
    %c0_i32 = arith.constant 0 : i32
    %c0_i32_0 = arith.constant 0 : i32
    %c0_i32_1 = arith.constant 0 : i32
    %c0_i32_2 = arith.constant 0 : i32
    return %c0_i32, %c0_i32_0, %c0_i32_1 : i32, i32, i32
  }
  func.func @transform_12(%arg0: i32) -> (i32, i32, i32) {
    %c0_i32 = arith.constant 0 : i32
    %c0_i32_0 = arith.constant 0 : i32
    %c0_i32_1 = arith.constant 0 : i32
    %c0_i32_2 = arith.constant 0 : i32
    return %c0_i32, %c0_i32_0, %c0_i32_1 : i32, i32, i32
  }
  func.func @transform_13(%arg0: i32) -> (i32, i32, i32) {
    %c0_i32 = arith.constant 0 : i32
    %c0_i32_0 = arith.constant 0 : i32
    %c0_i32_1 = arith.constant 0 : i32
    %c0_i32_2 = arith.constant 0 : i32
    return %c0_i32, %c0_i32_0, %c0_i32_1 : i32, i32, i32
  }
  func.func @transform_14(%arg0: i32) -> (i32, i32, i32) {
    %c0_i32 = arith.constant 0 : i32
    %c0_i32_0 = arith.constant 0 : i32
    %c0_i32_1 = arith.constant 0 : i32
    %c0_i32_2 = arith.constant 0 : i32
    return %c0_i32, %c0_i32_0, %c0_i32_1 : i32, i32, i32
  }
  func.func @transform_15(%arg0: i32) -> (i32, i32) {
    %c0_i32 = arith.constant 0 : i32
    %c0_i32_0 = arith.constant 0 : i32
    %c0_i32_1 = arith.constant 0 : i32
    return %c0_i32, %c0_i32_0 : i32, i32
  }
  func.func @transform_16(%arg0: i32) -> (i32, i32) {
    %c0_i32 = arith.constant 0 : i32
    %c0_i32_0 = arith.constant 0 : i32
    %c0_i32_1 = arith.constant 0 : i32
    return %c0_i32, %c0_i32_0 : i32, i32
  }
  func.func @transform_17(%arg0: i32) -> (i32, i32) {
    %c0_i32 = arith.constant 0 : i32
    %c0_i32_0 = arith.constant 0 : i32
    %c0_i32_1 = arith.constant 0 : i32
    return %c0_i32, %c0_i32_0 : i32, i32
  }
  func.func @transform_18(%arg0: i32) -> (i32, i32) {
    %c0_i32 = arith.constant 0 : i32
    %c0_i32_0 = arith.constant 0 : i32
    %c0_i32_1 = arith.constant 0 : i32
    return %c0_i32, %c0_i32_0 : i32, i32
  }
  func.func @transform_19(%arg0: i32) -> (i32, i32, i32) {
    %c0_i32 = arith.constant 0 : i32
    %c0_i32_0 = arith.constant 0 : i32
    %c0_i32_1 = arith.constant 0 : i32
    return %arg0, %c0_i32, %c0_i32_0 : i32, i32, i32
  }
  func.func @transform_20(%arg0: i32) -> (i32, i32, i32) {
    %c0_i32 = arith.constant 0 : i32
    %c0_i32_0 = arith.constant 0 : i32
    %c0_i32_1 = arith.constant 0 : i32
    return %arg0, %c0_i32, %c0_i32_0 : i32, i32, i32
  }
  func.func @transform_21(%arg0: i32) -> (i32, i32, i32, i32) {
    %c0_i32 = arith.constant 0 : i32
    %c0_i32_0 = arith.constant 0 : i32
    %c0_i32_1 = arith.constant 0 : i32
    %c0_i32_2 = arith.constant 0 : i32
    return %arg0, %c0_i32, %c0_i32_0, %c0_i32_1 : i32, i32, i32, i32
  }
}

module attributes {stable_mosaic.version = 11 : i64} {
  func.func @_dual_branch_kernel(%arg0: i32, %arg1: memref<1x8x32xf32, #tpu.memory_space<vmem>>, %arg2: memref<32x32xbf16, #tpu.memory_space<vmem>>, %arg3: memref<1x32xf32, #tpu.memory_space<vmem>>, %arg4: memref<1x32x96xbf16, #tpu.memory_space<vmem>>, %arg5: memref<1x1x96xf32, #tpu.memory_space<vmem>>, %arg6: memref<1x32x32xbf16, #tpu.memory_space<vmem>>, %arg7: memref<1x1x32xf32, #tpu.memory_space<vmem>>, %arg8: memref<1x1x32xf32, #tpu.memory_space<vmem>>, %arg9: memref<1x1x32xf32, #tpu.memory_space<vmem>>, %arg10: memref<1x32x128xbf16, #tpu.memory_space<vmem>>, %arg11: memref<1x1x128xf32, #tpu.memory_space<vmem>>, %arg12: memref<1x128x32xbf16, #tpu.memory_space<vmem>>, %arg13: memref<1x1x32xf32, #tpu.memory_space<vmem>>, %arg14: memref<1x1x32xf32, #tpu.memory_space<vmem>>, %arg15: memref<1x1x32xf32, #tpu.memory_space<vmem>>, %arg16: memref<1x32xf32, #tpu.memory_space<vmem>>, %arg17: memref<1x32xf32, #tpu.memory_space<vmem>>, %arg18: memref<32x16xbf16, #tpu.memory_space<vmem>>, %arg19: memref<1x16xf32, #tpu.memory_space<vmem>>, %arg20: memref<1x8x32xf32, #tpu.memory_space<vmem>>, %arg21: memref<1x8x16xf32, #tpu.memory_space<vmem>>, %arg22: memref<1x4x8x8xf32, #tpu.memory_space<vmem>>, %arg23: memref<8x32xf32, #tpu.memory_space<vmem>>) attributes {dimension_semantics = [#tpu.dimension_semantics<parallel>], iteration_bounds = array<i64: 2>, scalar_prefetch = 0 : i64, scratch_operands = 1 : i64, tpu.core_type = #tpu.core_type<tc>, window_params = [{transform_indices = @transform_0, window_bounds = array<i64: 1, 8, 32>}, {pipeline_mode = #tpu.pipeline_mode<synchronous>, transform_indices = @transform_1, window_bounds = array<i64: 32, 32>}, {pipeline_mode = #tpu.pipeline_mode<synchronous>, transform_indices = @transform_2, window_bounds = array<i64: 1, 32>}, {pipeline_mode = #tpu.pipeline_mode<synchronous>, transform_indices = @transform_3, window_bounds = array<i64: 1, 32, 96>}, {pipeline_mode = #tpu.pipeline_mode<synchronous>, transform_indices = @transform_4, window_bounds = array<i64: 1, 1, 96>}, {pipeline_mode = #tpu.pipeline_mode<synchronous>, transform_indices = @transform_5, window_bounds = array<i64: 1, 32, 32>}, {pipeline_mode = #tpu.pipeline_mode<synchronous>, transform_indices = @transform_6, window_bounds = array<i64: 1, 1, 32>}, {pipeline_mode = #tpu.pipeline_mode<synchronous>, transform_indices = @transform_7, window_bounds = array<i64: 1, 1, 32>}, {pipeline_mode = #tpu.pipeline_mode<synchronous>, transform_indices = @transform_8, window_bounds = array<i64: 1, 1, 32>}, {pipeline_mode = #tpu.pipeline_mode<synchronous>, transform_indices = @transform_9, window_bounds = array<i64: 1, 32, 128>}, {pipeline_mode = #tpu.pipeline_mode<synchronous>, transform_indices = @transform_10, window_bounds = array<i64: 1, 1, 128>}, {pipeline_mode = #tpu.pipeline_mode<synchronous>, transform_indices = @transform_11, window_bounds = array<i64: 1, 128, 32>}, {pipeline_mode = #tpu.pipeline_mode<synchronous>, transform_indices = @transform_12, window_bounds = array<i64: 1, 1, 32>}, {pipeline_mode = #tpu.pipeline_mode<synchronous>, transform_indices = @transform_13, window_bounds = array<i64: 1, 1, 32>}, {pipeline_mode = #tpu.pipeline_mode<synchronous>, transform_indices = @transform_14, window_bounds = array<i64: 1, 1, 32>}, {pipeline_mode = #tpu.pipeline_mode<synchronous>, transform_indices = @transform_15, window_bounds = array<i64: 1, 32>}, {pipeline_mode = #tpu.pipeline_mode<synchronous>, transform_indices = @transform_16, window_bounds = array<i64: 1, 32>}, {pipeline_mode = #tpu.pipeline_mode<synchronous>, transform_indices = @transform_17, window_bounds = array<i64: 32, 16>}, {pipeline_mode = #tpu.pipeline_mode<synchronous>, transform_indices = @transform_18, window_bounds = array<i64: 1, 16>}, {transform_indices = @transform_19, window_bounds = array<i64: 1, 8, 32>}, {transform_indices = @transform_20, window_bounds = array<i64: 1, 8, 16>}, {transform_indices = @transform_21, window_bounds = array<i64: 1, 4, 8, 8>}]} {
    %c0 = arith.constant 0 : index
    %c0_0 = arith.constant 0 : index
    %c0_1 = arith.constant 0 : index
    %0 = vector.load %arg1[%c0, %c0_0, %c0_1] : memref<1x8x32xf32, #tpu.memory_space<vmem>>, vector<1x8x32xf32>
    %1 = vector.shape_cast %0 : vector<1x8x32xf32> to vector<8x32xf32>
    %c0_2 = arith.constant 0 : index
    %c0_3 = arith.constant 0 : index
    %2 = vector.load %arg2[%c0_2, %c0_3] : memref<32x32xbf16, #tpu.memory_space<vmem>>, vector<32x32xbf16>
    %3 = arith.truncf %1 : vector<8x32xf32> to vector<8x32xbf16>
    %cst = arith.constant dense<0.000000e+00> : vector<8x32xf32>
    %4 = tpu.matmul %3, %2, %cst {dimension_numbers = #tpu.dot_dimension_numbers<[1], [0], [0], [1], [0, 0, 1, 1], [], []>} : vector<8x32xbf16>, vector<32x32xbf16>, vector<8x32xf32> -> vector<8x32xf32>
    %c0_4 = arith.constant 0 : index
    %c0_5 = arith.constant 0 : index
    %5 = vector.load %arg3[%c0_4, %c0_5] : memref<1x32xf32, #tpu.memory_space<vmem>>, vector<1x32xf32>
    %6 = vector.broadcast %5 : vector<1x32xf32> to vector<8x32xf32>
    %7 = arith.addf %4, %6 : vector<8x32xf32>
    %c0_6 = arith.constant 0 : index
    %c0_7 = arith.constant 0 : index
    %c0_8 = arith.constant 0 : index
    %8 = vector.load %arg4[%c0_6, %c0_7, %c0_8] : memref<1x32x96xbf16, #tpu.memory_space<vmem>>, vector<1x32x96xbf16>
    %9 = vector.shape_cast %8 : vector<1x32x96xbf16> to vector<32x96xbf16>
    %10 = arith.truncf %7 : vector<8x32xf32> to vector<8x32xbf16>
    %cst_9 = arith.constant dense<0.000000e+00> : vector<8x96xf32>
    %11 = tpu.matmul %10, %9, %cst_9 {dimension_numbers = #tpu.dot_dimension_numbers<[1], [0], [0], [1], [0, 0, 1, 1], [], []>} : vector<8x32xbf16>, vector<32x96xbf16>, vector<8x96xf32> -> vector<8x96xf32>
    %c0_10 = arith.constant 0 : index
    %c0_11 = arith.constant 0 : index
    %c0_12 = arith.constant 0 : index
    %12 = vector.load %arg5[%c0_10, %c0_11, %c0_12] : memref<1x1x96xf32, #tpu.memory_space<vmem>>, vector<1x1x96xf32>
    %13 = vector.shape_cast %12 : vector<1x1x96xf32> to vector<1x96xf32>
    %14 = vector.broadcast %13 : vector<1x96xf32> to vector<8x96xf32>
    %15 = arith.addf %11, %14 : vector<8x96xf32>
    %16 = arith.truncf %15 : vector<8x96xf32> to vector<8x96xbf16>
    %17 = vector.extract_strided_slice %16 {offsets = [0, 0], sizes = [8, 8], strides = [1, 1]} : vector<8x96xbf16> to vector<8x8xbf16>
    %18 = vector.extract_strided_slice %16 {offsets = [0, 32], sizes = [8, 8], strides = [1, 1]} : vector<8x96xbf16> to vector<8x8xbf16>
    %19 = vector.extract_strided_slice %16 {offsets = [0, 64], sizes = [8, 8], strides = [1, 1]} : vector<8x96xbf16> to vector<8x8xbf16>
    %cst_13 = arith.constant dense<0.000000e+00> : vector<8x8xf32>
    %20 = tpu.matmul %17, %18, %cst_13 {dimension_numbers = #tpu.dot_dimension_numbers<[1], [1], [0], [0], [0, 0, 1, 0], [], []>} : vector<8x8xbf16>, vector<8x8xbf16>, vector<8x8xf32> -> vector<8x8xf32>
    %cst_14 = arith.constant 0.353553385 : f32
    %21 = vector.broadcast %cst_14 : f32 to vector<8x8xf32>
    %22 = arith.mulf %20, %21 : vector<8x8xf32>
    %cst_15 = arith.constant dense<0xFF800000> : vector<8xf32>
    %23 = vector.multi_reduction <maximumf>, %22, %cst_15 [1] : vector<8x8xf32> to vector<8xf32>
    %24 = vector.shape_cast %23 : vector<8xf32> to vector<8x1xf32>
    %25 = vector.broadcast %24 : vector<8x1xf32> to vector<8x8xf32>
    %26 = arith.subf %22, %25 : vector<8x8xf32>
    %27 = math.exp %26 : vector<8x8xf32>
    %cst_16 = arith.constant dense<0.000000e+00> : vector<8xf32>
    %28 = vector.multi_reduction <add>, %27, %cst_16 [1] : vector<8x8xf32> to vector<8xf32>
    %29 = vector.shape_cast %28 : vector<8xf32> to vector<8x1xf32>
    %30 = tpu.reciprocal %29 {approx = true} : vector<8x1xf32> -> vector<8x1xf32>
    %31 = vector.broadcast %30 : vector<8x1xf32> to vector<8x8xf32>
    %32 = arith.mulf %27, %31 : vector<8x8xf32>
    %c0_17 = arith.constant 0 : index
    %c0_18 = arith.constant 0 : index
    %c0_19 = arith.constant 0 : index
    %c0_20 = arith.constant 0 : index
    %33 = vector.load %arg22[%c0_17, %c0_18, %c0_19, %c0_20] : memref<1x4x8x8xf32, #tpu.memory_space<vmem>>, vector<1x1x8x8xf32>
    %34 = vector.shape_cast %33 : vector<1x1x8x8xf32> to vector<8x8xf32>
    %35 = vector.shape_cast %32 : vector<8x8xf32> to vector<1x1x8x8xf32>
    tpu.vector_store %arg22[%c0_17, %c0_18, %c0_19, %c0_20], %35 {strides = array<i32>} : memref<1x4x8x8xf32, #tpu.memory_space<vmem>>, vector<1x1x8x8xf32>,
    %36 = arith.truncf %32 : vector<8x8xf32> to vector<8x8xbf16>
    %cst_21 = arith.constant dense<0.000000e+00> : vector<8x8xf32>
    %37 = tpu.matmul %36, %19, %cst_21 {dimension_numbers = #tpu.dot_dimension_numbers<[1], [0], [0], [1], [0, 0, 1, 1], [], []>} : vector<8x8xbf16>, vector<8x8xbf16>, vector<8x8xf32> -> vector<8x8xf32>
    %c0_22 = arith.constant 0 : index
    %c0_23 = arith.constant 0 : index
    %38 = vector.load %arg23[%c0_22, %c0_23] : memref<8x32xf32, #tpu.memory_space<vmem>>, vector<8x8xf32>
    tpu.vector_store %arg23[%c0_22, %c0_23], %37 {strides = array<i32>} : memref<8x32xf32, #tpu.memory_space<vmem>>, vector<8x8xf32>,
    %39 = vector.extract_strided_slice %16 {offsets = [0, 8], sizes = [8, 8], strides = [1, 1]} : vector<8x96xbf16> to vector<8x8xbf16>
    %40 = vector.extract_strided_slice %16 {offsets = [0, 40], sizes = [8, 8], strides = [1, 1]} : vector<8x96xbf16> to vector<8x8xbf16>
    %41 = vector.extract_strided_slice %16 {offsets = [0, 72], sizes = [8, 8], strides = [1, 1]} : vector<8x96xbf16> to vector<8x8xbf16>
    %cst_24 = arith.constant dense<0.000000e+00> : vector<8x8xf32>
    %42 = tpu.matmul %39, %40, %cst_24 {dimension_numbers = #tpu.dot_dimension_numbers<[1], [1], [0], [0], [0, 0, 1, 0], [], []>} : vector<8x8xbf16>, vector<8x8xbf16>, vector<8x8xf32> -> vector<8x8xf32>
    %cst_25 = arith.constant 0.353553385 : f32
    %43 = vector.broadcast %cst_25 : f32 to vector<8x8xf32>
    %44 = arith.mulf %42, %43 : vector<8x8xf32>
    %cst_26 = arith.constant dense<0xFF800000> : vector<8xf32>
    %45 = vector.multi_reduction <maximumf>, %44, %cst_26 [1] : vector<8x8xf32> to vector<8xf32>
    %46 = vector.shape_cast %45 : vector<8xf32> to vector<8x1xf32>
    %47 = vector.broadcast %46 : vector<8x1xf32> to vector<8x8xf32>
    %48 = arith.subf %44, %47 : vector<8x8xf32>
    %49 = math.exp %48 : vector<8x8xf32>
    %cst_27 = arith.constant dense<0.000000e+00> : vector<8xf32>
    %50 = vector.multi_reduction <add>, %49, %cst_27 [1] : vector<8x8xf32> to vector<8xf32>
    %51 = vector.shape_cast %50 : vector<8xf32> to vector<8x1xf32>
    %52 = tpu.reciprocal %51 {approx = true} : vector<8x1xf32> -> vector<8x1xf32>
    %53 = vector.broadcast %52 : vector<8x1xf32> to vector<8x8xf32>
    %54 = arith.mulf %49, %53 : vector<8x8xf32>
    %c0_28 = arith.constant 0 : index
    %c1 = arith.constant 1 : index
    %c0_29 = arith.constant 0 : index
    %c0_30 = arith.constant 0 : index
    %55 = vector.load %arg22[%c0_28, %c1, %c0_29, %c0_30] : memref<1x4x8x8xf32, #tpu.memory_space<vmem>>, vector<1x1x8x8xf32>
    %56 = vector.shape_cast %55 : vector<1x1x8x8xf32> to vector<8x8xf32>
    %57 = vector.shape_cast %54 : vector<8x8xf32> to vector<1x1x8x8xf32>
    tpu.vector_store %arg22[%c0_28, %c1, %c0_29, %c0_30], %57 {strides = array<i32>} : memref<1x4x8x8xf32, #tpu.memory_space<vmem>>, vector<1x1x8x8xf32>,
    %58 = arith.truncf %54 : vector<8x8xf32> to vector<8x8xbf16>
    %cst_31 = arith.constant dense<0.000000e+00> : vector<8x8xf32>
    %59 = tpu.matmul %58, %41, %cst_31 {dimension_numbers = #tpu.dot_dimension_numbers<[1], [0], [0], [1], [0, 0, 1, 1], [], []>} : vector<8x8xbf16>, vector<8x8xbf16>, vector<8x8xf32> -> vector<8x8xf32>
    %c0_32 = arith.constant 0 : index
    %c8 = arith.constant 8 : index
    %60 = vector.load %arg23[%c0_32, %c8] : memref<8x32xf32, #tpu.memory_space<vmem>>, vector<8x8xf32>
    tpu.vector_store %arg23[%c0_32, %c8], %59 {strides = array<i32>} : memref<8x32xf32, #tpu.memory_space<vmem>>, vector<8x8xf32>,
    %61 = vector.extract_strided_slice %16 {offsets = [0, 16], sizes = [8, 8], strides = [1, 1]} : vector<8x96xbf16> to vector<8x8xbf16>
    %62 = vector.extract_strided_slice %16 {offsets = [0, 48], sizes = [8, 8], strides = [1, 1]} : vector<8x96xbf16> to vector<8x8xbf16>
    %63 = vector.extract_strided_slice %16 {offsets = [0, 80], sizes = [8, 8], strides = [1, 1]} : vector<8x96xbf16> to vector<8x8xbf16>
    %cst_33 = arith.constant dense<0.000000e+00> : vector<8x8xf32>
    %64 = tpu.matmul %61, %62, %cst_33 {dimension_numbers = #tpu.dot_dimension_numbers<[1], [1], [0], [0], [0, 0, 1, 0], [], []>} : vector<8x8xbf16>, vector<8x8xbf16>, vector<8x8xf32> -> vector<8x8xf32>
    %cst_34 = arith.constant 0.353553385 : f32
    %65 = vector.broadcast %cst_34 : f32 to vector<8x8xf32>
    %66 = arith.mulf %64, %65 : vector<8x8xf32>
    %cst_35 = arith.constant dense<0xFF800000> : vector<8xf32>
    %67 = vector.multi_reduction <maximumf>, %66, %cst_35 [1] : vector<8x8xf32> to vector<8xf32>
    %68 = vector.shape_cast %67 : vector<8xf32> to vector<8x1xf32>
    %69 = vector.broadcast %68 : vector<8x1xf32> to vector<8x8xf32>
    %70 = arith.subf %66, %69 : vector<8x8xf32>
    %71 = math.exp %70 : vector<8x8xf32>
    %cst_36 = arith.constant dense<0.000000e+00> : vector<8xf32>
    %72 = vector.multi_reduction <add>, %71, %cst_36 [1] : vector<8x8xf32> to vector<8xf32>
    %73 = vector.shape_cast %72 : vector<8xf32> to vector<8x1xf32>
    %74 = tpu.reciprocal %73 {approx = true} : vector<8x1xf32> -> vector<8x1xf32>
    %75 = vector.broadcast %74 : vector<8x1xf32> to vector<8x8xf32>
    %76 = arith.mulf %71, %75 : vector<8x8xf32>
    %c0_37 = arith.constant 0 : index
    %c2 = arith.constant 2 : index
    %c0_38 = arith.constant 0 : index
    %c0_39 = arith.constant 0 : index
    %77 = vector.load %arg22[%c0_37, %c2, %c0_38, %c0_39] : memref<1x4x8x8xf32, #tpu.memory_space<vmem>>, vector<1x1x8x8xf32>
    %78 = vector.shape_cast %77 : vector<1x1x8x8xf32> to vector<8x8xf32>
    %79 = vector.shape_cast %76 : vector<8x8xf32> to vector<1x1x8x8xf32>
    tpu.vector_store %arg22[%c0_37, %c2, %c0_38, %c0_39], %79 {strides = array<i32>} : memref<1x4x8x8xf32, #tpu.memory_space<vmem>>, vector<1x1x8x8xf32>,
    %80 = arith.truncf %76 : vector<8x8xf32> to vector<8x8xbf16>
    %cst_40 = arith.constant dense<0.000000e+00> : vector<8x8xf32>
    %81 = tpu.matmul %80, %63, %cst_40 {dimension_numbers = #tpu.dot_dimension_numbers<[1], [0], [0], [1], [0, 0, 1, 1], [], []>} : vector<8x8xbf16>, vector<8x8xbf16>, vector<8x8xf32> -> vector<8x8xf32>
    %c0_41 = arith.constant 0 : index
    %c16 = arith.constant 16 : index
    %82 = vector.load %arg23[%c0_41, %c16] : memref<8x32xf32, #tpu.memory_space<vmem>>, vector<8x8xf32>
    tpu.vector_store %arg23[%c0_41, %c16], %81 {strides = array<i32>} : memref<8x32xf32, #tpu.memory_space<vmem>>, vector<8x8xf32>,
    %83 = vector.extract_strided_slice %16 {offsets = [0, 24], sizes = [8, 8], strides = [1, 1]} : vector<8x96xbf16> to vector<8x8xbf16>
    %84 = vector.extract_strided_slice %16 {offsets = [0, 56], sizes = [8, 8], strides = [1, 1]} : vector<8x96xbf16> to vector<8x8xbf16>
    %85 = vector.extract_strided_slice %16 {offsets = [0, 88], sizes = [8, 8], strides = [1, 1]} : vector<8x96xbf16> to vector<8x8xbf16>
    %cst_42 = arith.constant dense<0.000000e+00> : vector<8x8xf32>
    %86 = tpu.matmul %83, %84, %cst_42 {dimension_numbers = #tpu.dot_dimension_numbers<[1], [1], [0], [0], [0, 0, 1, 0], [], []>} : vector<8x8xbf16>, vector<8x8xbf16>, vector<8x8xf32> -> vector<8x8xf32>
    %cst_43 = arith.constant 0.353553385 : f32
    %87 = vector.broadcast %cst_43 : f32 to vector<8x8xf32>
    %88 = arith.mulf %86, %87 : vector<8x8xf32>
    %cst_44 = arith.constant dense<0xFF800000> : vector<8xf32>
    %89 = vector.multi_reduction <maximumf>, %88, %cst_44 [1] : vector<8x8xf32> to vector<8xf32>
    %90 = vector.shape_cast %89 : vector<8xf32> to vector<8x1xf32>
    %91 = vector.broadcast %90 : vector<8x1xf32> to vector<8x8xf32>
    %92 = arith.subf %88, %91 : vector<8x8xf32>
    %93 = math.exp %92 : vector<8x8xf32>
    %cst_45 = arith.constant dense<0.000000e+00> : vector<8xf32>
    %94 = vector.multi_reduction <add>, %93, %cst_45 [1] : vector<8x8xf32> to vector<8xf32>
    %95 = vector.shape_cast %94 : vector<8xf32> to vector<8x1xf32>
    %96 = tpu.reciprocal %95 {approx = true} : vector<8x1xf32> -> vector<8x1xf32>
    %97 = vector.broadcast %96 : vector<8x1xf32> to vector<8x8xf32>
    %98 = arith.mulf %93, %97 : vector<8x8xf32>
    %c0_46 = arith.constant 0 : index
    %c3 = arith.constant 3 : index
    %c0_47 = arith.constant 0 : index
    %c0_48 = arith.constant 0 : index
    %99 = vector.load %arg22[%c0_46, %c3, %c0_47, %c0_48] : memref<1x4x8x8xf32, #tpu.memory_space<vmem>>, vector<1x1x8x8xf32>
    %100 = vector.shape_cast %99 : vector<1x1x8x8xf32> to vector<8x8xf32>
    %101 = vector.shape_cast %98 : vector<8x8xf32> to vector<1x1x8x8xf32>
    tpu.vector_store %arg22[%c0_46, %c3, %c0_47, %c0_48], %101 {strides = array<i32>} : memref<1x4x8x8xf32, #tpu.memory_space<vmem>>, vector<1x1x8x8xf32>,
    %102 = arith.truncf %98 : vector<8x8xf32> to vector<8x8xbf16>
    %cst_49 = arith.constant dense<0.000000e+00> : vector<8x8xf32>
    %103 = tpu.matmul %102, %85, %cst_49 {dimension_numbers = #tpu.dot_dimension_numbers<[1], [0], [0], [1], [0, 0, 1, 1], [], []>} : vector<8x8xbf16>, vector<8x8xbf16>, vector<8x8xf32> -> vector<8x8xf32>
    %c0_50 = arith.constant 0 : index
    %c24 = arith.constant 24 : index
    %104 = vector.load %arg23[%c0_50, %c24] : memref<8x32xf32, #tpu.memory_space<vmem>>, vector<8x8xf32>
    tpu.vector_store %arg23[%c0_50, %c24], %103 {strides = array<i32>} : memref<8x32xf32, #tpu.memory_space<vmem>>, vector<8x8xf32>,
    %c0_51 = arith.constant 0 : index
    %c0_52 = arith.constant 0 : index
    %105 = vector.load %arg23[%c0_51, %c0_52] : memref<8x32xf32, #tpu.memory_space<vmem>>, vector<8x32xf32>
    %c0_53 = arith.constant 0 : index
    %c0_54 = arith.constant 0 : index
    %c0_55 = arith.constant 0 : index
    %106 = vector.load %arg6[%c0_53, %c0_54, %c0_55] : memref<1x32x32xbf16, #tpu.memory_space<vmem>>, vector<1x32x32xbf16>
    %107 = vector.shape_cast %106 : vector<1x32x32xbf16> to vector<32x32xbf16>
    %108 = arith.truncf %105 : vector<8x32xf32> to vector<8x32xbf16>
    %cst_56 = arith.constant dense<0.000000e+00> : vector<8x32xf32>
    %109 = tpu.matmul %108, %107, %cst_56 {dimension_numbers = #tpu.dot_dimension_numbers<[1], [0], [0], [1], [0, 0, 1, 1], [], []>} : vector<8x32xbf16>, vector<32x32xbf16>, vector<8x32xf32> -> vector<8x32xf32>
    %c0_57 = arith.constant 0 : index
    %c0_58 = arith.constant 0 : index
    %c0_59 = arith.constant 0 : index
    %110 = vector.load %arg7[%c0_57, %c0_58, %c0_59] : memref<1x1x32xf32, #tpu.memory_space<vmem>>, vector<1x1x32xf32>
    %111 = vector.shape_cast %110 : vector<1x1x32xf32> to vector<1x32xf32>
    %112 = vector.broadcast %111 : vector<1x32xf32> to vector<8x32xf32>
    %113 = arith.addf %109, %112 : vector<8x32xf32>
    %114 = arith.addf %7, %113 : vector<8x32xf32>
    %c0_60 = arith.constant 0 : index
    %c0_61 = arith.constant 0 : index
    %c0_62 = arith.constant 0 : index
    %115 = vector.load %arg8[%c0_60, %c0_61, %c0_62] : memref<1x1x32xf32, #tpu.memory_space<vmem>>, vector<1x1x32xf32>
    %116 = vector.shape_cast %115 : vector<1x1x32xf32> to vector<1x32xf32>
    %c0_63 = arith.constant 0 : index
    %c0_64 = arith.constant 0 : index
    %c0_65 = arith.constant 0 : index
    %117 = vector.load %arg9[%c0_63, %c0_64, %c0_65] : memref<1x1x32xf32, #tpu.memory_space<vmem>>, vector<1x1x32xf32>
    %118 = vector.shape_cast %117 : vector<1x1x32xf32> to vector<1x32xf32>
    %cst_66 = arith.constant dense<0.000000e+00> : vector<8xf32>
    %119 = vector.multi_reduction <add>, %114, %cst_66 [1] : vector<8x32xf32> to vector<8xf32>
    %120 = vector.shape_cast %119 : vector<8xf32> to vector<8x1xf32>
    %cst_67 = arith.constant 3.200000e+01 : f32
    %121 = vector.broadcast %cst_67 : f32 to vector<8x1xf32>
    %122 = arith.divf %120, %121 : vector<8x1xf32>
    %123 = vector.broadcast %122 : vector<8x1xf32> to vector<8x32xf32>
    %124 = arith.subf %114, %123 : vector<8x32xf32>
    %125 = arith.mulf %124, %124 : vector<8x32xf32>
    %cst_68 = arith.constant dense<0.000000e+00> : vector<8xf32>
    %126 = vector.multi_reduction <add>, %125, %cst_68 [1] : vector<8x32xf32> to vector<8xf32>
    %127 = vector.shape_cast %126 : vector<8xf32> to vector<8x1xf32>
    %cst_69 = arith.constant 3.200000e+01 : f32
    %128 = vector.broadcast %cst_69 : f32 to vector<8x1xf32>
    %129 = arith.divf %127, %128 : vector<8x1xf32>
    %cst_70 = arith.constant 9.99999974E-6 : f32
    %130 = vector.broadcast %cst_70 : f32 to vector<8x1xf32>
    %131 = arith.addf %129, %130 : vector<8x1xf32>
    %132 = math.rsqrt %131 : vector<8x1xf32>
    %133 = vector.broadcast %132 : vector<8x1xf32> to vector<8x32xf32>
    %134 = arith.mulf %124, %133 : vector<8x32xf32>
    %135 = vector.broadcast %116 : vector<1x32xf32> to vector<8x32xf32>
    %136 = arith.mulf %134, %135 : vector<8x32xf32>
    %137 = vector.broadcast %118 : vector<1x32xf32> to vector<8x32xf32>
    %138 = arith.addf %136, %137 : vector<8x32xf32>
    %c0_71 = arith.constant 0 : index
    %c0_72 = arith.constant 0 : index
    %c0_73 = arith.constant 0 : index
    %139 = vector.load %arg10[%c0_71, %c0_72, %c0_73] : memref<1x32x128xbf16, #tpu.memory_space<vmem>>, vector<1x32x128xbf16>
    %140 = vector.shape_cast %139 : vector<1x32x128xbf16> to vector<32x128xbf16>
    %141 = arith.truncf %138 : vector<8x32xf32> to vector<8x32xbf16>
    %cst_74 = arith.constant dense<0.000000e+00> : vector<8x128xf32>
    %142 = tpu.matmul %141, %140, %cst_74 {dimension_numbers = #tpu.dot_dimension_numbers<[1], [0], [0], [1], [0, 0, 1, 1], [], []>} : vector<8x32xbf16>, vector<32x128xbf16>, vector<8x128xf32> -> vector<8x128xf32>
    %c0_75 = arith.constant 0 : index
    %c0_76 = arith.constant 0 : index
    %c0_77 = arith.constant 0 : index
    %143 = vector.load %arg11[%c0_75, %c0_76, %c0_77] : memref<1x1x128xf32, #tpu.memory_space<vmem>>, vector<1x1x128xf32>
    %144 = vector.shape_cast %143 : vector<1x1x128xf32> to vector<1x128xf32>
    %145 = vector.broadcast %144 : vector<1x128xf32> to vector<8x128xf32>
    %146 = arith.addf %142, %145 : vector<8x128xf32>
    %cst_78 = arith.constant 0.000000e+00 : f32
    %147 = vector.broadcast %cst_78 : f32 to vector<8x128xf32>
    %148 = arith.maximumf %146, %147 : vector<8x128xf32>
    %c0_79 = arith.constant 0 : index
    %c0_80 = arith.constant 0 : index
    %c0_81 = arith.constant 0 : index
    %149 = vector.load %arg12[%c0_79, %c0_80, %c0_81] : memref<1x128x32xbf16, #tpu.memory_space<vmem>>, vector<1x128x32xbf16>
    %150 = vector.shape_cast %149 : vector<1x128x32xbf16> to vector<128x32xbf16>
    %151 = arith.truncf %148 : vector<8x128xf32> to vector<8x128xbf16>
    %cst_82 = arith.constant dense<0.000000e+00> : vector<8x32xf32>
    %152 = tpu.matmul %151, %150, %cst_82 {dimension_numbers = #tpu.dot_dimension_numbers<[1], [0], [0], [1], [0, 0, 1, 1], [], []>} : vector<8x128xbf16>, vector<128x32xbf16>, vector<8x32xf32> -> vector<8x32xf32>
    %c0_83 = arith.constant 0 : index
    %c0_84 = arith.constant 0 : index
    %c0_85 = arith.constant 0 : index
    %153 = vector.load %arg13[%c0_83, %c0_84, %c0_85] : memref<1x1x32xf32, #tpu.memory_space<vmem>>, vector<1x1x32xf32>
    %154 = vector.shape_cast %153 : vector<1x1x32xf32> to vector<1x32xf32>
    %155 = vector.broadcast %154 : vector<1x32xf32> to vector<8x32xf32>
    %156 = arith.addf %152, %155 : vector<8x32xf32>
    %157 = arith.addf %138, %156 : vector<8x32xf32>
    %c0_86 = arith.constant 0 : index
    %c0_87 = arith.constant 0 : index
    %c0_88 = arith.constant 0 : index
    %158 = vector.load %arg14[%c0_86, %c0_87, %c0_88] : memref<1x1x32xf32, #tpu.memory_space<vmem>>, vector<1x1x32xf32>
    %159 = vector.shape_cast %158 : vector<1x1x32xf32> to vector<1x32xf32>
    %c0_89 = arith.constant 0 : index
    %c0_90 = arith.constant 0 : index
    %c0_91 = arith.constant 0 : index
    %160 = vector.load %arg15[%c0_89, %c0_90, %c0_91] : memref<1x1x32xf32, #tpu.memory_space<vmem>>, vector<1x1x32xf32>
    %161 = vector.shape_cast %160 : vector<1x1x32xf32> to vector<1x32xf32>
    %cst_92 = arith.constant dense<0.000000e+00> : vector<8xf32>
    %162 = vector.multi_reduction <add>, %157, %cst_92 [1] : vector<8x32xf32> to vector<8xf32>
    %163 = vector.shape_cast %162 : vector<8xf32> to vector<8x1xf32>
    %cst_93 = arith.constant 3.200000e+01 : f32
    %164 = vector.broadcast %cst_93 : f32 to vector<8x1xf32>
    %165 = arith.divf %163, %164 : vector<8x1xf32>
    %166 = vector.broadcast %165 : vector<8x1xf32> to vector<8x32xf32>
    %167 = arith.subf %157, %166 : vector<8x32xf32>
    %168 = arith.mulf %167, %167 : vector<8x32xf32>
    %cst_94 = arith.constant dense<0.000000e+00> : vector<8xf32>
    %169 = vector.multi_reduction <add>, %168, %cst_94 [1] : vector<8x32xf32> to vector<8xf32>
    %170 = vector.shape_cast %169 : vector<8xf32> to vector<8x1xf32>
    %cst_95 = arith.constant 3.200000e+01 : f32
    %171 = vector.broadcast %cst_95 : f32 to vector<8x1xf32>
    %172 = arith.divf %170, %171 : vector<8x1xf32>
    %cst_96 = arith.constant 9.99999974E-6 : f32
    %173 = vector.broadcast %cst_96 : f32 to vector<8x1xf32>
    %174 = arith.addf %172, %173 : vector<8x1xf32>
    %175 = math.rsqrt %174 : vector<8x1xf32>
    %176 = vector.broadcast %175 : vector<8x1xf32> to vector<8x32xf32>
    %177 = arith.mulf %167, %176 : vector<8x32xf32>
    %178 = vector.broadcast %159 : vector<1x32xf32> to vector<8x32xf32>
    %179 = arith.mulf %177, %178 : vector<8x32xf32>
    %180 = vector.broadcast %161 : vector<1x32xf32> to vector<8x32xf32>
    %181 = arith.addf %179, %180 : vector<8x32xf32>
    %c0_97 = arith.constant 0 : index
    %c0_98 = arith.constant 0 : index
    %182 = vector.load %arg16[%c0_97, %c0_98] : memref<1x32xf32, #tpu.memory_space<vmem>>, vector<1x32xf32>
    %c0_99 = arith.constant 0 : index
    %c0_100 = arith.constant 0 : index
    %183 = vector.load %arg17[%c0_99, %c0_100] : memref<1x32xf32, #tpu.memory_space<vmem>>, vector<1x32xf32>
    %cst_101 = arith.constant dense<0.000000e+00> : vector<8xf32>
    %184 = vector.multi_reduction <add>, %181, %cst_101 [1] : vector<8x32xf32> to vector<8xf32>
    %185 = vector.shape_cast %184 : vector<8xf32> to vector<8x1xf32>
    %cst_102 = arith.constant 3.200000e+01 : f32
    %186 = vector.broadcast %cst_102 : f32 to vector<8x1xf32>
    %187 = arith.divf %185, %186 : vector<8x1xf32>
    %188 = vector.broadcast %187 : vector<8x1xf32> to vector<8x32xf32>
    %189 = arith.subf %181, %188 : vector<8x32xf32>
    %190 = arith.mulf %189, %189 : vector<8x32xf32>
    %cst_103 = arith.constant dense<0.000000e+00> : vector<8xf32>
    %191 = vector.multi_reduction <add>, %190, %cst_103 [1] : vector<8x32xf32> to vector<8xf32>
    %192 = vector.shape_cast %191 : vector<8xf32> to vector<8x1xf32>
    %cst_104 = arith.constant 3.200000e+01 : f32
    %193 = vector.broadcast %cst_104 : f32 to vector<8x1xf32>
    %194 = arith.divf %192, %193 : vector<8x1xf32>
    %cst_105 = arith.constant 9.99999974E-6 : f32
    %195 = vector.broadcast %cst_105 : f32 to vector<8x1xf32>
    %196 = arith.addf %194, %195 : vector<8x1xf32>
    %197 = math.rsqrt %196 : vector<8x1xf32>
    %198 = vector.broadcast %197 : vector<8x1xf32> to vector<8x32xf32>
    %199 = arith.mulf %189, %198 : vector<8x32xf32>
    %200 = vector.broadcast %182 : vector<1x32xf32> to vector<8x32xf32>
    %201 = arith.mulf %199, %200 : vector<8x32xf32>
    %202 = vector.broadcast %183 : vector<1x32xf32> to vector<8x32xf32>
    %203 = arith.addf %201, %202 : vector<8x32xf32>
    %204 = vector.shape_cast %203 : vector<8x32xf32> to vector<1x8x32xf32>
    %c0_106 = arith.constant 0 : index
    %c0_107 = arith.constant 0 : index
    %c0_108 = arith.constant 0 : index
    %205 = vector.load %arg20[%c0_106, %c0_107, %c0_108] : memref<1x8x32xf32, #tpu.memory_space<vmem>>, vector<1x8x32xf32>
    tpu.vector_store %arg20[%c0_106, %c0_107, %c0_108], %204 {strides = array<i32>} : memref<1x8x32xf32, #tpu.memory_space<vmem>>, vector<1x8x32xf32>,
    %c0_109 = arith.constant 0 : index
    %c0_110 = arith.constant 0 : index
    %206 = vector.load %arg18[%c0_109, %c0_110] : memref<32x16xbf16, #tpu.memory_space<vmem>>, vector<32x16xbf16>
    %207 = arith.truncf %203 : vector<8x32xf32> to vector<8x32xbf16>
    %cst_111 = arith.constant dense<0.000000e+00> : vector<8x16xf32>
    %208 = tpu.matmul %207, %206, %cst_111 {dimension_numbers = #tpu.dot_dimension_numbers<[1], [0], [0], [1], [0, 0, 1, 1], [], []>} : vector<8x32xbf16>, vector<32x16xbf16>, vector<8x16xf32> -> vector<8x16xf32>
    %c0_112 = arith.constant 0 : index
    %c0_113 = arith.constant 0 : index
    %209 = vector.load %arg19[%c0_112, %c0_113] : memref<1x16xf32, #tpu.memory_space<vmem>>, vector<1x16xf32>
    %210 = vector.broadcast %209 : vector<1x16xf32> to vector<8x16xf32>
    %211 = arith.addf %208, %210 : vector<8x16xf32>
    %212 = vector.shape_cast %211 : vector<8x16xf32> to vector<1x8x16xf32>
    %c0_114 = arith.constant 0 : index
    %c0_115 = arith.constant 0 : index
    %c0_116 = arith.constant 0 : index
    %213 = vector.load %arg21[%c0_114, %c0_115, %c0_116] : memref<1x8x16xf32, #tpu.memory_space<vmem>>, vector<1x8x16xf32>
    tpu.vector_store %arg21[%c0_114, %c0_115, %c0_116], %212 {strides = array<i32>} : memref<1x8x16xf32, #tpu.memory_space<vmem>>, vector<1x8x16xf32>,
    return
  }
  func.func @transform_0(%arg0: i32) -> (i32, i32, i32) {
    %c0_i32 = arith.constant 0 : i32
    %c0_i32_0 = arith.constant 0 : i32
    %c0_i32_1 = arith.constant 0 : i32
    return %arg0, %c0_i32, %c0_i32_0 : i32, i32, i32
  }
  func.func @transform_1(%arg0: i32) -> (i32, i32) {
    %c0_i32 = arith.constant 0 : i32
    %c0_i32_0 = arith.constant 0 : i32
    %c0_i32_1 = arith.constant 0 : i32
    return %c0_i32, %c0_i32_0 : i32, i32
  }
  func.func @transform_2(%arg0: i32) -> (i32, i32) {
    %c0_i32 = arith.constant 0 : i32
    %c0_i32_0 = arith.constant 0 : i32
    %c0_i32_1 = arith.constant 0 : i32
    return %c0_i32, %c0_i32_0 : i32, i32
  }
  func.func @transform_3(%arg0: i32) -> (i32, i32, i32) {
    %c0_i32 = arith.constant 0 : i32
    %c0_i32_0 = arith.constant 0 : i32
    %c0_i32_1 = arith.constant 0 : i32
    %c0_i32_2 = arith.constant 0 : i32
    return %c0_i32, %c0_i32_0, %c0_i32_1 : i32, i32, i32
  }
  func.func @transform_4(%arg0: i32) -> (i32, i32, i32) {
    %c0_i32 = arith.constant 0 : i32
    %c0_i32_0 = arith.constant 0 : i32
    %c0_i32_1 = arith.constant 0 : i32
    %c0_i32_2 = arith.constant 0 : i32
    return %c0_i32, %c0_i32_0, %c0_i32_1 : i32, i32, i32
  }
  func.func @transform_5(%arg0: i32) -> (i32, i32, i32) {
    %c0_i32 = arith.constant 0 : i32
    %c0_i32_0 = arith.constant 0 : i32
    %c0_i32_1 = arith.constant 0 : i32
    %c0_i32_2 = arith.constant 0 : i32
    return %c0_i32, %c0_i32_0, %c0_i32_1 : i32, i32, i32
  }
  func.func @transform_6(%arg0: i32) -> (i32, i32, i32) {
    %c0_i32 = arith.constant 0 : i32
    %c0_i32_0 = arith.constant 0 : i32
    %c0_i32_1 = arith.constant 0 : i32
    %c0_i32_2 = arith.constant 0 : i32
    return %c0_i32, %c0_i32_0, %c0_i32_1 : i32, i32, i32
  }
  func.func @transform_7(%arg0: i32) -> (i32, i32, i32) {
    %c0_i32 = arith.constant 0 : i32
    %c0_i32_0 = arith.constant 0 : i32
    %c0_i32_1 = arith.constant 0 : i32
    %c0_i32_2 = arith.constant 0 : i32
    return %c0_i32, %c0_i32_0, %c0_i32_1 : i32, i32, i32
  }
  func.func @transform_8(%arg0: i32) -> (i32, i32, i32) {
    %c0_i32 = arith.constant 0 : i32
    %c0_i32_0 = arith.constant 0 : i32
    %c0_i32_1 = arith.constant 0 : i32
    %c0_i32_2 = arith.constant 0 : i32
    return %c0_i32, %c0_i32_0, %c0_i32_1 : i32, i32, i32
  }
  func.func @transform_9(%arg0: i32) -> (i32, i32, i32) {
    %c0_i32 = arith.constant 0 : i32
    %c0_i32_0 = arith.constant 0 : i32
    %c0_i32_1 = arith.constant 0 : i32
    %c0_i32_2 = arith.constant 0 : i32
    return %c0_i32, %c0_i32_0, %c0_i32_1 : i32, i32, i32
  }
  func.func @transform_10(%arg0: i32) -> (i32, i32, i32) {
    %c0_i32 = arith.constant 0 : i32
    %c0_i32_0 = arith.constant 0 : i32
    %c0_i32_1 = arith.constant 0 : i32
    %c0_i32_2 = arith.constant 0 : i32
    return %c0_i32, %c0_i32_0, %c0_i32_1 : i32, i32, i32
  }
  func.func @transform_11(%arg0: i32) -> (i32, i32, i32) {
    %c0_i32 = arith.constant 0 : i32
    %c0_i32_0 = arith.constant 0 : i32
    %c0_i32_1 = arith.constant 0 : i32
    %c0_i32_2 = arith.constant 0 : i32
    return %c0_i32, %c0_i32_0, %c0_i32_1 : i32, i32, i32
  }
  func.func @transform_12(%arg0: i32) -> (i32, i32, i32) {
    %c0_i32 = arith.constant 0 : i32
    %c0_i32_0 = arith.constant 0 : i32
    %c0_i32_1 = arith.constant 0 : i32
    %c0_i32_2 = arith.constant 0 : i32
    return %c0_i32, %c0_i32_0, %c0_i32_1 : i32, i32, i32
  }
  func.func @transform_13(%arg0: i32) -> (i32, i32, i32) {
    %c0_i32 = arith.constant 0 : i32
    %c0_i32_0 = arith.constant 0 : i32
    %c0_i32_1 = arith.constant 0 : i32
    %c0_i32_2 = arith.constant 0 : i32
    return %c0_i32, %c0_i32_0, %c0_i32_1 : i32, i32, i32
  }
  func.func @transform_14(%arg0: i32) -> (i32, i32, i32) {
    %c0_i32 = arith.constant 0 : i32
    %c0_i32_0 = arith.constant 0 : i32
    %c0_i32_1 = arith.constant 0 : i32
    %c0_i32_2 = arith.constant 0 : i32
    return %c0_i32, %c0_i32_0, %c0_i32_1 : i32, i32, i32
  }
  func.func @transform_15(%arg0: i32) -> (i32, i32) {
    %c0_i32 = arith.constant 0 : i32
    %c0_i32_0 = arith.constant 0 : i32
    %c0_i32_1 = arith.constant 0 : i32
    return %c0_i32, %c0_i32_0 : i32, i32
  }
  func.func @transform_16(%arg0: i32) -> (i32, i32) {
    %c0_i32 = arith.constant 0 : i32
    %c0_i32_0 = arith.constant 0 : i32
    %c0_i32_1 = arith.constant 0 : i32
    return %c0_i32, %c0_i32_0 : i32, i32
  }
  func.func @transform_17(%arg0: i32) -> (i32, i32) {
    %c0_i32 = arith.constant 0 : i32
    %c0_i32_0 = arith.constant 0 : i32
    %c0_i32_1 = arith.constant 0 : i32
    return %c0_i32, %c0_i32_0 : i32, i32
  }
  func.func @transform_18(%arg0: i32) -> (i32, i32) {
    %c0_i32 = arith.constant 0 : i32
    %c0_i32_0 = arith.constant 0 : i32
    %c0_i32_1 = arith.constant 0 : i32
    return %c0_i32, %c0_i32_0 : i32, i32
  }
  func.func @transform_19(%arg0: i32) -> (i32, i32, i32) {
    %c0_i32 = arith.constant 0 : i32
    %c0_i32_0 = arith.constant 0 : i32
    %c0_i32_1 = arith.constant 0 : i32
    return %arg0, %c0_i32, %c0_i32_0 : i32, i32, i32
  }
  func.func @transform_20(%arg0: i32) -> (i32, i32, i32) {
    %c0_i32 = arith.constant 0 : i32
    %c0_i32_0 = arith.constant 0 : i32
    %c0_i32_1 = arith.constant 0 : i32
    return %arg0, %c0_i32, %c0_i32_0 : i32, i32, i32
  }
  func.func @transform_21(%arg0: i32) -> (i32, i32, i32, i32) {
    %c0_i32 = arith.constant 0 : i32
    %c0_i32_0 = arith.constant 0 : i32
    %c0_i32_1 = arith.constant 0 : i32
    %c0_i32_2 = arith.constant 0 : i32
    return %arg0, %c0_i32, %c0_i32_0, %c0_i32_1 : i32, i32, i32, i32
  }
}

</mosaic_0001>

<bundles_post_ra>
// kernel: dual_forward.2
= control target key start
LH: loop header
LB: loop body
LE: loop exit
PB: predicated region body
PF: predicated region fallthrough
CT: control target
= control target key end

     0   :  { %s2371_s0 = inlined_call_operand.vmem [shape: f32[2,16,8], index: 0, kind: input, shape index: {}]   ;;  %s2372_s1 = inlined_call_operand.vmem [shape: bf16[16,32], index: 1, kind: input, shape index: {}]   ;;  %s2373_s2 = inlined_call_operand.vmem [shape: f32[1,32], index: 2, kind: input, shape index: {}]   ;;  %s2374_s3 = inlined_call_operand.vmem [shape: bf16[1,32,96], index: 3, kind: input, shape index: {}]   ;;  %s2375_s4 = inlined_call_operand.vmem [shape: f32[1,1,96], index: 4, kind: input, shape index: {}]   ;;  %s2376_s5 = inlined_call_operand.vmem [shape: bf16[1,32,32], index: 5, kind: input, shape index: {}]   ;;  %s2377_s6 = inlined_call_operand.vmem [shape: f32[1,1,32], index: 6, kind: input, shape index: {}]   ;;  %s2378_s7 = inlined_call_operand.vmem [shape: f32[1,1,32], index: 7, kind: input, shape index: {}]   ;;  %s2379_s8 = inlined_call_operand.vmem [shape: f32[1,1,32], index: 8, kind: input, shape index: {}]   ;;  %s2380_s9 = inlined_call_operand.vmem [shape: bf16[1,32,128], index: 9, kind: input, shape index: {}]   ;;  %s2381_s10 = inlined_call_operand.vmem [shape: f32[1,1,128], index: 10, kind: input, shape index: {}]   ;;  %s2382_s11 = inlined_call_operand.vmem [shape: bf16[1,128,32], index: 11, kind: input, shape index: {}]   ;;  %s2383_s12 = inlined_call_operand.vmem [shape: f32[1,1,32], index: 12, kind: input, shape index: {}]   ;;  %s2384_s13 = inlined_call_operand.vmem [shape: f32[1,1,32], index: 13, kind: input, shape index: {}]   ;;  %s2385_s14 = inlined_call_operand.vmem [shape: f32[1,1,32], index: 14, kind: input, shape index: {}]   ;;  %s2386_s15 = inlined_call_operand.vmem [shape: f32[1,32], index: 15, kind: input, shape index: {}]   ;;  %s2387_s16 = inlined_call_operand.vmem [shape: f32[1,32], index: 16, kind: input, shape index: {}]   ;;  %s2388_s17 = inlined_call_operand.vmem [shape: bf16[32,16], index: 17, kind: input, shape index: {}]   ;;  %s2389_s18 = inlined_call_operand.vmem [shape: f32[1,16], index: 18, kind: input, shape index: {}]   ;;  %s2390_s19 = inlined_call_operand.hbm [shape: f32[2,8,32], index: 19, kind: output, shape index: {0}]   ;;  %s2391_s20 = inlined_call_operand.hbm [shape: f32[2,8,16], index: 20, kind: output, shape index: {1}]   ;;  %s2392_s21 = inlined_call_operand.vmem [shape: f32[2,4,8,8], index: 21, kind: output, shape index: {2}]  }
   0x1   :  { %2400 = sst [smem:[#allocation12_spill]] %s2371_s0 }
   0x2   :  { %2401 = sst [smem:[#allocation13_spill]] %s2372_s1 }
   0x3   :  { %2402 = sst [smem:[#allocation14_spill]] %s2373_s2 }
   0x4   :  { %2403 = sst [smem:[#allocation15_spill]] %s2374_s3 }
   0x5   :  { %2404 = sst [smem:[#allocation16_spill]] %s2375_s4 }
   0x6   :  { %2405 = sst [smem:[#allocation17_spill]] %s2376_s5 }
   0x7   :  { %2406 = sst [smem:[#allocation18_spill]] %s2377_s6 }
   0x8   :  { %2407 = sst [smem:[#allocation19_spill]] %s2378_s7 }
   0x9   :  { %2408 = sst [smem:[#allocation20_spill]] %s2379_s8 }
   0xa   :  { %2409 = sst [smem:[#allocation21_spill]] %s2380_s9 }
   0xb   :  { %2410 = sst [smem:[#allocation22_spill]] %s2381_s10 }
   0xc   :  { %2411 = sst [smem:[#allocation23_spill]] %s2382_s11 }
   0xd   :  { %2412 = sst [smem:[#allocation24_spill]] %s2383_s12 }
   0xe   :  { %27 = vsyncpa [#allocation4], 0 }
   0xf   :  { %29 = vsyncpa [#allocation4 + $0x1], 0 }
  0x10   :  { %30 = vsyncpa [#allocation6], 0 }
  0x11   :  { %32 = vsyncpa [#allocation6 + $0x1], 0  ;;  %s2085_s2 = smov 0   ;;  %s2087_s25 = smov 0  }
  0x12   :  { %s2089_s26 = smov 0   ;;  %s2091_s27 = smov 0  }
  0x13 LB: > { %2413 = sst [smem:[#allocation9_spill]] %s1952_s26  ;;  %s2106_s3 = sadd.s32 4294967295, %s1956_s27   ;;  %s1956_s27 = sphi %s2091_s27, %s2432_s27   ;;  %s1952_s26 = sphi %s2089_s26, %s2434_s26   ;;  %s1948_s25 = sphi %s2087_s25, %s2436_s25   ;;  %s1944_s2 = sphi %s2085_s2, %s2435_s2  }
  0x14   : > { %s1637_s28 = sadd.s32 4294967294, %s1956_s27   ;;  %s2110_s29 = sadd.s32 1, %s1956_s27  }
  0x15   : > { %2414 = sst [smem:[#allocation10_spill]] %s2110_s29  ;;  %s449_s0 = sadd.s32 1, %s1952_s26 }
  0x16   : > { %s446_s4 = ssub.s32 %s1956_s27, %s2110_s29  ;;  %p459_p0 = scmp.ne.s32.totalorder %s1952_s26, %s1948_s25 }
  0x17   : > { %p447_p1 = scmp.eq.s32.totalorder %s446_s4, 0  ;;  %p460_p2 = scmp.eq.s32.totalorder %s2106_s3, 1 }
  0x18   : > { %p465_p3 = scmp.ne.s32.totalorder %s1948_s25, %s1944_s2  ;;  %p466_p4 = scmp.eq.s32.totalorder %s1637_s28, 1 }
  0x19   : > { %s2121_s30 = scalar_select %p447_p1, %s1952_s26, %s449_s0  }
  0x1a   : > { %p2123_p5 = por %p460_p2, %p459_p0  ;;  %p2127_p6 = por %p466_p4, %p465_p3 }
  0x1b   : > { %2415 = sst [smem:[#allocation11_spill]] %s2121_s30  ;;  %p1640_p7 = scmp.ge.s32.totalorder %s1956_s27, 1 }
  0x1c   : > { %p598_p8 = scmp.lt.s32.totalorder %s1956_s27, 3 }
  0x1e   : > { %p599_p9 = pnand %p1640_p7, %p598_p8 }
  0x1f   : > { %p668_p10 = scmp.lt.s32.totalorder (!%p599_p9), %s2106_s3, 1  ;;  %s2418_s0 = sld [smem:[#allocation12_spill]] (!%p599_p9) }
  0x20   : > { %602 = sbr.rel (%p599_p9) target bundleno = 2776 (0xad8), region = 96  ;;  %s2419_s28 = sld [smem:[#allocation13_spill]] (!%p599_p9) }
  0x21   : > { %s2421_s29 = sld [smem:[#allocation14_spill]] (!%p599_p9)  ;;  %s1959_s26 = smov (!%p599_p9), 72  }
  0x22   : > { %s2422_s24 = sld [smem:[#allocation16_spill]] (!%p599_p9)  ;;  %s1961_s30 = smov (!%p599_p9), 96  }
  0x23   : > { %s2424_s6 = sld [smem:[#allocation18_spill]] (!%p599_p9) }
  0x24   : > { %s2425_s9 = sld [smem:[#allocation21_spill]] (!%p599_p9) }
  0x25   : > { %v1958_v0 = vmov 16.0   ;;  %s2135_s23 = scalar_select %p668_p10, %s2106_s3, 1  ;;  %vm681_vm0 = vcmask 64512   ;;  %vm787_vm8 = vcmask 130048   ;;  %vm825_vm9 = vcmask 261120  }
  0x26   : > { %1832 = vrcp.f32 %v1958_v0  ;;  %v1739_v41 = vld [vmem:[%s2419_s28] sm:$0xff]  ;;  %s1962_s28 = smov 48   ;;  %vm886_vm10 = vcmask 1043456   ;;  %vm967_vm11 = vcmask 130112   ;;  %vm1032_vm12 = vcmask 195712   ;;  %s2426_s11 = sld [smem:[#allocation23_spill]] }
  0x27   : > { %s1737_s1 = sshll.u32 %s2135_s23, 4  ;;  %798 = vmatpush.bf16.msra.mxu1 %v1739_v41  ;;  %v1820_v61 = vld [vmem:[%s2421_s29] ss:$0 sm:$0xff]  ;;  %s1960_s29 = smov 120   ;;  %vm1097_vm13 = vcmask 261312  }
  0x28   : > { %s672_s4 = scalar_lea.vmem %s2418_s0, %s1737_s1  ;;  %s2420_s1 = sld [smem:[#allocation15_spill]] }
  0x29   : > { %v679_v1 = vld [vmem:[%s672_s4] sm:$0xff]  ;;  %v680_v2 = vld [vmem:[%s672_s4 + $0x8] sm:$0xff]  ;;  %s1963_s0 = smov 80   ;;  %s1964_s4 = smov 88  }
  0x2a   : > { %v682_v4 = vsel %vm681_vm0, %v679_v1, 0.0  ;;  %v683_v5 = vsel %vm681_vm0, %v680_v2, 0.0  ;;  %s2427_s7 = sld [smem:[#allocation19_spill]] }
  0x2b   : > { %v684_v6 = vadd.f32 %v683_v5, %v682_v4  ;;  %s2428_s8 = sld [smem:[#allocation20_spill]] }
  0x2c   : > { %v1833_v3 = vpop.eup %1832  ;;  %s2429_s10 = sld [smem:[#allocation22_spill]] }
  0x2d   : > { %v692_v7 = vmul.f32 16.0, %v1833_v3  ;;  %v685_v8 = vrot.slane %v684_v6, 4  ;;  %vm696_vm1 = vweird.f32 %v1833_v3  ;;  %s2430_s12 = sld [smem:[#allocation24_spill]] }
  0x2e   : > { %v1741_v57 = vld [vmem:[%s2420_s1 + $0x8] sm:$0xff]  ;;  %v1740_v58 = vld [vmem:[%s2420_s1] sm:$0xff]  ;;  %s1966_s1 = smov 104  }
  0x2f   : > { %v693_v9 = vsub.f32 1.0, %v692_v7  ;;  %v686_v10 = vadd.f32 %v685_v8, %v684_v6  ;;  %835 = vmatpush.bf16.msrb.mxu1 %v1741_v57 }
  0x31   : > { %v694_v11 = vmul.f32 %v1833_v3, %v693_v9  ;;  %v687_v12 = vrot.slane %v686_v10, 2 }
  0x33   : > { %v695_v13 = vadd.f32 %v1833_v3, %v694_v11  ;;  %v688_v14 = vadd.f32 %v687_v12, %v686_v10  ;;  %836 = vmatpush.bf16.msrb.mxu1 %v1740_v58 }
  0x35   : > { %v689_v15 = vrot.slane %v688_v14, 1  ;;  %v697_v16 = vsel %vm696_vm1, %v1833_v3, %v695_v13 }
  0x37   : > { %v690_v17 = vadd.f32 %v689_v15, %v688_v14 }
  0x39   : > { %v2143_v18 = vmul.f32 %v697_v16, %v690_v17 }
  0x3b   : > { %v699_v19 = vsub.f32 %v679_v1, %v2143_v18  ;;  %v700_v20 = vsub.f32 %v680_v2, %v2143_v18  ;;  %v1821_v2 = vld [vmem:[%s2422_s24] ss:$0 sm:$0xff]  ;;  %s1965_s24 = smov 40  }
  0x3d   : > { %v701_v21 = vmul.f32 %v699_v19, %v699_v19  ;;  %v702_v22 = vmul.f32 %v700_v20, %v700_v20 }
  0x3f   : > { %v703_v23 = vsel %vm681_vm0, %v701_v21, 0.0  ;;  %v704_v24 = vsel %vm681_vm0, %v702_v22, 0.0 }
  0x40   : > { %v705_v25 = vadd.f32 %v704_v24, %v703_v23 }
  0x42   : > { %v706_v26 = vrot.slane %v705_v25, 4 }
  0x44   : > { %v707_v27 = vadd.f32 %v706_v26, %v705_v25 }
  0x46   : > { %v708_v28 = vrot.slane %v707_v27, 2 }
  0x48   : > { %v709_v29 = vadd.f32 %v708_v28, %v707_v27 }
  0x4a   : > { %v710_v30 = vrot.slane %v709_v29, 1 }
  0x4c   : > { %v711_v31 = vadd.f32 %v710_v30, %v709_v29 }
  0x4e   : > { %v712_v32 = vmul.f32 %v711_v31, %v697_v16 }
  0x50   : > { %v713_v33 = vadd.f32 1e-05, %v712_v32 }
  0x52   : > { %1834 = vrsqrt.f32 %v713_v33  ;;  %vm721_vm2 = vcmp.eq.f32.partialorder %v713_v33, inf  ;;  %v724_v40 = vand.u32 2147483648, %v713_v33  ;;  %vm723_vm3 = vcmp.eq.f32.partialorder %v713_v33, 0.0 }
  0x58   : > { %v1835_v34 = vpop.eup %1834 }
  0x59   : > { %v715_v35 = vmul.f32 %v1835_v34, %v713_v33 }
  0x5b   : > { %v716_v36 = vmul.f32 %v1835_v34, %v715_v35 }
  0x5d   : > { %v717_v37 = vmul.f32 0.5, %v716_v36 }
  0x5f   : > { %v718_v38 = vsub.f32 1.5, %v717_v37 }
  0x61   : > { %v719_v39 = vmul.f32 %v1835_v34, %v718_v38 }
  0x63   : > { %v720_v42 = vmul.f32 %v719_v39, %v713_v33 }
  0x65   : > { %v722_v43 = vsel %vm721_vm2, %v713_v33, %v720_v42 }
  0x66   : > { %v2152_v44 = vsel %vm723_vm3, %v724_v40, %v722_v43 }
  0x67   : > { %1836 = vrcp.f32 %v2152_v44  ;;  %v737_v47 = vand.u32 2147483648, %v2152_v44  ;;  %vm731_vm4 = vweird.f32 %v2152_v44  ;;  %v735_v49 = vand.u32 2147483647, %v2152_v44 }
  0x69   : > { %v738_v51 = vor.u32 1.1754944e-38, %v737_v47  ;;  %vm736_vm7 = vcmp.eq.f32.partialorder %v735_v49, 8.507059e+37 }
  0x6d   : > { %v1837_v45 = vpop.eup %1836 }
  0x6e   : > { %v727_v46 = vmul.f32 %v1837_v45, %v2152_v44  ;;  %vm732_vm5 = vweird.f32 %v1837_v45 }
  0x6f   : > { %vm733_vm6 = vmor %vm731_vm4, %vm732_vm5 }
  0x70   : > { %v728_v48 = vsub.f32 1.0, %v727_v46 }
  0x72   : > { %v729_v50 = vmul.f32 %v1837_v45, %v728_v48 }
  0x74   : > { %v730_v52 = vadd.f32 %v1837_v45, %v729_v50 }
  0x76   : > { %v734_v53 = vsel %vm733_vm6, %v1837_v45, %v730_v52 }
  0x77   : > { %v739_v54 = vsel %vm736_vm7, %v738_v51, %v734_v53 }
  0x78   : > { %v740_v55 = vmul.f32 %v739_v54, %v699_v19  ;;  %v741_v56 = vmul.f32 %v739_v54, %v700_v20 }
  0x7a   : > { %742 = vxpose.xlu0.b32.start [1/2] (short) (narrow) %v740_v55, 8 }
  0x82   : > { %743 = vxpose.xlu0.b32.end [2/2] (short) (narrow) %v741_v56, 8 }
 0x11e   : > { %v758_v59 = vpop.trf.xlu0 }
 0x11f   : > { %v776_v60 = vpack.c.bf16 %v758_v59, %v758_v59 }
 0x121   : > { %1651 = vmatmul.msk.bf16.vlgmr.msra.gmra.mxu1 %vm787_vm8, %v776_v60 }
 0x19e   : > { %v800_v62 = vpop.f32.mrf.mxu1 }
 0x19f   : > { %v2169_v63 = vadd.f32 %v1820_v61, %v800_v62 }
 0x1a1   : > { %v808_v0 = vpack.c.bf16 %v2169_v63, %v2169_v63 }
 0x1a3   : > { %1660 = vmatmul.msk.bf16.vlgmr.msrb.gmra.mxu1 %vm825_vm9, %v808_v0 }
 0x1a6   : > { %v802_v1 = vpop.f32.mrf.mxu1 }
 0x220   : > { %v838_v3 = vpop.f32.mrf.mxu1 }
 0x221   : > { %v839_v4 = vadd.f32 %v1821_v2, %v838_v3 }
 0x223   : > { %v842_v5 = vpack.c.bf16 %v839_v4, %v839_v4 }
 0x225   : > { %v844_v6 = vunpack.c.l.b16 %v842_v5 }
 0x227   : > { %v2177_v7 = vpack.c.b16 %v844_v6, %v844_v6 }
 0x228   : > { %v840_v8 = vpop.f32.mrf.mxu1 }
 0x229   : > { %1036 = vrot.lane.b32.xlu0 %v2177_v7, %s1959_s26  ;;  %904 = vrot.lane.b32.xlu2 %v2177_v7, %s1960_s29  ;;  %s1967_s26 = smov 112   ;;  %s1969_s29 = smov 56  }
 0x22a   : > { %846 = vrot.lane.b32.xlu1 %v2177_v7, %s1961_s30  ;;  %s1738_s30 = sshll.u32 %s2135_s23, 5  ;;  %s1970_s23 = smov 16  }
 0x231   : > { %1007 = vrot.lane.b32.xlu0 %v2177_v7, %s1962_s28  ;;  %971 = vrot.lane.b32.xlu2 %v2177_v7, %s1963_s0  ;;  %s2306_s28 = sand.u32 1, %s1948_s25  }
 0x232   : > { %906 = vrot.lane.b32.xlu1 %v2177_v7, %s1964_s4  ;;  %s677_s4 = scalar_lea.vmem %s2392_s21, %s1738_s30  ;;  %s2423_s30 = sld [smem:[#allocation17_spill]] }
 0x239   : > { %1072 = vrot.lane.b32.xlu0 %v2177_v7, %s1965_s24  ;;  %1034 = vrot.lane.b32.xlu2 %v2177_v7, %s1966_s1  ;;  %s1968_s1 = smov 64   ;;  %s1971_s24 = smov 8  }
 0x23a   : > { %969 = vrot.lane.b32.xlu1 %v2177_v7, %s1967_s26  ;;  %s1972_s26 = smov 24  }
 0x283   : > { %v905_v9 = vpop.permute.xlu2 %904 }
 0x28b   : > { %v972_v10 = vpop.permute.xlu2 %971 }
 0x28c   : > { %v977_v11 = vsel %vm681_vm0, %v972_v10, 0 }
 0x28d   : > { %986 = vmatpush.bf16.xpose.msra.mxu1 %v977_v11 }
 0x293   : > { %v1035_v22 = vpop.permute.xlu2 %1034 }
 0x29b   : > { %v1037_v12 = vpop.permute.xlu0 %1036 }
 0x29c   : > { %v847_v13 = vpop.permute.xlu1 %846  ;;  %v1042_v20 = vsel %vm681_vm0, %v1037_v12, 0 }
 0x29d   : > { %v852_v14 = vsel %vm681_vm0, %v847_v13, 0 }
 0x29e   : > { %861 = vmatpush.bf16.xpose.msra.mxu2 %v852_v14 }
 0x2a3   : > { %v1008_v15 = vpop.permute.xlu0 %1007 }
 0x2a4   : > { %v907_v16 = vpop.permute.xlu1 %906  ;;  %v1013_v17 = vsel %vm886_vm10, %v1008_v15, 0 }
 0x2a5   : > { %1661 = vmatmul.msk.bf16.vlgmr.msra.gmra.mxu2 %vm681_vm0, %v842_v5  ;;  %v912_v19 = vsel %vm681_vm0, %v907_v16, 0 }
 0x2a6   : > { %921 = vmatpush.bf16.xpose.msra.mxu0 %v912_v19  ;;  %1022 = vmatpush.bf16.msrb.mxu2 %v1013_v17 }
 0x2ab   : > { %v1073_v8 = vpop.permute.xlu0 %1072 }
 0x2ac   : > { %v970_v21 = vpop.permute.xlu1 %969  ;;  %v1078_v13 = vsel %vm886_vm10, %v1073_v8, 0 }
 0x2ad   : > { %1663 = vmatmul.msk.bf16.vlgmr.msra.gmra.mxu0 %vm681_vm0, %v905_v9  ;;  %1666 = vmatmul.msk.bf16.vlgmr.msra.gmra.mxu1 %vm681_vm0, %v970_v21 }
 0x2ae   : > { %1051 = vmatpush.bf16.xpose.msrb.mxu0 %v1042_v20 }
 0x2bd   : > { %1669 = vmatmul.msk.bf16.vlgmr.msrb.gmra.mxu0 %vm681_vm0, %v1035_v22 }
 0x328   : > { %v863_v23 = vpop.f32.mrf.mxu2 }
 0x329   : > { %v867_v24 = vmul.f32 0.35355338, %v863_v23 }
 0x32a   : > { %v923_v25 = vpop.f32.mrf.mxu0  ;;  %v988_v26 = vpop.f32.mrf.mxu1 }
 0x32b   : > { %v927_v27 = vmul.f32 0.35355338, %v923_v25  ;;  %v868_v28 = vsel %vm681_vm0, %v867_v24, -inf  ;;  %v992_v31 = vmul.f32 0.35355338, %v988_v26 }
 0x32c   : > { %869 = vmax.xlane.f32.xlu1 %v868_v28  ;;  %v1743_v28 = vld [vmem:[%s2423_s30 + $0x8] sm:$0xff] }
 0x32d   : > { %v928_v29 = vsel %vm681_vm0, %v927_v27, -inf  ;;  %v993_v34 = vsel %vm681_vm0, %v992_v31, -inf  ;;  %1130 = vmatpush.bf16.msrb.mxu1 %v1743_v28 }
 0x32e   : > { %929 = vmax.xlane.f32.xlu2 %v928_v29 }
 0x330   : > { %v865_v30 = vpop.f32.mrf.mxu2 }
 0x332   : > { %v925_v32 = vpop.f32.mrf.mxu0  ;;  %v990_v33 = vpop.f32.mrf.mxu1 }
 0x336   : > { %994 = vmax.xlane.f32.xlu2 %v993_v34 }
 0x33a   : > { %v1053_v35 = vpop.f32.mrf.mxu0 }
 0x33b   : > { %v1057_v36 = vmul.f32 0.35355338, %v1053_v35  ;;  %v1822_v35 = vld [vmem:[%s2424_s6] ss:$0 sm:$0xff] }
 0x33d   : > { %v1058_v37 = vsel %vm681_vm0, %v1057_v36, -inf }
 0x33e   : > { %1059 = vmax.xlane.f32.xlu1 %v1058_v37 }
 0x342   : > { %v1055_v38 = vpop.f32.mrf.mxu0 }
 0x357   : > { %881 = vrot.lane.b32.xlu1 %v2177_v7, %s1968_s1 }
 0x39f   : > { %v870_v39 = vpop.xlane.xlu1 %869 }
 0x3a0   : > { %v871_v42 = vsub.f32 %v867_v24, %v870_v39 }
 0x3a1   : > { %v930_v40 = vpop.xlane.xlu2 %929 }
 0x3a2   : > { %v931_v41 = vsub.f32 %v927_v27, %v930_v40  ;;  %v872_v45 = vmul.f32 1.442695, %v871_v42 }
 0x3a4   : > { %v932_v43 = vmul.f32 1.442695, %v931_v41  ;;  %v1973_v41 = vmov 32.0  }
 0x3a6   : > { %1838 = vpow2.f32 %v932_v43 }
 0x3a7   : > { %1840 = vpow2.f32 %v872_v45 }
 0x3a9   : > { %v995_v46 = vpop.xlane.xlu2 %994 }
 0x3aa   : > { %v996_v47 = vsub.f32 %v992_v31, %v995_v46  ;;  %v1742_v31 = vld [vmem:[%s2423_s30] sm:$0xff] }
 0x3ab   : > { %1131 = vmatpush.bf16.msrb.mxu1 %v1742_v31 }
 0x3ac   : > { %v1839_v48 = vpop.eup %1838  ;;  %v997_v49 = vmul.f32 1.442695, %v996_v47 }
 0x3ad   : > { %v934_v50 = vsel %vm681_vm0, %v1839_v48, 0.0  ;;  %v1841_v51 = vpop.eup %1840 }
 0x3ae   : > { %1842 = vpow2.f32 %v997_v49  ;;  %935 = vadd.xlane.f32.xlu2 %v934_v50  ;;  %v874_v54 = vsel %vm681_vm0, %v1841_v51, 0.0 }
 0x3b1   : > { %v1060_v55 = vpop.xlane.xlu1 %1059 }
 0x3b2   : > { %v1061_v58 = vsub.f32 %v1057_v36, %v1060_v55  ;;  %v1753_v55 = vld [vmem:[%s2426_s11 + $0x38] sm:$0xff] }
 0x3b3   : > { %1284 = vmatpush.bf16.msra.mxu0 %v1753_v55  ;;  %v1755_v55 = vld [vmem:[%s2388_s17 + $0x8] sm:$0xff] }
 0x3b4   : > { %v1843_v52 = vpop.eup %1842  ;;  %v1062_v59 = vmul.f32 1.442695, %v1061_v58  ;;  %v1752_v58 = vld [vmem:[%s2426_s11 + $0x30] sm:$0xff] }
 0x3b5   : > { %v999_v53 = vsel %vm681_vm0, %v1843_v52, 0.0 }
 0x3b6   : > { %1000 = vadd.xlane.f32.xlu1 %v999_v53  ;;  %875 = vadd.xlane.f32.xlu2 %v874_v54  ;;  %1844 = vpow2.f32 %v1062_v59  ;;  %v1745_v53 = vld [vmem:[%s2425_s9 + $0x8] sm:$0xff]  ;;  %v1744_v54 = vld [vmem:[%s2425_s9] sm:$0xff] }
 0x3b7   : > { %1207 = vmatpush.bf16.msra.mxu2 %v1745_v53  ;;  %1285 = vmatpush.bf16.msra.mxu0 %v1752_v58  ;;  %v1974_v58 = vmov 0  }
 0x3b8   : > { %1818 = vset.pattern.permute.xlu0 %v1974_v58 }
 0x3bb   : > { %1208 = vmatpush.bf16.msra.mxu2 %v1744_v54 }
 0x3bc   : > { %v1845_v60 = vpop.eup %1844 }
 0x3bd   : > { %v1064_v61 = vsel %vm681_vm0, %v1845_v60, 0.0 }
 0x3c9   : > { %v882_v56 = vpop.permute.xlu1 %881 }
 0x3ca   : > { %v888_v57 = vsel %vm886_vm10, %v882_v56, 0 }
 0x3cb   : > { %897 = vmatpush.bf16.msra.mxu3 %v888_v57 }
 0x3ce   : > { %942 = vrot.lane.b32.xlu2 %v2177_v7, %s1969_s29  ;;  %s1733_s29 = sshll.u32 %s2106_s3, 3  ;;  %s1882_s3 = scalar_lea.hbm %s2390_s19, 16 }
 0x3f7   : > { %1065 = vadd.xlane.f32.xlu2 %v1064_v61  ;;  %v1750_v61 = vld [vmem:[%s2426_s11 + $0x20] sm:$0xff] }
 0x421   : > { %v936_v62 = vpop.xlane.xlu2 %935 }
 0x422   : > { %1846 = vrcp.f32 %v936_v62 }
 0x428   : > { %v1847_v0 = vpop.eup %1846 }
 0x429   : > { %v938_v1 = vmul.f32 %v1847_v0, %v1839_v48  ;;  %v876_v2 = vpop.xlane.xlu2 %875  ;;  %v1001_v3 = vpop.xlane.xlu1 %1000 }
 0x42a   : > { %1848 = vrcp.f32 %v876_v2 }
 0x42b   : > { %1664 = vst.msk [vmem:[%s677_s4 + $0x8] sm:$0xff] %vm681_vm0, %v938_v1  ;;  %1850 = vrcp.f32 %v1001_v3  ;;  %v941_v14 = vpack.c.bf16 %v938_v1, %v938_v1  ;;  %v1749_v1 = vld [vmem:[%s2426_s11 + $0x18] sm:$0xff] }
 0x430   : > { %v1849_v4 = vpop.eup %1848 }
 0x431   : > { %v1851_v5 = vpop.eup %1850  ;;  %v943_v6 = vpop.permute.xlu2 %942  ;;  %v878_v7 = vmul.f32 %v1849_v4, %v1841_v51  ;;  %v1748_v4 = vld [vmem:[%s2426_s11 + $0x10] sm:$0xff] }
 0x432   : > { %v1003_v9 = vmul.f32 %v1851_v5, %v1843_v52  ;;  %v948_v10 = vsel %vm886_vm10, %v943_v6, 0 }
 0x433   : > { %957 = vmatpush.bf16.msrb.mxu3 %v948_v10  ;;  %879 = vst.msk [vmem:[%s677_s4] sm:$0xff] %vm681_vm0, %v878_v7  ;;  %v880_v11 = vpack.c.bf16 %v878_v7, %v878_v7  ;;  %v1823_v7 = vld [vmem:[%s2427_s7] ss:$0 sm:$0xff]  ;;  %s1478_s7 = scalar_lea.sflag [#allocation4], %s2306_s28 }
 0x434   : > { %1667 = vst.msk [vmem:[%s677_s4 + $0x10] sm:$0xff] %vm681_vm0, %v1003_v9  ;;  %v1006_v12 = vpack.c.bf16 %v1003_v9, %v1003_v9  ;;  %v1824_v9 = vld [vmem:[%s2428_s8] ss:$0 sm:$0xff] }
 0x435   : > { %1662 = vmatmul.msk.bf16.vlgmr.msra.gmra.mxu3 %vm681_vm0, %v880_v11 }
 0x436   : > { %1668 = vmatmul.msk.bf16.vlgmr.msrb.gmra.mxu2 %vm681_vm0, %v1006_v12 }
 0x437   : > { %1087 = vmatpush.bf16.msra.mxu3 %v1078_v13 }
 0x445   : > { %1665 = vmatmul.msk.bf16.vlgmr.msrb.gmra.mxu3 %vm681_vm0, %v941_v14  ;;  %v1747_v14 = vld [vmem:[%s2426_s11 + $0x8] sm:$0xff] }
 0x446   : > { %1393 = vmatpush.bf16.msrb.mxu3 %v1755_v55 }
 0x46a   : > { %v1066_v15 = vpop.xlane.xlu2 %1065 }
 0x46b   : > { %1852 = vrcp.f32 %v1066_v15  ;;  %v1746_v15 = vld [vmem:[%s2426_s11] sm:$0xff] }
 0x46c   : > { %1854 = vrcp.f32 %v1973_v41 }
 0x471   : > { %v1853_v16 = vpop.eup %1852 }
 0x472   : > { %v1068_v17 = vmul.f32 %v1853_v16, %v1845_v60  ;;  %v1855_v42 = vpop.eup %1854  ;;  %v1751_v60 = vld [vmem:[%s2426_s11 + $0x28] sm:$0xff]  ;;  %v1825_v16 = vld [vmem:[%s2429_s10] ss:$0 sm:$0xff] }
 0x473   : > { %v1144_v43 = vmul.f32 32.0, %v1855_v42  ;;  %vm1148_vm14 = vweird.f32 %v1855_v42  ;;  %1286 = vmatpush.bf16.msra.mxu0 %v1751_v60 }
 0x474   : > { %1670 = vst.msk [vmem:[%s677_s4 + $0x18] sm:$0xff] %vm681_vm0, %v1068_v17  ;;  %v1071_v19 = vpack.c.bf16 %v1068_v17, %v1068_v17 }
 0x475   : > { %v1145_v45 = vsub.f32 1.0, %v1144_v43  ;;  %v1827_v43 = vld [vmem:[%s2384_s13] ss:$0 sm:$0xff] }
 0x476   : > { %1671 = vmatmul.msk.bf16.vlgmr.msra.gmra.mxu3 %vm681_vm0, %v1071_v19 }
 0x477   : > { %v1146_v46 = vmul.f32 %v1855_v42, %v1145_v45  ;;  %1287 = vmatpush.bf16.msra.mxu0 %v1750_v61 }
 0x479   : > { %v1147_v47 = vadd.f32 %v1855_v42, %v1146_v46  ;;  %v1828_v46 = vld [vmem:[%s2385_s14] ss:$0 sm:$0xff] }
 0x47b   : > { %v2235_v48 = vsel %vm1148_vm14, %v1855_v42, %v1147_v47  ;;  %1288 = vmatpush.bf16.msra.mxu0 %v1749_v1 }
 0x47f   : > { %1289 = vmatpush.bf16.msra.mxu0 %v1748_v4  ;;  %v1830_v4 = vld [vmem:[%s2387_s16] ss:$0 sm:$0xff] }
 0x483   : > { %1290 = vmatpush.bf16.msra.mxu0 %v1747_v14 }
 0x487   : > { %1291 = vmatpush.bf16.msra.mxu0 %v1746_v15 }
 0x4b8   : > { %v899_v20 = vpop.f32.mrf.mxu3 }
 0x4b9   : > { %903 = vst.msk [vmem:[#allocation2] sm:$0xff] %vm681_vm0, %v899_v20  ;;  %v1024_v21 = vpop.f32.mrf.mxu2 }
 0x4ba   : > { %1029 = vrot.lane.b32.xlu0 %v1024_v21, %s1970_s23  ;;  %s1498_s23 = scalar_lea.hbm %s2390_s19, %s1733_s29 }
 0x4bb   : > { %s1502_s6 = sshll.u32 %s1498_s23, 4  ;;  %s1503_s6 = int_to_ptr.hbm [resolvable:$true] %s1502_s6 }
 0x4bc   : > { %s1876_s8 = sshra.s32 %s1503_s6, 4  ;;  %s1877_s8 = int_to_ptr.hbm [resolvable:$true] %s1876_s8 }
 0x4bd   : > { %p1883_p0 = scmp.lt.s32.totalorder %s1877_s8, %s2390_s19 }
 0x4c0   : > { %v901_v22 = vpop.f32.mrf.mxu3 }
 0x4c1   : > { %v1026_v23 = vpop.f32.mrf.mxu2 }
 0x4c2   : > { %v1826_v23 = vld [vmem:[%s2430_s12] ss:$0 sm:$0xff] }
 0x4c8   : > { %v959_v24 = vpop.f32.mrf.mxu3 }
 0x4c9   : > { %964 = vrot.lane.b32.xlu1 %v959_v24, %s1971_s24 }
 0x4d0   : > { %v961_v25 = vpop.f32.mrf.mxu3 }
 0x4f9   : > { %v1089_v26 = vpop.f32.mrf.mxu3 }
 0x4fa   : > { %1094 = vrot.lane.b32.xlu0 %v1089_v26, %s1972_s26  ;;  %s2399_s26 = sshll.u32 %s2306_s28, 3 }
 0x4fb   : > { %s653_s1 = scalar_lea.vmem [#allocation3], %s2399_s26  ;;  %s1878_s26 = scalar_lea.hbm %s1877_s8, 8 }
 0x4fc   : > { %s1500_s24 = sshll.u32 %s653_s1, 4  ;;  %p1879_p11 = scmp.ne.s32.totalorder %s1877_s8, %s1878_s26  ;;  %s1501_s24 = int_to_ptr.vmem [resolvable:$true] %s1500_s24 }
 0x4fd   : > { %p1884_p1 = scmp.lt.s32.totalorder %s1882_s3, %s1878_s26 }
 0x4fe   : > { %p1880_p12 = pnand %p1879_p11, %p2123_p5 }
 0x4ff   : > { %p1885_p2 = por %p1884_p1, %p1883_p0 }
 0x500   : > { %p1881_p13 = pneg %p1880_p12 }
 0x501   : > { %v1091_v27 = vpop.f32.mrf.mxu3 }
 0x502   : > { %p1886_p3 = pnand %p1885_p2, %p1881_p13 }
 0x52c   : > { %v1030_v30 = vpop.permute.xlu0 %1029 }
 0x53b   : > { %v965_v29 = vpop.permute.xlu1 %964 }
 0x53c   : > { %968 = vst.msk [vmem:[#allocation2] sm:$0xff] %vm967_vm11, %v965_v29 }
 0x53d   : > { %1033 = vst.msk [vmem:[#allocation2] sm:$0xff] %vm1032_vm12, %v1030_v30 }
 0x56c   : > { %v1095_v32 = vpop.permute.xlu0 %1094 }
 0x56d   : > { %1098 = vst.msk [vmem:[#allocation2] sm:$0xff] %vm1097_vm13, %v1095_v32 }
 0x574   : > { %v1099_v33 = vld [vmem:[#allocation2] sm:$0xff] }
 0x575   : > { %v1104_v34 = vpack.c.bf16 %v1099_v33, %v1099_v33 }
 0x577   : > { %1680 = vmatmul.msk.bf16.vlgmr.msrb.gmra.mxu1 %vm825_vm9, %v1104_v34 }
 0x5f4   : > { %v1133_v36 = vpop.f32.mrf.mxu1 }
 0x5f5   : > { %v1134_v37 = vadd.f32 %v1822_v35, %v1133_v36 }
 0x5f7   : > { %v1137_v38 = vadd.f32 %v1134_v37, %v2169_v63 }
 0x5f9   : > { %v1140_v39 = vsel %vm825_vm9, %v1137_v38, 0.0 }
 0x5fa   : > { %1141 = vadd.xlane.f32.xlu2 %v1140_v39 }
 0x5fc   : > { %v1135_v40 = vpop.f32.mrf.mxu1 }
 0x66d   : > { %v1142_v49 = vpop.xlane.xlu2 %1141 }
 0x66e   : > { %v1150_v50 = vmul.f32 %v2235_v48, %v1142_v49 }
 0x670   : > { %v1151_v51 = vsub.f32 %v1137_v38, %v1150_v50 }
 0x672   : > { %v1152_v52 = vmul.f32 %v1151_v51, %v1151_v51 }
 0x674   : > { %v1153_v63 = vsel %vm825_vm9, %v1152_v52, 0.0 }
 0x675   : > { %1154 = vadd.xlane.f32.xlu0 %v1153_v63 }
 0x6e8   : > { %v1155_v56 = vpop.xlane.xlu0 %1154 }
 0x6e9   : > { %v1156_v57 = vmul.f32 %v1155_v56, %v2235_v48  ;;  %v1754_v56 = vld [vmem:[%s2388_s17] sm:$0xff] }
 0x6ea   : > { %1394 = vmatpush.bf16.msrb.mxu3 %v1754_v56 }
 0x6eb   : > { %v1157_v59 = vadd.f32 1e-05, %v1156_v57 }
 0x6ed   : > { %1856 = vrsqrt.f32 %v1157_v59  ;;  %vm1164_vm0 = vweird.f32 %v1157_v59 }
 0x6f3   : > { %v1857_v62 = vpop.eup %1856 }
 0x6f4   : > { %v1159_v0 = vmul.f32 %v1857_v62, %v1157_v59  ;;  %vm1165_vm15 = vweird.f32 %v1857_v62 }
 0x6f5   : > { %vm1166_vm1 = vmor %vm1164_vm0, %vm1165_vm15 }
 0x6f6   : > { %v1160_v2 = vmul.f32 %v1857_v62, %v1159_v0 }
 0x6f8   : > { %v1161_v3 = vmul.f32 0.5, %v1160_v2 }
 0x6fa   : > { %v1162_v5 = vsub.f32 1.5, %v1161_v3  ;;  %v1829_v3 = vld [vmem:[%s2386_s15] ss:$0 sm:$0xff] }
 0x6fc   : > { %v1163_v6 = vmul.f32 %v1857_v62, %v1162_v5 }
 0x6fe   : > { %v1167_v8 = vsel %vm1166_vm1, %v1857_v62, %v1163_v6 }
 0x6ff   : > { %v1168_v10 = vmul.f32 %v1167_v8, %v1151_v51 }
 0x701   : > { %v1172_v11 = vmul.f32 %v1823_v7, %v1168_v10 }
 0x703   : > { %v1176_v12 = vadd.f32 %v1824_v9, %v1172_v11 }
 0x705   : > { %v1181_v13 = vpack.c.bf16 %v1176_v12, %v1176_v12 }
 0x707   : > { %1689 = vmatmul.msk.bf16.vlgmr.msra.gmra.mxu2 %vm825_vm9, %v1181_v13 }
 0x78a   : > { %v1210_v17 = vpop.f32.mrf.mxu2 }
 0x78b   : > { %v1211_v19 = vadd.f32 %v1825_v16, %v1210_v17 }
 0x78d   : > { %v1214_v20 = vmax.f32 %v1211_v19, 0.0 }
 0x78f   : > { %v1231_v21 = vpack.c.bf16 %v1214_v20, %v1214_v20 }
 0x791   : > { %1292 = vmatmul.bf16.vlgmr.msra.gmra.mxu0 %v1231_v21 }
 0x792   : > { %v1212_v22 = vpop.f32.mrf.mxu2 }
 0x80e   : > { %v1293_v24 = vpop.f32.mrf.mxu0 }
 0x80f   : > { %v1294_v25 = vadd.f32 %v1826_v23, %v1293_v24 }
 0x811   : > { %v1297_v26 = vadd.f32 %v1294_v25, %v1176_v12 }
 0x813   : > { %v1300_v27 = vsel %vm825_vm9, %v1297_v26, 0.0 }
 0x814   : > { %1301 = vadd.xlane.f32.xlu2 %v1300_v27 }
 0x816   : > { %v1295_v28 = vpop.f32.mrf.mxu0 }
 0x887   : > { %v1302_v29 = vpop.xlane.xlu2 %1301 }
 0x888   : > { %v1303_v30 = vmul.f32 %v1302_v29, %v2235_v48 }
 0x88a   : > { %v1304_v31 = vsub.f32 %v1297_v26, %v1303_v30 }
 0x88c   : > { %v1305_v32 = vmul.f32 %v1304_v31, %v1304_v31 }
 0x88e   : > { %v1306_v33 = vsel %vm825_vm9, %v1305_v32, 0.0 }
 0x88f   : > { %1307 = vadd.xlane.f32.xlu1 %v1306_v33 }
 0x8c9   : > { %1438 = vxpose.xlu1.b32.start.end [1/1] (short) (narrow) %v2143_v18, 8 }
 0x902   : > { %v1308_v34 = vpop.xlane.xlu1 %1307 }
 0x903   : > { %v1309_v35 = vmul.f32 %v1308_v34, %v2235_v48 }
 0x905   : > { %v1310_v36 = vadd.f32 1e-05, %v1309_v35 }
 0x907   : > { %1858 = vrsqrt.f32 %v1310_v36  ;;  %vm1317_vm3 = vweird.f32 %v1310_v36 }
 0x90d   : > { %v1859_v37 = vpop.eup %1858 }
 0x90e   : > { %v1312_v38 = vmul.f32 %v1859_v37, %v1310_v36  ;;  %vm1318_vm2 = vweird.f32 %v1859_v37 }
 0x90f   : > { %vm1319_vm4 = vmor %vm1317_vm3, %vm1318_vm2 }
 0x910   : > { %v1313_v39 = vmul.f32 %v1859_v37, %v1312_v38 }
 0x912   : > { %v1314_v40 = vmul.f32 0.5, %v1313_v39 }
 0x914   : > { %v1315_v41 = vsub.f32 1.5, %v1314_v40 }
 0x916   : > { %v1316_v42 = vmul.f32 %v1859_v37, %v1315_v41 }
 0x918   : > { %v1320_v45 = vsel %vm1319_vm4, %v1859_v37, %v1316_v42 }
 0x919   : > { %v1321_v18 = vmul.f32 %v1320_v45, %v1304_v31 }
 0x91b   : > { %v1325_v47 = vmul.f32 %v1827_v43, %v1321_v18 }
 0x91d   : > { %v1329_v49 = vadd.f32 %v1828_v46, %v1325_v47 }
 0x91f   : > { %v1332_v50 = vsel %vm825_vm9, %v1329_v49, 0.0 }
 0x920   : > { %1333 = vadd.xlane.f32.xlu2 %v1332_v50 }
 0x96d   : > { %v1454_v9 = vpop.trf.xlu1 }
 0x993   : > { %v1334_v51 = vpop.xlane.xlu2 %1333 }
 0x994   : > { %v1335_v52 = vmul.f32 %v1334_v51, %v2235_v48 }
 0x996   : > { %v1336_v63 = vsub.f32 %v1329_v49, %v1335_v52 }
 0x998   : > { %v1337_v53 = vmul.f32 %v1336_v63, %v1336_v63 }
 0x99a   : > { %v1338_v54 = vsel %vm825_vm9, %v1337_v53, 0.0 }
 0x99b   : > { %1339 = vadd.xlane.f32.xlu2 %v1338_v54 }
 0x9c4   : > { %1400 = vxpose.xlu2.b32.start.end [1/1] (short) (narrow) %v2152_v44, 8 }
 0xa0e   : > { %v1340_v57 = vpop.xlane.xlu2 %1339 }
 0xa0f   : > { %v1341_v59 = vmul.f32 %v1340_v57, %v2235_v48 }
 0xa11   : > { %v1342_v60 = vadd.f32 1e-05, %v1341_v59 }
 0xa13   : > { %1860 = vrsqrt.f32 %v1342_v60  ;;  %vm1349_vm6 = vweird.f32 %v1342_v60 }
 0xa19   : > { %v1861_v61 = vpop.eup %1860 }
 0xa1a   : > { %v1344_v44 = vmul.f32 %v1861_v61, %v1342_v60  ;;  %vm1350_vm5 = vweird.f32 %v1861_v61 }
 0xa1b   : > { %vm1351_vm7 = vmor %vm1349_vm6, %vm1350_vm5 }
 0xa1c   : > { %v1345_v62 = vmul.f32 %v1861_v61, %v1344_v44 }
 0xa1e   : > { %v1346_v0 = vmul.f32 0.5, %v1345_v62 }
 0xa20   : > { %v1347_v1 = vsub.f32 1.5, %v1346_v0 }
 0xa22   : > { %v1348_v2 = vmul.f32 %v1861_v61, %v1347_v1 }
 0xa24   : > { %v1352_v48 = vsel %vm1351_vm7, %v1861_v61, %v1348_v2 }
 0xa25   : > { %v1353_v5 = vmul.f32 %v1352_v48, %v1336_v63 }
 0xa26   : > { %1819 = vset.pattern.permute.xlu2 %v1974_v58 }
 0xa27   : > { %v1357_v6 = vmul.f32 %v1829_v3, %v1353_v5 }
 0xa29   : > { %v1361_v7 = vadd.f32 %v1830_v4, %v1357_v6 }
 0xa2b   : > { %v1367_v8 = vpack.c.bf16 %v1361_v7, %v1361_v7  ;;  %1362 = vst.msk [vmem:[%s653_s1] sm:$0xff] %vm825_vm9, %v1361_v7 }
 0xa2d   : > { %1730 = vmatmul.msk.bf16.vlgmr.msrb.gmra.mxu3 %vm825_vm9, %v1367_v8  ;;  %1472 = vperm.xlu2 %1819, %v1454_v9  }
 0xa2e   : > { %1889 = shalt.err (!%p1886_p3)
}
 0xa2f   : > { %1756 = dma.vmem_to_hbm [thread:$0]  (%p2123_p5), %s1501_s24, 128, %s1503_s6, %s1478_s7   ;;  %v1831_v13 = vld [vmem:[%s2389_s18] ss:$0 sm:$0xff] }
 0xa30   : > { %s1512_s8 = scalar_lea.hbm %s2391_s20, %s1733_s29  ;;  %s2431_s12 = sshll.u32 %s2306_s28, 3 }
 0xa31   : > { %s660_s26 = scalar_lea.vmem [#allocation5], %s2431_s12  ;;  %s1516_s7 = sshll.u32 %s1512_s8, 4  ;;  %s1517_s7 = int_to_ptr.hbm [resolvable:$true] %s1516_s7 }
 0xa32   : > { %s1514_s6 = sshll.u32 %s660_s26, 4  ;;  %s1483_s0 = scalar_lea.sflag [#allocation6], %s2306_s28  ;;  %s1515_s6 = int_to_ptr.vmem [resolvable:$true] %s1514_s6 }
 0xa33   : > { %s1904_s4 = sshra.s32 %s1517_s7, 4  ;;  %s1910_s3 = scalar_lea.hbm %s2391_s20, 16  ;;  %s1905_s4 = int_to_ptr.hbm [resolvable:$true] %s1904_s4 }
 0xa34   : > { %s1906_s23 = scalar_lea.hbm %s1905_s4, 8  ;;  %p1911_p9 = scmp.lt.s32.totalorder %s1905_s4, %s2391_s20 }
 0xa35   : > { %p1907_p4 = scmp.ne.s32.totalorder %s1905_s4, %s1906_s23  ;;  %p1912_p10 = scmp.lt.s32.totalorder %s1910_s3, %s1906_s23 }
 0xa37   : > { %p1908_p7 = pnand %p1907_p4, %p2123_p5  ;;  %p1913_p11 = por %p1912_p10, %p1911_p9 }
 0xa39   : > { %p1909_p8 = pneg %p1908_p7 }
 0xa3b   : > { %p1914_p12 = pnand %p1913_p11, %p1909_p8 }
 0xa5d   : > { %v1416_v10 = vpop.trf.xlu2 }
 0xa5e   : > { %1434 = vperm.xlu0 %1818, %v1416_v10  }
 0xa87   : > { %v1473_v16 = vpop.permute.xlu2 %1472 }
 0xab0   : > { %v1396_v11 = vpop.f32.mrf.mxu3 }
 0xab1   : > { %v1397_v14 = vadd.f32 %v1831_v13, %v1396_v11 }
 0xab8   : > { %v1398_v12 = vpop.f32.mrf.mxu3 }
 0xad0   : > { %v1435_v15 = vpop.permute.xlu0 %1434 }
 0xad1   : > { %v1437_v17 = vmul.f32 %v1435_v15, %v1397_v14 }
 0xad3   : > { %v1475_v19 = vadd.f32 %v1473_v16, %v1437_v17 }
 0xad5   : > { %1476 = vst.msk [vmem:[%s660_s26] sm:$0xff] %vm787_vm8, %v1475_v19 }
 0xad6   : > { %1917 = shalt.err (!%p1914_p12)
}
 0xad7   : > { %1757 = dma.vmem_to_hbm [thread:$0]  (%p2123_p5), %s1515_s6, 128, %s1517_s7, %s1483_s0  }
 0xad8 PF: > { %p1767_p13 = scmp.ge.s32.totalorder %s1956_s27, 2  ;;  %s1531_s28 = sand.u32 1, %s1944_s2  }
 0xad9   : > { %s1532_s10 = scalar_lea.sflag [#allocation4], %s1531_s28 }
 0xada   : > { %p1761_p0 = pnand %p1767_p13, %p2127_p6 }
 0xadc   : > { %p1762_p1 = pneg %p1761_p0 }
 0xade   : > { %1935 = dma.done.wait (%p1762_p1), %s1532_s10, 128  }
 0xadf   : > { %1937 = vsyncadd (%p1762_p1), %s1532_s10, 4294967168  ;;  %s1542_s11 = scalar_lea.sflag [#allocation6], %s1531_s28 }
 0xae0   : > { %1939 = dma.done.wait (%p1762_p1), %s1542_s11, 128  }
 0xae1   : > { %1941 = vsyncadd (%p1762_p1), %s1542_s11, 4294967168  ;;  %s2432_s27 = sld [smem:[#allocation10_spill]]  ;;  %s2435_s2 = smov %s1948_s25 }
 0xae2   : > { %s2433_s8 = sld [smem:[#allocation9_spill]] }
 0xae3   : > { %s2434_s26 = sld [smem:[#allocation11_spill]] }
 0xae7   : > { %p35_p5 = scmp.ge.s32.totalorder %s2432_s27, 4  }
 0xae8   : > { %s2436_s25 = smov %s2433_s8 }
 0xae9   :  { %37 = sbr.rel (!%p35_p5) target bundleno = 19 (0x13), region = 163 }
 0xaee   :  { %1556 = vsyncpa [#allocation4], 1 }
 0xaef   :  { %1558 = vsyncpa [#allocation4 + $0x1], 1 }
 0xaf0   :  { %1559 = vsyncpa [#allocation6], 1 }
 0xaf1   :  { %1561 = vsyncpa [#allocation6 + $0x1], 1 }

// kernel: dual_forward.3
= control target key start
LH: loop header
LB: loop body
LE: loop exit
PB: predicated region body
PF: predicated region fallthrough
CT: control target
= control target key end

     0   :  { %s2184_s0 = inlined_call_operand.vmem [shape: f32[2,8,32], index: 0, kind: input, shape index: {}]   ;;  %s2185_s1 = inlined_call_operand.vmem [shape: bf16[32,32], index: 1, kind: input, shape index: {}]   ;;  %s2186_s2 = inlined_call_operand.vmem [shape: f32[1,32], index: 2, kind: input, shape index: {}]   ;;  %s2187_s3 = inlined_call_operand.vmem [shape: bf16[1,32,96], index: 3, kind: input, shape index: {}]   ;;  %s2188_s4 = inlined_call_operand.vmem [shape: f32[1,1,96], index: 4, kind: input, shape index: {}]   ;;  %s2189_s5 = inlined_call_operand.vmem [shape: bf16[1,32,32], index: 5, kind: input, shape index: {}]   ;;  %s2190_s6 = inlined_call_operand.vmem [shape: f32[1,1,32], index: 6, kind: input, shape index: {}]   ;;  %s2191_s7 = inlined_call_operand.vmem [shape: f32[1,1,32], index: 7, kind: input, shape index: {}]   ;;  %s2192_s8 = inlined_call_operand.vmem [shape: f32[1,1,32], index: 8, kind: input, shape index: {}]   ;;  %s2193_s9 = inlined_call_operand.vmem [shape: bf16[1,32,128], index: 9, kind: input, shape index: {}]   ;;  %s2194_s10 = inlined_call_operand.vmem [shape: f32[1,1,128], index: 10, kind: input, shape index: {}]   ;;  %s2195_s11 = inlined_call_operand.vmem [shape: bf16[1,128,32], index: 11, kind: input, shape index: {}]   ;;  %s2196_s12 = inlined_call_operand.vmem [shape: f32[1,1,32], index: 12, kind: input, shape index: {}]   ;;  %s2197_s13 = inlined_call_operand.vmem [shape: f32[1,1,32], index: 13, kind: input, shape index: {}]   ;;  %s2198_s14 = inlined_call_operand.vmem [shape: f32[1,1,32], index: 14, kind: input, shape index: {}]   ;;  %s2199_s15 = inlined_call_operand.vmem [shape: f32[1,32], index: 15, kind: input, shape index: {}]   ;;  %s2200_s16 = inlined_call_operand.vmem [shape: f32[1,32], index: 16, kind: input, shape index: {}]   ;;  %s2201_s17 = inlined_call_operand.vmem [shape: bf16[32,16], index: 17, kind: input, shape index: {}]   ;;  %s2202_s18 = inlined_call_operand.vmem [shape: f32[1,16], index: 18, kind: input, shape index: {}]   ;;  %s2203_s19 = inlined_call_operand.hbm [shape: f32[2,8,32], index: 19, kind: output, shape index: {0}]   ;;  %s2204_s20 = inlined_call_operand.hbm [shape: f32[2,8,16], index: 20, kind: output, shape index: {1}]   ;;  %s2205_s21 = inlined_call_operand.vmem [shape: f32[2,4,8,8], index: 21, kind: output, shape index: {2}]  }
   0x1   :  { %2217 = sst [smem:[#allocation15_spill]] %s2184_s0 }
   0x2   :  { %2218 = sst [smem:[#allocation16_spill]] %s2185_s1 }
   0x3   :  { %2219 = sst [smem:[#allocation17_spill]] %s2186_s2 }
   0x4   :  { %2220 = sst [smem:[#allocation18_spill]] %s2187_s3 }
   0x5   :  { %2221 = sst [smem:[#allocation19_spill]] %s2188_s4 }
   0x6   :  { %2222 = sst [smem:[#allocation20_spill]] %s2189_s5 }
   0x7   :  { %2223 = sst [smem:[#allocation21_spill]] %s2190_s6 }
   0x8   :  { %2224 = sst [smem:[#allocation22_spill]] %s2191_s7 }
   0x9   :  { %2225 = sst [smem:[#allocation23_spill]] %s2192_s8 }
   0xa   :  { %2226 = sst [smem:[#allocation24_spill]] %s2193_s9 }
   0xb   :  { %2227 = sst [smem:[#allocation25_spill]] %s2194_s10 }
   0xc   :  { %2228 = sst [smem:[#allocation26_spill]] %s2195_s11 }
   0xd   :  { %27 = vsyncpa [#allocation4], 0 }
   0xe   :  { %29 = vsyncpa [#allocation4 + $0x1], 0 }
   0xf   :  { %30 = vsyncpa [#allocation6], 0 }
  0x10   :  { %32 = vsyncpa [#allocation6 + $0x1], 0  ;;  %s1911_s2 = smov 0   ;;  %s1913_s25 = smov 0  }
  0x11   :  { %s1915_s26 = smov 0   ;;  %s1917_s27 = smov 0  }
  0x12 LB: > { %2229 = sst [smem:[#allocation9_spill]] %s1772_s2  ;;  %s1932_s3 = sadd.s32 4294967295, %s1784_s27   ;;  %s1784_s27 = sphi %s1917_s27, %s2252_s27   ;;  %s1780_s26 = sphi %s1915_s26, %s2254_s26   ;;  %s1776_s25 = sphi %s1913_s25, %s2256_s25   ;;  %s1772_s2 = sphi %s1911_s2, %s2255_s2  }
  0x13   : > { %2230 = sst [smem:[#allocation10_spill]] %s1780_s26  ;;  %s1473_s28 = sadd.s32 4294967294, %s1784_s27  }
  0x14   : > { %2231 = sst [smem:[#allocation11_spill]] %s1784_s27  ;;  %s1936_s29 = sadd.s32 1, %s1784_s27  }
  0x15   : > { %2232 = sst [smem:[#allocation12_spill]] %s1936_s29  ;;  %s449_s0 = sadd.s32 1, %s1780_s26 }
  0x16   : > { %s446_s4 = ssub.s32 %s1784_s27, %s1936_s29  ;;  %p459_p0 = scmp.ne.s32.totalorder %s1780_s26, %s1776_s25 }
  0x17   : > { %p447_p1 = scmp.eq.s32.totalorder %s446_s4, 0  ;;  %p460_p2 = scmp.eq.s32.totalorder %s1932_s3, 1 }
  0x18   : > { %p465_p3 = scmp.ne.s32.totalorder %s1776_s25, %s1772_s2  ;;  %p466_p4 = scmp.eq.s32.totalorder %s1473_s28, 1 }
  0x19   : > { %s1947_s30 = scalar_select %p447_p1, %s1780_s26, %s449_s0  }
  0x1a   : > { %p1949_p5 = por %p460_p2, %p459_p0  ;;  %p1953_p6 = por %p466_p4, %p465_p3 }
  0x1b   : > { %2233 = sst [smem:[#allocation13_spill]] %s1947_s30  ;;  %p1476_p7 = scmp.ge.s32.totalorder %s1784_s27, 1 }
  0x1c   : > { %s2235_s22 = scalar_select %p1953_p6, 1, 0 }
  0x1d   : > { %p597_p8 = scmp.lt.s32.totalorder %s1784_s27, 3 }
  0x1e   : > { %2236 = sst [smem:[#allocation14_spill]] %s2235_s22 }
  0x1f   : > { %p598_p9 = pnand %p1476_p7, %p597_p8 }
  0x20   : > { %s2237_s24 = sld [smem:[#allocation16_spill]] (!%p598_p9)  ;;  %p666_p10 = scmp.lt.s32.totalorder (!%p598_p9), %s1932_s3, 1 }
  0x21   : > { %601 = sbr.rel (%p598_p9) target bundleno = 2835 (0xb13), region = 96  ;;  %s2238_s4 = sld [smem:[#allocation18_spill]] (!%p598_p9) }
  0x22   : > { %s2239_s1 = sld [smem:[#allocation15_spill]] (!%p598_p9)  ;;  %s1787_s23 = smov (!%p598_p9), 88  }
  0x23   : > { %s1789_s28 = smov (!%p598_p9), 120   ;;  %s1790_s0 = smov (!%p598_p9), 80  }
  0x24   : > { %s1791_s26 = smov (!%p598_p9), 72   ;;  %s1792_s30 = smov (!%p598_p9), 112  }
  0x25   : > { %s1793_s2 = smov (!%p598_p9), 104   ;;  %s2243_s6 = sld [smem:[#allocation21_spill]] (!%p598_p9) }
  0x26   : > { %v1578_v0 = vld [vmem:[%s2237_s24 + $0x8] sm:$0xff]  ;;  %v1577_v2 = vld [vmem:[%s2237_s24] sm:$0xff]  ;;  %s1970_s29 = scalar_select %p666_p10, %s1932_s3, 1  ;;  %vm698_vm0 = vcmask 261120   ;;  %vm797_vm1 = vcmask 1043456   ;;  %vm758_vm2 = vcmask 64512  }
  0x27   : > { %v1580_v1 = vld [vmem:[%s2238_s4 + $0x8] sm:$0xff]  ;;  %708 = vmatpush.bf16.msra.mxu0 %v1578_v0  ;;  %v1579_v5 = vld [vmem:[%s2238_s4] sm:$0xff]  ;;  %s2240_s24 = sld [smem:[#allocation17_spill]]  ;;  %vm878_vm3 = vcmask 130112   ;;  %vm943_vm4 = vcmask 195712   ;;  %vm1008_vm5 = vcmask 261312  }
  0x28   : > { %745 = vmatpush.bf16.msra.mxu1 %v1580_v1  ;;  %s1479_s22 = sshll.u32 %s1970_s29, 3  ;;  %s2244_s9 = sld [smem:[#allocation24_spill]] }
  0x29   : > { %s669_s27 = scalar_lea.vmem %s2239_s1, %s1479_s22  ;;  %s2241_s22 = sld [smem:[#allocation19_spill]] }
  0x2a   : > { %v676_v3 = vld [vmem:[%s669_s27] sm:$0xff]  ;;  %s1788_s1 = smov 96   ;;  %s1576_s27 = sshll.u32 %s1970_s29, 5 }
  0x2b   : > { %709 = vmatpush.bf16.msra.mxu0 %v1577_v2  ;;  %v681_v4 = vpack.c.bf16 %v676_v3, %v676_v3  ;;  %s1794_s29 = smov 56   ;;  %s2245_s11 = sld [smem:[#allocation26_spill]] }
  0x2c   : > { %746 = vmatpush.bf16.msra.mxu1 %v1579_v5  ;;  %s2246_s7 = sld [smem:[#allocation22_spill]] }
  0x2d   : > { %v1654_v6 = vld [vmem:[%s2240_s24] ss:$0 sm:$0xff]  ;;  %s1786_s24 = smov 64   ;;  %s2247_s8 = sld [smem:[#allocation23_spill]] }
  0x2e   : > { %1490 = vmatmul.msk.bf16.vlgmr.msra.gmra.mxu0 %vm698_vm0, %v681_v4  ;;  %s2248_s10 = sld [smem:[#allocation25_spill]] }
  0x2f   : > { %v1655_v11 = vld [vmem:[%s2241_s22] ss:$0 sm:$0xff]  ;;  %s2242_s22 = sld [smem:[#allocation20_spill]] }
  0xab   : > { %v711_v7 = vpop.f32.mrf.mxu0 }
  0xac   : > { %v1983_v8 = vadd.f32 %v1654_v6, %v711_v7 }
  0xae   : > { %v719_v9 = vpack.c.bf16 %v1983_v8, %v1983_v8 }
  0xb0   : > { %1499 = vmatmul.msk.bf16.vlgmr.msra.gmra.mxu1 %vm698_vm0, %v719_v9 }
  0xb3   : > { %v713_v10 = vpop.f32.mrf.mxu0 }
 0x12d   : > { %v748_v12 = vpop.f32.mrf.mxu1 }
 0x12e   : > { %v749_v13 = vadd.f32 %v1655_v11, %v748_v12 }
 0x130   : > { %v752_v14 = vpack.c.bf16 %v749_v13, %v749_v13 }
 0x132   : > { %v754_v15 = vunpack.c.l.b16 %v752_v14 }
 0x134   : > { %v1991_v16 = vpack.c.b16 %v754_v15, %v754_v15 }
 0x135   : > { %v750_v17 = vpop.f32.mrf.mxu1 }
 0x136   : > { %792 = vrot.lane.b32.xlu2 %v1991_v16, %s1786_s24  ;;  %817 = vrot.lane.b32.xlu1 %v1991_v16, %s1787_s23  ;;  %s2015_s23 = scalar_lea.vmem %s2205_s21, %s1576_s27  ;;  %s2124_s24 = sand.u32 1, %s1776_s25  }
 0x137   : > { %756 = vrot.lane.b32.xlu0 %v1991_v16, %s1788_s1  ;;  %s1795_s1 = smov 48  }
 0x13e   : > { %815 = vrot.lane.b32.xlu2 %v1991_v16, %s1789_s28  ;;  %s1796_s28 = smov 40  }
 0x146   : > { %882 = vrot.lane.b32.xlu2 %v1991_v16, %s1790_s0  ;;  %s1797_s0 = smov 8  }
 0x14e   : > { %947 = vrot.lane.b32.xlu2 %v1991_v16, %s1791_s26  ;;  %s1798_s26 = smov 16  }
 0x156   : > { %880 = vrot.lane.b32.xlu2 %v1991_v16, %s1792_s30  ;;  %s1799_s30 = smov 24  }
 0x190   : > { %v793_v18 = vpop.permute.xlu2 %792 }
 0x191   : > { %v799_v19 = vsel %vm797_vm1, %v793_v18, 0 }
 0x192   : > { %808 = vmatpush.bf16.msrb.mxu1 %v799_v19 }
 0x198   : > { %v816_v20 = vpop.permute.xlu2 %815 }
 0x1a0   : > { %v883_v21 = vpop.permute.xlu2 %882 }
 0x1a1   : > { %v888_v22 = vsel %vm758_vm2, %v883_v21, 0 }
 0x1a2   : > { %897 = vmatpush.bf16.xpose.msra.mxu1 %v888_v22 }
 0x1a8   : > { %v948_v23 = vpop.permute.xlu2 %947  ;;  %v818_v24 = vpop.permute.xlu1 %817 }
 0x1a9   : > { %v757_v25 = vpop.permute.xlu0 %756  ;;  %v823_v26 = vsel %vm758_vm2, %v818_v24, 0  ;;  %v953_v27 = vsel %vm758_vm2, %v948_v23, 0 }
 0x1aa   : > { %v763_v28 = vsel %vm758_vm2, %v757_v25, 0  ;;  %832 = vmatpush.bf16.xpose.msra.mxu3 %v823_v26 }
 0x1ab   : > { %772 = vmatpush.bf16.xpose.msra.mxu2 %v763_v28 }
 0x1b0   : > { %v881_v47 = vpop.permute.xlu2 %880 }
 0x1b1   : > { %1502 = vmatmul.msk.bf16.vlgmr.msra.gmra.mxu3 %vm758_vm2, %v816_v20 }
 0x1b2   : > { %962 = vmatpush.bf16.xpose.msrb.mxu3 %v953_v27  ;;  %1500 = vmatmul.msk.bf16.vlgmr.msra.gmra.mxu2 %vm758_vm2, %v752_v14 }
 0x234   : > { %v834_v29 = vpop.f32.mrf.mxu3 }
 0x235   : > { %v774_v30 = vpop.f32.mrf.mxu2  ;;  %v838_v31 = vmul.f32 0.35355338, %v834_v29 }
 0x236   : > { %v778_v32 = vmul.f32 0.35355338, %v774_v30 }
 0x237   : > { %v839_v33 = vsel %vm758_vm2, %v838_v31, -inf }
 0x238   : > { %840 = vmax.xlane.f32.xlu2 %v839_v33  ;;  %v779_v34 = vsel %vm758_vm2, %v778_v32, -inf }
 0x239   : > { %780 = vmax.xlane.f32.xlu0 %v779_v34 }
 0x23c   : > { %v836_v35 = vpop.f32.mrf.mxu3 }
 0x23d   : > { %v776_v36 = vpop.f32.mrf.mxu2  ;;  %v1582_v35 = vld [vmem:[%s2242_s22 + $0x8] sm:$0xff] }
 0x23e   : > { %v1581_v36 = vld [vmem:[%s2242_s22] sm:$0xff] }
 0x2ab   : > { %v841_v50 = vpop.xlane.xlu2 %840 }
 0x2ac   : > { %v781_v37 = vpop.xlane.xlu0 %780  ;;  %v842_v51 = vsub.f32 %v838_v31, %v841_v50 }
 0x2ad   : > { %v782_v38 = vsub.f32 %v778_v32, %v781_v37 }
 0x2ae   : > { %v843_v53 = vmul.f32 1.442695, %v842_v51 }
 0x2af   : > { %v783_v39 = vmul.f32 1.442695, %v782_v38 }
 0x2b1   : > { %1666 = vpow2.f32 %v783_v39 }
 0x2b7   : > { %v1667_v40 = vpop.eup %1666 }
 0x2b8   : > { %v785_v41 = vsel %vm758_vm2, %v1667_v40, 0.0 }
 0x2b9   : > { %786 = vadd.xlane.f32.xlu1 %v785_v41  ;;  %v1656_v41 = vld [vmem:[%s2243_s6] ss:$0 sm:$0xff] }
 0x2d2   : > { %945 = vrot.lane.b32.xlu1 %v1991_v16, %s1793_s2 }
 0x32c   : > { %v787_v42 = vpop.xlane.xlu1 %786 }
 0x32d   : > { %1668 = vrcp.f32 %v787_v42 }
 0x32e   : > { %1670 = vpow2.f32 %v843_v53 }
 0x333   : > { %v1669_v43 = vpop.eup %1668 }
 0x334   : > { %v789_v44 = vmul.f32 %v1669_v43, %v1667_v40  ;;  %v1671_v60 = vpop.eup %1670 }
 0x335   : > { %v845_v62 = vsel %vm758_vm2, %v1671_v60, 0.0 }
 0x336   : > { %790 = vst.msk [vmem:[%s2015_s23] sm:$0xff] %vm758_vm2, %v789_v44  ;;  %v791_v45 = vpack.c.bf16 %v789_v44, %v789_v44 }
 0x338   : > { %1501 = vmatmul.msk.bf16.vlgmr.msrb.gmra.mxu1 %vm758_vm2, %v791_v45 }
 0x339   : > { %1041 = vmatpush.bf16.msrb.mxu1 %v1582_v35 }
 0x33d   : > { %1042 = vmatpush.bf16.msrb.mxu1 %v1581_v36 }
 0x344   : > { %v946_v46 = vpop.permute.xlu1 %945 }
 0x345   : > { %1508 = vmatmul.msk.bf16.vlgmr.msrb.gmra.mxu3 %vm758_vm2, %v946_v46 }
 0x348   : > { %1505 = vmatmul.msk.bf16.vlgmr.msra.gmra.mxu1 %vm758_vm2, %v881_v47  ;;  %v1800_v47 = vmov 32.0  }
 0x3b5   : > { %v810_v48 = vpop.f32.mrf.mxu1 }
 0x3b6   : > { %814 = vst.msk [vmem:[#allocation2] sm:$0xff] %vm758_vm2, %v810_v48 }
 0x3bd   : > { %v812_v49 = vpop.f32.mrf.mxu1 }
 0x3c5   : > { %v899_v52 = vpop.f32.mrf.mxu1 }
 0x3c6   : > { %v903_v54 = vmul.f32 0.35355338, %v899_v52 }
 0x3c8   : > { %v964_v55 = vpop.f32.mrf.mxu3  ;;  %v904_v56 = vsel %vm758_vm2, %v903_v54, -inf }
 0x3c9   : > { %v968_v57 = vmul.f32 0.35355338, %v964_v55  ;;  %905 = vmax.xlane.f32.xlu1 %v904_v56 }
 0x3cb   : > { %v969_v58 = vsel %vm758_vm2, %v968_v57, -inf }
 0x3cc   : > { %970 = vmax.xlane.f32.xlu0 %v969_v58  ;;  %v1584_v58 = vld [vmem:[%s2244_s9 + $0x8] sm:$0xff] }
 0x3cd   : > { %v901_v59 = vpop.f32.mrf.mxu1 }
 0x3ce   : > { %v1583_v59 = vld [vmem:[%s2244_s9] sm:$0xff] }
 0x3d0   : > { %v966_v61 = vpop.f32.mrf.mxu3 }
 0x3d4   : > { %846 = vadd.xlane.f32.xlu0 %v845_v62 }
 0x3e8   : > { %853 = vrot.lane.b32.xlu0 %v1991_v16, %s1794_s29 }
 0x3f0   : > { %918 = vrot.lane.b32.xlu0 %v1991_v16, %s1795_s1 }
 0x43c   : > { %v906_v63 = vpop.xlane.xlu1 %905 }
 0x43d   : > { %v907_v0 = vsub.f32 %v903_v54, %v906_v63  ;;  %v1591_v63 = vld [vmem:[%s2245_s11 + $0x30] sm:$0xff] }
 0x43f   : > { %v908_v1 = vmul.f32 1.442695, %v907_v0  ;;  %v971_v2 = vpop.xlane.xlu0 %970 }
 0x440   : > { %v972_v3 = vsub.f32 %v968_v57, %v971_v2  ;;  %v1589_v2 = vld [vmem:[%s2245_s11 + $0x20] sm:$0xff] }
 0x441   : > { %1672 = vpow2.f32 %v908_v1  ;;  %v1590_v1 = vld [vmem:[%s2245_s11 + $0x28] sm:$0xff] }
 0x442   : > { %v973_v4 = vmul.f32 1.442695, %v972_v3 }
 0x444   : > { %1674 = vpow2.f32 %v973_v4 }
 0x447   : > { %v1673_v5 = vpop.eup %1672  ;;  %v847_v6 = vpop.xlane.xlu0 %846 }
 0x448   : > { %1676 = vrcp.f32 %v847_v6  ;;  %v910_v7 = vsel %vm758_vm2, %v1673_v5, 0.0 }
 0x449   : > { %911 = vadd.xlane.f32.xlu2 %v910_v7 }
 0x44a   : > { %v1675_v9 = vpop.eup %1674 }
 0x44b   : > { %v975_v10 = vsel %vm758_vm2, %v1675_v9, 0.0 }
 0x44c   : > { %976 = vadd.xlane.f32.xlu1 %v975_v10 }
 0x44e   : > { %v1677_v11 = vpop.eup %1676 }
 0x44f   : > { %v849_v12 = vmul.f32 %v1677_v11, %v1671_v60  ;;  %v1592_v60 = vld [vmem:[%s2245_s11 + $0x38] sm:$0xff] }
 0x450   : > { %1195 = vmatpush.bf16.msra.mxu3 %v1592_v60  ;;  %v1593_v60 = vld [vmem:[%s2201_s17] sm:$0xff] }
 0x451   : > { %1503 = vst.msk [vmem:[%s2015_s23 + $0x8] sm:$0xff] %vm758_vm2, %v849_v12  ;;  %v852_v15 = vpack.c.bf16 %v849_v12, %v849_v12  ;;  %v1657_v12 = vld [vmem:[%s2246_s7] ss:$0 sm:$0xff] }
 0x454   : > { %1196 = vmatpush.bf16.msra.mxu3 %v1591_v63 }
 0x458   : > { %1197 = vmatpush.bf16.msra.mxu3 %v1590_v1 }
 0x45a   : > { %v854_v13 = vpop.permute.xlu0 %853 }
 0x45b   : > { %v859_v14 = vsel %vm797_vm1, %v854_v13, 0 }
 0x45c   : > { %868 = vmatpush.bf16.msrb.mxu0 %v859_v14  ;;  %1198 = vmatpush.bf16.msra.mxu3 %v1589_v2  ;;  %v1658_v14 = vld [vmem:[%s2247_s8] ss:$0 sm:$0xff] }
 0x45f   : > { %1504 = vmatmul.msk.bf16.vlgmr.msrb.gmra.mxu0 %vm758_vm2, %v852_v15 }
 0x461   : > { %983 = vrot.lane.b32.xlu2 %v1991_v16, %s1796_s28  ;;  %s1314_s28 = scalar_lea.sflag [#allocation4], %s2124_s24 }
 0x462   : > { %v919_v17 = vpop.permute.xlu0 %918 }
 0x463   : > { %v924_v18 = vsel %vm797_vm1, %v919_v17, 0 }
 0x464   : > { %933 = vmatpush.bf16.msrb.mxu2 %v924_v18 }
 0x468   : > { %1118 = vmatpush.bf16.msra.mxu2 %v1584_v58 }
 0x46c   : > { %1119 = vmatpush.bf16.msra.mxu2 %v1583_v59  ;;  %v1594_v59 = vld [vmem:[%s2201_s17 + $0x8] sm:$0xff] }
 0x4bc   : > { %v912_v19 = vpop.xlane.xlu2 %911 }
 0x4bd   : > { %1678 = vrcp.f32 %v912_v19 }
 0x4bf   : > { %v977_v20 = vpop.xlane.xlu1 %976 }
 0x4c0   : > { %1680 = vrcp.f32 %v977_v20  ;;  %v1586_v20 = vld [vmem:[%s2245_s11 + $0x8] sm:$0xff] }
 0x4c1   : > { %1682 = vrcp.f32 %v1800_v47  ;;  %v1661_v47 = vld [vmem:[%s2197_s13] ss:$0 sm:$0xff] }
 0x4c3   : > { %v1679_v21 = vpop.eup %1678 }
 0x4c4   : > { %v914_v22 = vmul.f32 %v1679_v21, %v1673_v5  ;;  %v984_v23 = vpop.permute.xlu2 %983  ;;  %v1588_v5 = vld [vmem:[%s2245_s11 + $0x18] sm:$0xff]  ;;  %v1585_v21 = vld [vmem:[%s2245_s11] sm:$0xff] }
 0x4c5   : > { %v989_v24 = vsel %vm797_vm1, %v984_v23, 0  ;;  %1199 = vmatpush.bf16.msra.mxu3 %v1588_v5 }
 0x4c6   : > { %v1681_v25 = vpop.eup %1680  ;;  %1506 = vst.msk [vmem:[%s2015_s23 + $0x10] sm:$0xff] %vm758_vm2, %v914_v22  ;;  %998 = vmatpush.bf16.msra.mxu0 %v989_v24  ;;  %v917_v26 = vpack.c.bf16 %v914_v22, %v914_v22  ;;  %v1659_v22 = vld [vmem:[%s2248_s10] ss:$0 sm:$0xff] }
 0x4c7   : > { %v979_v16 = vmul.f32 %v1681_v25, %v1675_v9  ;;  %v1683_v48 = vpop.eup %1682  ;;  %v1587_v9 = vld [vmem:[%s2245_s11 + $0x10] sm:$0xff] }
 0x4c8   : > { %1507 = vmatmul.msk.bf16.vlgmr.msrb.gmra.mxu2 %vm758_vm2, %v917_v26  ;;  %v1055_v49 = vmul.f32 32.0, %v1683_v48  ;;  %vm1059_vm6 = vweird.f32 %v1683_v48 }
 0x4c9   : > { %1509 = vst.msk [vmem:[%s2015_s23 + $0x18] sm:$0xff] %vm758_vm2, %v979_v16  ;;  %v982_v27 = vpack.c.bf16 %v979_v16, %v979_v16  ;;  %1200 = vmatpush.bf16.msra.mxu3 %v1587_v9 }
 0x4ca   : > { %v1056_v50 = vsub.f32 1.0, %v1055_v49  ;;  %1304 = vmatpush.bf16.msrb.mxu0 %v1594_v59 }
 0x4cb   : > { %1510 = vmatmul.msk.bf16.vlgmr.msra.gmra.mxu0 %vm758_vm2, %v982_v27  ;;  %v1660_v27 = vld [vmem:[%s2196_s12] ss:$0 sm:$0xff] }
 0x4cc   : > { %v1057_v51 = vmul.f32 %v1683_v48, %v1056_v50  ;;  %v1662_v50 = vld [vmem:[%s2198_s14] ss:$0 sm:$0xff] }
 0x4cd   : > { %1201 = vmatpush.bf16.msra.mxu3 %v1586_v20 }
 0x4ce   : > { %v1058_v52 = vadd.f32 %v1683_v48, %v1057_v51  ;;  %1305 = vmatpush.bf16.msrb.mxu0 %v1593_v60 }
 0x4d0   : > { %v2055_v53 = vsel %vm1059_vm6, %v1683_v48, %v1058_v52 }
 0x4d1   : > { %1202 = vmatpush.bf16.msra.mxu3 %v1585_v21 }
 0x4dc   : > { %v870_v28 = vpop.f32.mrf.mxu0 }
 0x4dd   : > { %875 = vrot.lane.b32.xlu1 %v870_v28, %s1797_s0  ;;  %s1477_s0 = sshll.u32 %s2124_s24, 3 }
 0x4e4   : > { %v872_v29 = vpop.f32.mrf.mxu0 }
 0x548   : > { %v1000_v30 = vpop.f32.mrf.mxu0 }
 0x54b   : > { %v935_v31 = vpop.f32.mrf.mxu2 }
 0x54c   : > { %940 = vrot.lane.b32.xlu0 %v935_v31, %s1798_s26  ;;  %s651_s26 = scalar_lea.vmem [#allocation3], %s1477_s0 }
 0x54d   : > { %s1336_s29 = sshll.u32 %s651_s26, 4  ;;  %s1337_s29 = int_to_ptr.vmem [resolvable:$true] %s1336_s29 }
 0x54f   : > { %v876_v32 = vpop.permute.xlu1 %875 }
 0x550   : > { %879 = vst.msk [vmem:[#allocation2] sm:$0xff] %vm878_vm3, %v876_v32  ;;  %v1002_v33 = vpop.f32.mrf.mxu0 }
 0x553   : > { %v937_v34 = vpop.f32.mrf.mxu2 }
 0x554   : > { %1005 = vrot.lane.b32.xlu0 %v1000_v30, %s1799_s30  ;;  %s1572_s30 = sshll.u32 %s1932_s3, 3  ;;  %s1710_s3 = scalar_lea.hbm %s2203_s19, 16 }
 0x555   : > { %s1334_s23 = scalar_lea.hbm %s2203_s19, %s1572_s30 }
 0x556   : > { %s1338_s1 = sshll.u32 %s1334_s23, 4  ;;  %s1339_s1 = int_to_ptr.hbm [resolvable:$true] %s1338_s1 }
 0x557   : > { %s1704_s4 = sshra.s32 %s1339_s1, 4  ;;  %s1705_s4 = int_to_ptr.hbm [resolvable:$true] %s1704_s4 }
 0x558   : > { %s1706_s6 = scalar_lea.hbm %s1705_s4, 8  ;;  %p1711_p0 = scmp.lt.s32.totalorder %s1705_s4, %s2203_s19 }
 0x559   : > { %p1707_p11 = scmp.ne.s32.totalorder %s1705_s4, %s1706_s6  ;;  %p1712_p1 = scmp.lt.s32.totalorder %s1710_s3, %s1706_s6 }
 0x55b   : > { %p1708_p12 = pnand %p1707_p11, %p1949_p5  ;;  %p1713_p2 = por %p1712_p1, %p1711_p0 }
 0x55d   : > { %p1709_p13 = pneg %p1708_p12 }
 0x55f   : > { %p1714_p3 = pnand %p1713_p2, %p1709_p13 }
 0x5be   : > { %v941_v37 = vpop.permute.xlu0 %940 }
 0x5bf   : > { %944 = vst.msk [vmem:[#allocation2] sm:$0xff] %vm943_vm4, %v941_v37 }
 0x5c6   : > { %v1006_v38 = vpop.permute.xlu0 %1005 }
 0x5c7   : > { %1009 = vst.msk [vmem:[#allocation2] sm:$0xff] %vm1008_vm5, %v1006_v38 }
 0x5ce   : > { %v1010_v39 = vld [vmem:[#allocation2] sm:$0xff] }
 0x5cf   : > { %v1015_v40 = vpack.c.bf16 %v1010_v39, %v1010_v39 }
 0x5d1   : > { %1519 = vmatmul.msk.bf16.vlgmr.msrb.gmra.mxu1 %vm698_vm0, %v1015_v40 }
 0x64e   : > { %v1044_v42 = vpop.f32.mrf.mxu1 }
 0x64f   : > { %v1045_v43 = vadd.f32 %v1656_v41, %v1044_v42 }
 0x651   : > { %v1048_v44 = vadd.f32 %v1045_v43, %v1983_v8 }
 0x653   : > { %v1051_v45 = vsel %vm698_vm0, %v1048_v44, 0.0 }
 0x654   : > { %1052 = vadd.xlane.f32.xlu0 %v1051_v45 }
 0x656   : > { %v1046_v46 = vpop.f32.mrf.mxu1 }
 0x6c7   : > { %v1053_v54 = vpop.xlane.xlu0 %1052 }
 0x6c8   : > { %v1061_v55 = vmul.f32 %v2055_v53, %v1053_v54 }
 0x6ca   : > { %v1062_v56 = vsub.f32 %v1048_v44, %v1061_v55 }
 0x6cc   : > { %v1063_v57 = vmul.f32 %v1062_v56, %v1062_v56 }
 0x6ce   : > { %v1064_v8 = vsel %vm698_vm0, %v1063_v57, 0.0 }
 0x6cf   : > { %1065 = vadd.xlane.f32.xlu2 %v1064_v8 }
 0x742   : > { %v1066_v61 = vpop.xlane.xlu2 %1065 }
 0x743   : > { %v1067_v62 = vmul.f32 %v1066_v61, %v2055_v53 }
 0x745   : > { %v1068_v0 = vadd.f32 1e-05, %v1067_v62 }
 0x747   : > { %1684 = vrsqrt.f32 %v1068_v0  ;;  %vm1075_vm8 = vweird.f32 %v1068_v0 }
 0x74d   : > { %v1685_v3 = vpop.eup %1684 }
 0x74e   : > { %v1070_v4 = vmul.f32 %v1685_v3, %v1068_v0  ;;  %vm1076_vm7 = vweird.f32 %v1685_v3 }
 0x74f   : > { %vm1077_vm9 = vmor %vm1075_vm8, %vm1076_vm7 }
 0x750   : > { %v1071_v6 = vmul.f32 %v1685_v3, %v1070_v4 }
 0x752   : > { %v1072_v7 = vmul.f32 0.5, %v1071_v6  ;;  %v1663_v6 = vld [vmem:[%s2199_s15] ss:$0 sm:$0xff] }
 0x754   : > { %v1073_v10 = vsub.f32 1.5, %v1072_v7  ;;  %v1664_v7 = vld [vmem:[%s2200_s16] ss:$0 sm:$0xff] }
 0x756   : > { %v1074_v11 = vmul.f32 %v1685_v3, %v1073_v10 }
 0x758   : > { %v1078_v13 = vsel %vm1077_vm9, %v1685_v3, %v1074_v11 }
 0x759   : > { %v1079_v15 = vmul.f32 %v1078_v13, %v1062_v56 }
 0x75b   : > { %v1083_v17 = vmul.f32 %v1657_v12, %v1079_v15 }
 0x75d   : > { %v1087_v18 = vadd.f32 %v1658_v14, %v1083_v17 }
 0x75f   : > { %v1092_v19 = vpack.c.bf16 %v1087_v18, %v1087_v18 }
 0x761   : > { %1528 = vmatmul.msk.bf16.vlgmr.msra.gmra.mxu2 %vm698_vm0, %v1092_v19 }
 0x7e4   : > { %v1121_v23 = vpop.f32.mrf.mxu2 }
 0x7e5   : > { %v1122_v24 = vadd.f32 %v1659_v22, %v1121_v23 }
 0x7e7   : > { %v1125_v25 = vmax.f32 %v1122_v24, 0.0 }
 0x7e9   : > { %v1142_v26 = vpack.c.bf16 %v1125_v25, %v1125_v25 }
 0x7eb   : > { %1203 = vmatmul.bf16.vlgmr.msra.gmra.mxu3 %v1142_v26 }
 0x7ec   : > { %v1123_v16 = vpop.f32.mrf.mxu2 }
 0x86e   : > { %v1204_v28 = vpop.f32.mrf.mxu3 }
 0x86f   : > { %v1205_v29 = vadd.f32 %v1660_v27, %v1204_v28 }
 0x871   : > { %v1208_v30 = vadd.f32 %v1205_v29, %v1087_v18 }
 0x873   : > { %v1211_v31 = vsel %vm698_vm0, %v1208_v30, 0.0 }
 0x874   : > { %1212 = vadd.xlane.f32.xlu1 %v1211_v31 }
 0x876   : > { %v1206_v32 = vpop.f32.mrf.mxu3 }
 0x8e7   : > { %v1213_v33 = vpop.xlane.xlu1 %1212 }
 0x8e8   : > { %v1214_v34 = vmul.f32 %v1213_v33, %v2055_v53 }
 0x8ea   : > { %v1215_v35 = vsub.f32 %v1208_v30, %v1214_v34 }
 0x8ec   : > { %v1216_v36 = vmul.f32 %v1215_v35, %v1215_v35 }
 0x8ee   : > { %v1217_v37 = vsel %vm698_vm0, %v1216_v36, 0.0 }
 0x8ef   : > { %1218 = vadd.xlane.f32.xlu0 %v1217_v37 }
 0x962   : > { %v1219_v38 = vpop.xlane.xlu0 %1218 }
 0x963   : > { %v1220_v39 = vmul.f32 %v1219_v38, %v2055_v53 }
 0x965   : > { %v1221_v40 = vadd.f32 1e-05, %v1220_v39 }
 0x967   : > { %1686 = vrsqrt.f32 %v1221_v40  ;;  %vm1228_vm11 = vweird.f32 %v1221_v40 }
 0x96d   : > { %v1687_v41 = vpop.eup %1686 }
 0x96e   : > { %v1223_v42 = vmul.f32 %v1687_v41, %v1221_v40  ;;  %vm1229_vm10 = vweird.f32 %v1687_v41 }
 0x96f   : > { %vm1230_vm12 = vmor %vm1228_vm11, %vm1229_vm10 }
 0x970   : > { %v1224_v43 = vmul.f32 %v1687_v41, %v1223_v42 }
 0x972   : > { %v1225_v44 = vmul.f32 0.5, %v1224_v43 }
 0x974   : > { %v1226_v45 = vsub.f32 1.5, %v1225_v44 }
 0x976   : > { %v1227_v46 = vmul.f32 %v1687_v41, %v1226_v45 }
 0x978   : > { %v1231_v48 = vsel %vm1230_vm12, %v1687_v41, %v1227_v46 }
 0x979   : > { %v1232_v49 = vmul.f32 %v1231_v48, %v1215_v35 }
 0x97b   : > { %v1236_v51 = vmul.f32 %v1661_v47, %v1232_v49 }
 0x97d   : > { %v1240_v52 = vadd.f32 %v1662_v50, %v1236_v51 }
 0x97f   : > { %v1243_v54 = vsel %vm698_vm0, %v1240_v52, 0.0 }
 0x980   : > { %1244 = vadd.xlane.f32.xlu2 %v1243_v54 }
 0x9f3   : > { %v1245_v55 = vpop.xlane.xlu2 %1244 }
 0x9f4   : > { %v1246_v56 = vmul.f32 %v1245_v55, %v2055_v53 }
 0x9f6   : > { %v1247_v57 = vsub.f32 %v1240_v52, %v1246_v56 }
 0x9f8   : > { %v1248_v8 = vmul.f32 %v1247_v57, %v1247_v57 }
 0x9fa   : > { %v1249_v58 = vsel %vm698_vm0, %v1248_v8, 0.0 }
 0x9fb   : > { %1250 = vadd.xlane.f32.xlu1 %v1249_v58 }
 0xa6e   : > { %v1251_v61 = vpop.xlane.xlu1 %1250 }
 0xa6f   : > { %v1252_v62 = vmul.f32 %v1251_v61, %v2055_v53 }
 0xa71   : > { %v1253_v63 = vadd.f32 1e-05, %v1252_v62 }
 0xa73   : > { %1688 = vrsqrt.f32 %v1253_v63  ;;  %vm1260_vm14 = vweird.f32 %v1253_v63 }
 0xa79   : > { %v1689_v0 = vpop.eup %1688 }
 0xa7a   : > { %v1255_v1 = vmul.f32 %v1689_v0, %v1253_v63  ;;  %vm1261_vm13 = vweird.f32 %v1689_v0 }
 0xa7b   : > { %vm1262_vm15 = vmor %vm1260_vm14, %vm1261_vm13 }
 0xa7c   : > { %v1256_v2 = vmul.f32 %v1689_v0, %v1255_v1 }
 0xa7e   : > { %v1257_v3 = vmul.f32 0.5, %v1256_v2 }
 0xa80   : > { %v1258_v4 = vsub.f32 1.5, %v1257_v3 }
 0xa82   : > { %v1259_v5 = vmul.f32 %v1689_v0, %v1258_v4 }
 0xa84   : > { %v1263_v53 = vsel %vm1262_vm15, %v1689_v0, %v1259_v5 }
 0xa85   : > { %v1264_v9 = vmul.f32 %v1263_v53, %v1247_v57 }
 0xa87   : > { %v1268_v10 = vmul.f32 %v1663_v6, %v1264_v9 }
 0xa89   : > { %v1272_v11 = vadd.f32 %v1664_v7, %v1268_v10 }
 0xa8b   : > { %v1278_v12 = vpack.c.bf16 %v1272_v11, %v1272_v11  ;;  %1273 = vst.msk [vmem:[%s651_s26] sm:$0xff] %vm698_vm0, %v1272_v11 }
 0xa8d   : > { %1569 = vmatmul.msk.bf16.vlgmr.msrb.gmra.mxu0 %vm698_vm0, %v1278_v12 }
 0xa8e   : > { %1717 = shalt.err (!%p1714_p3)
}
 0xa8f   : > { %1595 = dma.vmem_to_hbm [thread:$0]  (%p1949_p5), %s1337_s29, 128, %s1339_s1, %s1314_s28   ;;  %v1665_v13 = vld [vmem:[%s2202_s18] ss:$0 sm:$0xff]  ;;  %vm1311_vm0 = vcmask 130048  }
 0xa90   : > { %s1348_s27 = scalar_lea.hbm %s2204_s20, %s1572_s30  ;;  %s658_s7 = scalar_lea.vmem [#allocation5], %s1477_s0 }
 0xa91   : > { %s1350_s8 = sshll.u32 %s658_s7, 4  ;;  %s1352_s9 = sshll.u32 %s1348_s27, 4  ;;  %s1351_s8 = int_to_ptr.vmem [resolvable:$true] %s1350_s8  ;;  %s1353_s9 = int_to_ptr.hbm [resolvable:$true] %s1352_s9 }
 0xa92   : > { %s1319_s6 = scalar_lea.sflag [#allocation6], %s2124_s24  ;;  %s1732_s10 = sshra.s32 %s1353_s9, 4  ;;  %s1733_s10 = int_to_ptr.hbm [resolvable:$true] %s1732_s10 }
 0xa93   : > { %s1734_s4 = scalar_lea.hbm %s1733_s10, 8  ;;  %s1738_s0 = scalar_lea.hbm %s2204_s20, 16 }
 0xa94   : > { %p1735_p4 = scmp.ne.s32.totalorder %s1733_s10, %s1734_s4  ;;  %p1739_p9 = scmp.lt.s32.totalorder %s1733_s10, %s2204_s20 }
 0xa95   : > { %p1740_p10 = scmp.lt.s32.totalorder %s1738_s0, %s1734_s4 }
 0xa96   : > { %p1736_p7 = pnand %p1735_p4, %p1949_p5 }
 0xa97   : > { %p1741_p11 = por %p1740_p10, %p1739_p9 }
 0xa98   : > { %p1737_p8 = pneg %p1736_p7 }
 0xa9a   : > { %p1742_p12 = pnand %p1741_p11, %p1737_p8 }
 0xb0a   : > { %v1307_v14 = vpop.f32.mrf.mxu0 }
 0xb0b   : > { %v1308_v15 = vadd.f32 %v1665_v13, %v1307_v14 }
 0xb0d   : > { %1312 = vst.msk [vmem:[%s658_s7] sm:$0xff] %vm1311_vm0, %v1308_v15 }
 0xb0e   : > { %1745 = shalt.err (!%p1742_p12)
}
 0xb0f   : > { %1596 = dma.vmem_to_hbm [thread:$0]  (%p1949_p5), %s1351_s8, 128, %s1353_s9, %s1319_s6  }
 0xb12   : > { %v1309_v17 = vpop.f32.mrf.mxu0 }
 0xb13 PF: > { %s2249_s24 = sld [smem:[#allocation11_spill]] }
 0xb14   : > { %s2250_s28 = sld [smem:[#allocation9_spill]] }
 0xb19   : > { %p1606_p13 = scmp.ge.s32.totalorder %s2249_s24, 2 }
 0xb1a   : > { %s1367_s26 = sand.u32 1, %s2250_s28  }
 0xb1b   : > { %p1600_p0 = pnand %p1606_p13, %p1953_p6  ;;  %s1368_s2 = scalar_lea.sflag [#allocation4], %s1367_s26 }
 0xb1d   : > { %p1601_p1 = pneg %p1600_p0 }
 0xb1f   : > { %1763 = dma.done.wait (%p1601_p1), %s1368_s2, 128  }
 0xb20   : > { %1765 = vsyncadd (%p1601_p1), %s1368_s2, 4294967168  ;;  %s1378_s27 = scalar_lea.sflag [#allocation6], %s1367_s26 }
 0xb21   : > { %1767 = dma.done.wait (%p1601_p1), %s1378_s27, 128  }
 0xb22   : > { %1769 = vsyncadd (%p1601_p1), %s1378_s27, 4294967168  ;;  %s2252_s27 = sld [smem:[#allocation12_spill]]  ;;  %s2255_s2 = smov %s1776_s25 }
 0xb23   : > { %s2253_s5 = sld [smem:[#allocation10_spill]] }
 0xb24   : > { %s2254_s26 = sld [smem:[#allocation13_spill]] }
 0xb28   : > { %p35_p5 = scmp.ge.s32.totalorder %s2252_s27, 4  }
 0xb29   : > { %s2256_s25 = smov %s2253_s5 }
 0xb2a   :  { %37 = sbr.rel (!%p35_p5) target bundleno = 18 (0x12), region = 163 }
 0xb2f   :  { %1392 = vsyncpa [#allocation4], 1 }
 0xb30   :  { %1394 = vsyncpa [#allocation4 + $0x1], 1 }
 0xb31   :  { %1395 = vsyncpa [#allocation6], 1 }
 0xb32   :  { %1397 = vsyncpa [#allocation6 + $0x1], 1 }

</bundles_post_ra>
